<compile_context>
chip_gen: v6e
topology: v6e:2x2x1
jax: 0.10.0
libtpu: 0.0.40
codegen_flags: <defaults>
</compile_context>

<pallas_src>
import functools

import jax
import jax.numpy as jnp
from jax.experimental import pallas as pl
from jax.experimental.pallas import tpu as pltpu

I_DIM = 784              # flattened 28x28 image
H_DIM = 256              # hidden widths 1024, 512, 256; final output 1
MAX_TILE_B = 512         # rows per grid step (multiple of 8); fits all gens


def _round_up(x, m):
    return ((x + m - 1) // m) * m


def _ceil_div(a, b):
    return -(-a // b)


def _choose_tile_b(B):
    """Multiple of 8; <= MAX_TILE_B; >= 2 grid steps when B > 16 (v7x 2 TCs);
    minimizes batch padding for mid-size batches."""
    if B <= 8:
        return 8
    n_steps = max(1, _ceil_div(B, MAX_TILE_B))
    if B > 16 and n_steps == 1:
        n_steps = 2                      # let both v7x TensorCores work
    return _round_up(_ceil_div(B, n_steps), 8)


def _leaky_relu(x, alpha=0.2):
    return jnp.where(x >= 0, x, alpha * x)


def discriminator_kernel(x_ref,
                         w1_ref, b1_ref,
                         w2_ref, b2_ref,
                         w3_ref, b3_ref,
                         w4_ref, b4_ref,
                         out_ref):
    # Cast the f32 input tile to bf16 in VMEM (free VPU filler under MXU slack).
    x = x_ref[...].astype(jnp.bfloat16)
    # Layer 1: Linear(784, 1024) + LeakyReLU(0.2)   (bf16 matmul, f32 acc)
    h = jnp.dot(x, w1_ref[...], preferred_element_type=jnp.float32)
    h = _leaky_relu(h + b1_ref[...])
    # Layer 2: Linear(1024, 512) + LeakyReLU(0.2)
    h = jnp.dot(h.astype(jnp.bfloat16), w2_ref[...],
                preferred_element_type=jnp.float32)
    h = _leaky_relu(h + b2_ref[...])
    # Layer 3: Linear(512, 256) + LeakyReLU(0.2)
    h = jnp.dot(h.astype(jnp.bfloat16), w3_ref[...],
                preferred_element_type=jnp.float32)
    h = _leaky_relu(h + b3_ref[...])
    # Layer 4: Linear(256, 1) as VPU multiply + lane reduce (w4 stored (1, 256)).
    out = jnp.sum(h * w4_ref[...], axis=-1, keepdims=True) + b4_ref[...]
    out_ref[...] = out.astype(out_ref.dtype)


@functools.partial(jax.jit, static_argnames=("tile_b",))
def _discriminator_pallas(x, prepped, *, tile_b):
    bp = x.shape[0]
    grid = (bp // tile_b,)

    batch_map = lambda i: (i, 0)
    const_map = lambda i: (0, 0)

    def resident(a):
        # Constant block index + single buffer: DMA'd once, VMEM-resident,
        # no wasted double-buffer VMEM.
        return pl.BlockSpec(a.shape, const_map, pipeline_mode=pl.Buffered(1))

    in_specs = [pl.BlockSpec((tile_b, I_DIM), batch_map)]      # x tile (f32)
    in_specs += [resident(a) for a in prepped]                 # weights/biases

    out_spec = pl.BlockSpec((tile_b, 1), batch_map)

    return pl.pallas_call(
        discriminator_kernel,
        out_shape=jax.ShapeDtypeStruct((bp, 1), jnp.float32),
        grid=grid,
        in_specs=in_specs,
        out_specs=out_spec,
        compiler_params=pltpu.CompilerParams(
            dimension_semantics=("parallel",),
            vmem_limit_bytes=32 * 1024 * 1024,   # overrides v5e's 16 MiB default
        ),
    )(x, *prepped)


def prepare_params(params):
    """One-time weight prep (hoisted out of the forward path):
    bf16 casts for the MXU weights, w4 transposed to a (1, 256) f32 row."""
    (w1, b1), (w2, b2), (w3, b3), (w4, b4) = params
    return (
        w1.astype(jnp.bfloat16), b1.astype(jnp.float32),
        w2.astype(jnp.bfloat16), b2.astype(jnp.float32),
        w3.astype(jnp.bfloat16), b3.astype(jnp.float32),
        w4.T.astype(jnp.float32), b4.astype(jnp.float32),
    )


def discriminator_forward(x, prepped_params, *, tile_b=None):
    """x: (B, 784) float32; prepped_params: output of prepare_params()."""
    B = x.shape[0]
    if tile_b is None:
        tile_b = _choose_tile_b(B)
    bp = _round_up(B, tile_b)
    if bp != B:
        # Only pads the batch dim (no feature pad / dtype pass over x).
        x = jnp.pad(x, ((0, bp - B), (0, 0)))
    out = _discriminator_pallas(x, tuple(prepped_params), tile_b=tile_b)
    return out[:B] if bp != B else out


def init_params(key, i_dim=I_DIM, h_dim=H_DIM):
    """Deterministic init mimicking PyTorch nn.Linear defaults
    (uniform(-1/sqrt(fan_in), 1/sqrt(fan_in))); W stored (in, out)."""
    dims = [(i_dim, h_dim * 4), (h_dim * 4, h_dim * 2),
            (h_dim * 2, h_dim), (h_dim, 1)]
    params = []
    for (fan_in, fan_out) in dims:
        key, kw, kb = jax.random.split(key, 3)
        bound = 1.0 / jnp.sqrt(jnp.float32(fan_in))
        w = jax.random.uniform(kw, (fan_in, fan_out), jnp.float32, -bound, bound)
        b = jax.random.uniform(kb, (1, fan_out), jnp.float32, -bound, bound)
        params.append((w, b))
    return params


def reference_forward(x, params):
    """Plain-JAX reference mirroring the kernel's precision path
    (bf16 matmul operands, f32 accumulation / elementwise)."""
    (w1, b1), (w2, b2), (w3, b3), (w4, b4) = params
    h = jnp.dot(x.astype(jnp.bfloat16), w1.astype(jnp.bfloat16),
                preferred_element_type=jnp.float32) + b1
    h = jnp.where(h >= 0, h, 0.2 * h)
    h = jnp.dot(h.astype(jnp.bfloat16), w2.astype(jnp.bfloat16),
                preferred_element_type=jnp.float32) + b2
    h = jnp.where(h >= 0, h, 0.2 * h)
    h = jnp.dot(h.astype(jnp.bfloat16), w3.astype(jnp.bfloat16),
                preferred_element_type=jnp.float32) + b3
    h = jnp.where(h >= 0, h, 0.2 * h)
    return jnp.sum(h * w4[:, 0][None, :], axis=-1, keepdims=True) + b4


if __name__ == "__main__":
    key = jax.random.PRNGKey(0)
    key, kx = jax.random.split(key)

    B = 2
    x = jax.random.normal(kx, (B, I_DIM), jnp.float32)  # flattened 28x28 images
    params = init_params(key)

    prepped = prepare_params(params)      # one-time weight prep (hoisted)
    out = discriminator_forward(x, prepped)
    out = jax.block_until_ready(out)

    ref = reference_forward(x, params)
    assert out.shape == (B, 1), out.shape
    assert jnp.allclose(out, ref, atol=5e-3, rtol=5e-3), (out, ref)

    print("KERNEL_OK")
</pallas_src>

<mosaic_0001>
module attributes {stable_mosaic.version = 11 : i64} {
  func.func @discriminator_kernel(%arg0: i32, %arg1: memref<8x784xf32, #tpu.memory_space<vmem>>, %arg2: memref<784x1024xbf16, #tpu.memory_space<vmem>>, %arg3: memref<1x1024xf32, #tpu.memory_space<vmem>>, %arg4: memref<1024x512xbf16, #tpu.memory_space<vmem>>, %arg5: memref<1x512xf32, #tpu.memory_space<vmem>>, %arg6: memref<512x256xbf16, #tpu.memory_space<vmem>>, %arg7: memref<1x256xf32, #tpu.memory_space<vmem>>, %arg8: memref<1x256xf32, #tpu.memory_space<vmem>>, %arg9: memref<1x1xf32, #tpu.memory_space<vmem>>, %arg10: memref<8x1xf32, #tpu.memory_space<vmem>>) attributes {dimension_semantics = [#tpu.dimension_semantics<parallel>], iteration_bounds = array<i64: 1>, scalar_prefetch = 0 : i64, scratch_operands = 0 : i64, tpu.core_type = #tpu.core_type<tc>, window_params = [{transform_indices = @transform_0, window_bounds = array<i64: 8, 784>}, {pipeline_mode = #tpu.pipeline_mode<synchronous>, transform_indices = @transform_1, window_bounds = array<i64: 784, 1024>}, {pipeline_mode = #tpu.pipeline_mode<synchronous>, transform_indices = @transform_2, window_bounds = array<i64: 1, 1024>}, {pipeline_mode = #tpu.pipeline_mode<synchronous>, transform_indices = @transform_3, window_bounds = array<i64: 1024, 512>}, {pipeline_mode = #tpu.pipeline_mode<synchronous>, transform_indices = @transform_4, window_bounds = array<i64: 1, 512>}, {pipeline_mode = #tpu.pipeline_mode<synchronous>, transform_indices = @transform_5, window_bounds = array<i64: 512, 256>}, {pipeline_mode = #tpu.pipeline_mode<synchronous>, transform_indices = @transform_6, window_bounds = array<i64: 1, 256>}, {pipeline_mode = #tpu.pipeline_mode<synchronous>, transform_indices = @transform_7, window_bounds = array<i64: 1, 256>}, {pipeline_mode = #tpu.pipeline_mode<synchronous>, transform_indices = @transform_8, window_bounds = array<i64: 1, 1>}, {transform_indices = @transform_9, window_bounds = array<i64: 8, 1>}]} {
    %c0 = arith.constant 0 : index
    %c0_0 = arith.constant 0 : index
    %0 = vector.load %arg1[%c0, %c0_0] : memref<8x784xf32, #tpu.memory_space<vmem>>, vector<8x784xf32>
    %1 = arith.truncf %0 : vector<8x784xf32> to vector<8x784xbf16>
    %c0_1 = arith.constant 0 : index
    %c0_2 = arith.constant 0 : index
    %2 = vector.load %arg2[%c0_1, %c0_2] : memref<784x1024xbf16, #tpu.memory_space<vmem>>, vector<784x1024xbf16>
    %cst = arith.constant dense<0.000000e+00> : vector<8x1024xf32>
    %3 = tpu.matmul %1, %2, %cst {dimension_numbers = #tpu.dot_dimension_numbers<[1], [0], [0], [1], [0, 0, 1, 1], [], []>} : vector<8x784xbf16>, vector<784x1024xbf16>, vector<8x1024xf32> -> vector<8x1024xf32>
    %c0_3 = arith.constant 0 : index
    %c0_4 = arith.constant 0 : index
    %4 = vector.load %arg3[%c0_3, %c0_4] : memref<1x1024xf32, #tpu.memory_space<vmem>>, vector<1x1024xf32>
    %5 = vector.broadcast %4 : vector<1x1024xf32> to vector<8x1024xf32>
    %6 = arith.addf %3, %5 : vector<8x1024xf32>
    %cst_5 = arith.constant 0.000000e+00 : f32
    %7 = vector.broadcast %cst_5 : f32 to vector<8x1024xf32>
    %8 = arith.cmpf oge, %6, %7 : vector<8x1024xf32>
    %cst_6 = arith.constant 2.000000e-01 : f32
    %9 = vector.broadcast %cst_6 : f32 to vector<8x1024xf32>
    %10 = arith.mulf %9, %6 : vector<8x1024xf32>
    %11 = arith.select %8, %6, %10 : vector<8x1024xi1>, vector<8x1024xf32>
    %12 = arith.truncf %11 : vector<8x1024xf32> to vector<8x1024xbf16>
    %c0_7 = arith.constant 0 : index
    %c0_8 = arith.constant 0 : index
    %13 = vector.load %arg4[%c0_7, %c0_8] : memref<1024x512xbf16, #tpu.memory_space<vmem>>, vector<1024x512xbf16>
    %cst_9 = arith.constant dense<0.000000e+00> : vector<8x512xf32>
    %14 = tpu.matmul %12, %13, %cst_9 {dimension_numbers = #tpu.dot_dimension_numbers<[1], [0], [0], [1], [0, 0, 1, 1], [], []>} : vector<8x1024xbf16>, vector<1024x512xbf16>, vector<8x512xf32> -> vector<8x512xf32>
    %c0_10 = arith.constant 0 : index
    %c0_11 = arith.constant 0 : index
    %15 = vector.load %arg5[%c0_10, %c0_11] : memref<1x512xf32, #tpu.memory_space<vmem>>, vector<1x512xf32>
    %16 = vector.broadcast %15 : vector<1x512xf32> to vector<8x512xf32>
    %17 = arith.addf %14, %16 : vector<8x512xf32>
    %cst_12 = arith.constant 0.000000e+00 : f32
    %18 = vector.broadcast %cst_12 : f32 to vector<8x512xf32>
    %19 = arith.cmpf oge, %17, %18 : vector<8x512xf32>
    %cst_13 = arith.constant 2.000000e-01 : f32
    %20 = vector.broadcast %cst_13 : f32 to vector<8x512xf32>
    %21 = arith.mulf %20, %17 : vector<8x512xf32>
    %22 = arith.select %19, %17, %21 : vector<8x512xi1>, vector<8x512xf32>
    %23 = arith.truncf %22 : vector<8x512xf32> to vector<8x512xbf16>
    %c0_14 = arith.constant 0 : index
    %c0_15 = arith.constant 0 : index
    %24 = vector.load %arg6[%c0_14, %c0_15] : memref<512x256xbf16, #tpu.memory_space<vmem>>, vector<512x256xbf16>
    %cst_16 = arith.constant dense<0.000000e+00> : vector<8x256xf32>
    %25 = tpu.matmul %23, %24, %cst_16 {dimension_numbers = #tpu.dot_dimension_numbers<[1], [0], [0], [1], [0, 0, 1, 1], [], []>} : vector<8x512xbf16>, vector<512x256xbf16>, vector<8x256xf32> -> vector<8x256xf32>
    %c0_17 = arith.constant 0 : index
    %c0_18 = arith.constant 0 : index
    %26 = vector.load %arg7[%c0_17, %c0_18] : memref<1x256xf32, #tpu.memory_space<vmem>>, vector<1x256xf32>
    %27 = vector.broadcast %26 : vector<1x256xf32> to vector<8x256xf32>
    %28 = arith.addf %25, %27 : vector<8x256xf32>
    %cst_19 = arith.constant 0.000000e+00 : f32
    %29 = vector.broadcast %cst_19 : f32 to vector<8x256xf32>
    %30 = arith.cmpf oge, %28, %29 : vector<8x256xf32>
    %cst_20 = arith.constant 2.000000e-01 : f32
    %31 = vector.broadcast %cst_20 : f32 to vector<8x256xf32>
    %32 = arith.mulf %31, %28 : vector<8x256xf32>
    %33 = arith.select %30, %28, %32 : vector<8x256xi1>, vector<8x256xf32>
    %c0_21 = arith.constant 0 : index
    %c0_22 = arith.constant 0 : index
    %34 = vector.load %arg8[%c0_21, %c0_22] : memref<1x256xf32, #tpu.memory_space<vmem>>, vector<1x256xf32>
    %35 = vector.broadcast %34 : vector<1x256xf32> to vector<8x256xf32>
    %36 = arith.mulf %33, %35 : vector<8x256xf32>
    %cst_23 = arith.constant dense<0.000000e+00> : vector<8xf32>
    %37 = vector.multi_reduction <add>, %36, %cst_23 [1] : vector<8x256xf32> to vector<8xf32>
    %38 = vector.shape_cast %37 : vector<8xf32> to vector<8x1xf32>
    %c0_24 = arith.constant 0 : index
    %c0_25 = arith.constant 0 : index
    %39 = vector.load %arg9[%c0_24, %c0_25] : memref<1x1xf32, #tpu.memory_space<vmem>>, vector<1x1xf32>
    %40 = vector.broadcast %39 : vector<1x1xf32> to vector<8x1xf32>
    %41 = arith.addf %38, %40 : vector<8x1xf32>
    %c0_26 = arith.constant 0 : index
    %c0_27 = arith.constant 0 : index
    %42 = vector.load %arg10[%c0_26, %c0_27] : memref<8x1xf32, #tpu.memory_space<vmem>>, vector<8x1xf32>
    tpu.vector_store %arg10[%c0_26, %c0_27], %41 {strides = array<i32>} : memref<8x1xf32, #tpu.memory_space<vmem>>, vector<8x1xf32>,
    return
  }
  func.func @transform_0(%arg0: i32) -> (i32, i32) {
    %c0_i32 = arith.constant 0 : i32
    %c0_i32_0 = arith.constant 0 : i32
    return %arg0, %c0_i32 : i32, i32
  }
  func.func @transform_1(%arg0: i32) -> (i32, i32) {
    %c0_i32 = arith.constant 0 : i32
    %c0_i32_0 = arith.constant 0 : i32
    %c0_i32_1 = arith.constant 0 : i32
    return %c0_i32, %c0_i32_0 : i32, i32
  }
  func.func @transform_2(%arg0: i32) -> (i32, i32) {
    %c0_i32 = arith.constant 0 : i32
    %c0_i32_0 = arith.constant 0 : i32
    %c0_i32_1 = arith.constant 0 : i32
    return %c0_i32, %c0_i32_0 : i32, i32
  }
  func.func @transform_3(%arg0: i32) -> (i32, i32) {
    %c0_i32 = arith.constant 0 : i32
    %c0_i32_0 = arith.constant 0 : i32
    %c0_i32_1 = arith.constant 0 : i32
    return %c0_i32, %c0_i32_0 : i32, i32
  }
  func.func @transform_4(%arg0: i32) -> (i32, i32) {
    %c0_i32 = arith.constant 0 : i32
    %c0_i32_0 = arith.constant 0 : i32
    %c0_i32_1 = arith.constant 0 : i32
    return %c0_i32, %c0_i32_0 : i32, i32
  }
  func.func @transform_5(%arg0: i32) -> (i32, i32) {
    %c0_i32 = arith.constant 0 : i32
    %c0_i32_0 = arith.constant 0 : i32
    %c0_i32_1 = arith.constant 0 : i32
    return %c0_i32, %c0_i32_0 : i32, i32
  }
  func.func @transform_6(%arg0: i32) -> (i32, i32) {
    %c0_i32 = arith.constant 0 : i32
    %c0_i32_0 = arith.constant 0 : i32
    %c0_i32_1 = arith.constant 0 : i32
    return %c0_i32, %c0_i32_0 : i32, i32
  }
  func.func @transform_7(%arg0: i32) -> (i32, i32) {
    %c0_i32 = arith.constant 0 : i32
    %c0_i32_0 = arith.constant 0 : i32
    %c0_i32_1 = arith.constant 0 : i32
    return %c0_i32, %c0_i32_0 : i32, i32
  }
  func.func @transform_8(%arg0: i32) -> (i32, i32) {
    %c0_i32 = arith.constant 0 : i32
    %c0_i32_0 = arith.constant 0 : i32
    %c0_i32_1 = arith.constant 0 : i32
    return %c0_i32, %c0_i32_0 : i32, i32
  }
  func.func @transform_9(%arg0: i32) -> (i32, i32) {
    %c0_i32 = arith.constant 0 : i32
    %c0_i32_0 = arith.constant 0 : i32
    return %arg0, %c0_i32 : i32, i32
  }
}

</mosaic_0001>

<bundles_post_ra>
// kernel: _discriminator_pallas.1
= control target key start
LH: loop header
LB: loop body
LE: loop exit
PB: predicated region body
PF: predicated region fallthrough
CT: control target
= control target key end

     0   :  { %s7333_s0 = inlined_call_operand.hbm [shape: f32[8,784], index: 0, kind: input, shape index: {}]   ;;  %s7334_s1 = inlined_call_operand.hbm [shape: bf16[784,1024], index: 1, kind: input, shape index: {}]   ;;  %s7335_s2 = inlined_call_operand.hbm [shape: f32[1,1024], index: 2, kind: input, shape index: {}]   ;;  %s7336_s3 = inlined_call_operand.hbm [shape: bf16[1024,512], index: 3, kind: input, shape index: {}]   ;;  %s7337_s4 = inlined_call_operand.hbm [shape: f32[1,512], index: 4, kind: input, shape index: {}]   ;;  %s7338_s5 = inlined_call_operand.hbm [shape: bf16[512,256], index: 5, kind: input, shape index: {}]   ;;  %s7339_s6 = inlined_call_operand.hbm [shape: f32[1,256], index: 6, kind: input, shape index: {}]   ;;  %s7340_s7 = inlined_call_operand.hbm [shape: f32[1,256], index: 7, kind: input, shape index: {}]   ;;  %s7341_s8 = inlined_call_operand.<no memory space> [shape: f32[1,1], index: 8, kind: input, shape index: {}]   ;;  %s7342_s9 = inlined_call_operand.vmem [shape: f32[8,1], index: 9, kind: output, shape index: {}]  }
   0x1   :  { %v14_v0 = vstv %s7341_s8 }
   0x2   :  { %15 = vst [vmem:[#allocation2] sm:$0x1] %v14_v0 }
   0x3   :  { %16 = vsyncpa [#allocation4], 0 }
   0x4   :  { %17 = vsyncpa [#allocation6], 0 }
   0x5   :  { %18 = vsyncpa [#allocation9], 0 }
   0x6   :  { %19 = vsyncpa [#allocation12], 0 }
   0x7   :  { %20 = vsyncpa [#allocation15], 0  ;;  %s7039_s11 = smov [#allocation5]  }
   0x8   :  { %s36_s12 = sshll.u32 %s7039_s11, 4  ;;  %s37_s12 = int_to_ptr.vmem [resolvable:$true] %s36_s12 }
   0x9   :  { %s6877_s13 = scalar_lea.vmem %s37_s12, 50176  ;;  %p6882_p1 = scmp.lt.s32.totalorder %s37_s12, %s37_s12 }
   0xa   :  { %p6878_p0 = scmp.ne.s32.totalorder %s37_s12, %s6877_s13  ;;  %p6883_p2 = scmp.lt.s32.totalorder %s6877_s13, %s6877_s13 }
   0xc   :  { %p6884_p3 = por %p6883_p2, %p6882_p1 }
   0xe   :  { %p6885_p4 = pnand %p6884_p3, %p6878_p0 }
  0x10   :  { %6888 = shalt.err (!%p6885_p4)
}
  0x11   :  { %s7040_s14 = smov 512   ;;  %s7041_s15 = smov 32  }
  0x12   :  { %42 = dma.hbm_to_vmem [thread:$0]  %s7334_s1, 50176, %s37_s12, [#allocation6], %s7040_s14, %s7040_s14, %s7041_s15  }
  0x13   :  { %s7042_s17 = smov [#allocation8]  }
  0x14   :  { %s58_s18 = sshll.u32 %s7042_s17, 4  ;;  %s59_s18 = int_to_ptr.vmem [resolvable:$true] %s58_s18 }
  0x15   :  { %s6897_s19 = scalar_lea.vmem %s59_s18, 32768  ;;  %p6902_p6 = scmp.lt.s32.totalorder %s59_s18, %s59_s18 }
  0x16   :  { %p6898_p5 = scmp.ne.s32.totalorder %s59_s18, %s6897_s19  ;;  %p6903_p7 = scmp.lt.s32.totalorder %s6897_s19, %s6897_s19 }
  0x18   :  { %p6904_p8 = por %p6903_p7, %p6902_p6 }
  0x1a   :  { %p6905_p9 = pnand %p6904_p8, %p6898_p5 }
  0x1c   :  { %6908 = shalt.err (!%p6905_p9)
}
  0x1d   :  { %s7043_s20 = smov 256   ;;  %s7044_s21 = smov 16  }
  0x1e   :  { %64 = dma.hbm_to_vmem [thread:$0]  %s7336_s3, 32768, %s59_s18, [#allocation9], %s7043_s20, %s7043_s20, %s7044_s21  }
  0x1f   :  { %s7045_s24 = smov [#allocation11]  }
  0x20   :  { %s80_s25 = sshll.u32 %s7045_s24, 4  ;;  %s81_s25 = int_to_ptr.vmem [resolvable:$true] %s80_s25 }
  0x21   :  { %s6917_s1 = scalar_lea.vmem %s81_s25, 8192  ;;  %p6922_p11 = scmp.lt.s32.totalorder %s81_s25, %s81_s25 }
  0x22   :  { %p6918_p10 = scmp.ne.s32.totalorder %s81_s25, %s6917_s1  ;;  %p6923_p12 = scmp.lt.s32.totalorder %s6917_s1, %s6917_s1 }
  0x24   :  { %p6924_p13 = por %p6923_p12, %p6922_p11 }
  0x26   :  { %p6925_p0 = pnand %p6924_p13, %p6918_p10 }
  0x28   :  { %6928 = shalt.err (!%p6925_p0)
}
  0x29   :  { %s7046_s26 = smov 128   ;;  %s7047_s27 = smov 8  }
  0x2a   :  { %86 = dma.hbm_to_vmem [thread:$0]  %s7338_s5, 8192, %s81_s25, [#allocation12], %s7046_s26, %s7046_s26, %s7047_s27  }
  0x2b   :  { %s7048_s30 = smov [#allocation3]   ;;  %s7049_s3 = smov [#allocation7]  }
  0x2c   :  { %s27_s10 = sshll.u32 %s7048_s30, 4  ;;  %s49_s11 = sshll.u32 %s7049_s3, 4  ;;  %s28_s10 = int_to_ptr.vmem [resolvable:$true] %s27_s10  ;;  %s50_s11 = int_to_ptr.vmem [resolvable:$true] %s49_s11 }
  0x2d   :  { %s6937_s12 = scalar_lea.vmem %s28_s10, 896  ;;  %p6942_p2 = scmp.lt.s32.totalorder %s28_s10, %s28_s10 }
  0x2e   :  { %p6938_p1 = scmp.ne.s32.totalorder %s28_s10, %s6937_s12  ;;  %p6943_p3 = scmp.lt.s32.totalorder %s6937_s12, %s6937_s12 }
  0x30   :  { %p6944_p4 = por %p6943_p3, %p6942_p2 }
  0x32   :  { %p6945_p5 = pnand %p6944_p4, %p6938_p1 }
  0x34   :  { %6948 = shalt.err (!%p6945_p5)
}
  0x35   :  { %30 = dma.hbm_to_vmem [thread:$0]  %s7333_s0, 896, %s28_s10, [#allocation4]  }
  0x36   :  { %s6957_s15 = scalar_lea.vmem %s50_s11, 128  ;;  %p6962_p7 = scmp.lt.s32.totalorder %s50_s11, %s50_s11 }
  0x37   :  { %p6958_p6 = scmp.ne.s32.totalorder %s50_s11, %s6957_s15  ;;  %p6963_p8 = scmp.lt.s32.totalorder %s6957_s15, %s6957_s15 }
  0x39   :  { %p6964_p9 = por %p6963_p8, %p6962_p7 }
  0x3b   :  { %p6965_p10 = pnand %p6964_p9, %p6958_p6 }
  0x3d   :  { %6968 = shalt.err (!%p6965_p10)
}
  0x3e   :  { %52 = dma.hbm_to_vmem [thread:$0]  %s7335_s2, 128, %s50_s11, [#allocation6]  }
  0x3f   :  { %s7050_s8 = smov [#allocation10]   ;;  %s7051_s18 = smov [#allocation13]  }
  0x40   :  { %s71_s17 = sshll.u32 %s7050_s8, 4  ;;  %s93_s19 = sshll.u32 %s7051_s18, 4  ;;  %s72_s17 = int_to_ptr.vmem [resolvable:$true] %s71_s17  ;;  %s94_s19 = int_to_ptr.vmem [resolvable:$true] %s93_s19 }
  0x41   :  { %s6977_s20 = scalar_lea.vmem %s72_s17, 64  ;;  %p6982_p12 = scmp.lt.s32.totalorder %s72_s17, %s72_s17 }
  0x42   :  { %p6978_p11 = scmp.ne.s32.totalorder %s72_s17, %s6977_s20  ;;  %p6983_p13 = scmp.lt.s32.totalorder %s6977_s20, %s6977_s20 }
  0x44   :  { %p6984_p0 = por %p6983_p13, %p6982_p12 }
  0x46   :  { %p6985_p1 = pnand %p6984_p0, %p6978_p11 }
  0x48   :  { %6988 = shalt.err (!%p6985_p1)
}
  0x49   :  { %74 = dma.hbm_to_vmem [thread:$0]  %s7337_s4, 64, %s72_s17, [#allocation9]  }
  0x4a   :  { %s6997_s22 = scalar_lea.vmem %s94_s19, 32  ;;  %p7002_p3 = scmp.lt.s32.totalorder %s94_s19, %s94_s19 }
  0x4b   :  { %p6998_p2 = scmp.ne.s32.totalorder %s94_s19, %s6997_s22  ;;  %p7003_p4 = scmp.lt.s32.totalorder %s6997_s22, %s6997_s22 }
  0x4d   :  { %p7004_p5 = por %p7003_p4, %p7002_p3 }
  0x4f   :  { %p7005_p6 = pnand %p7004_p5, %p6998_p2 }
  0x51   :  { %7008 = shalt.err (!%p7005_p6)
}
  0x52   :  { %96 = dma.hbm_to_vmem [thread:$0]  %s7339_s6, 32, %s94_s19, [#allocation12]  }
  0x53   :  { %s7052_s24 = smov [#allocation14]  }
  0x54   :  { %s103_s25 = sshll.u32 %s7052_s24, 4  ;;  %s104_s25 = int_to_ptr.vmem [resolvable:$true] %s103_s25 }
  0x55   :  { %s7017_s1 = scalar_lea.vmem %s104_s25, 32  ;;  %p7022_p8 = scmp.lt.s32.totalorder %s104_s25, %s104_s25 }
  0x56   :  { %p7018_p7 = scmp.ne.s32.totalorder %s104_s25, %s7017_s1  ;;  %p7023_p9 = scmp.lt.s32.totalorder %s7017_s1, %s7017_s1 }
  0x58   :  { %p7024_p10 = por %p7023_p9, %p7022_p8 }
  0x5a   :  { %p7025_p11 = pnand %p7024_p10, %p7018_p7 }
  0x5c   :  { %7028 = shalt.err (!%p7025_p11)
}
  0x5d   :  { %106 = dma.hbm_to_vmem [thread:$0]  %s7340_s7, 32, %s104_s25, [#allocation15]  }
  0x5e   :  { %7029 = dma.done.wait [#allocation4], 896  }
  0x5f   :  { %7030 = vsyncadd [#allocation4], 4294966400 }
  0x60   :  { %7031 = dma.done.wait [#allocation6], 50304  }
  0x61   :  { %7032 = vsyncadd [#allocation6], 4294916992 }
  0x62   :  { %7033 = dma.done.wait [#allocation9], 32832  }
  0x63   :  { %7034 = vsyncadd [#allocation9], 4294934464 }
  0x64   :  { %7035 = dma.done.wait [#allocation12], 8224  }
  0x65   :  { %7036 = vsyncadd [#allocation12], 4294959072 }
  0x66   :  { %7037 = dma.done.wait [#allocation15], 32  }
  0x67   :  { %7038 = vsyncadd [#allocation15], 4294967264  ;;  %v204_v1 = vld [vmem:[#allocation5 + $0x1c0] sm:$0xff]  ;;  %v135_v54 = vld [vmem:[#allocation3 + $0x8] sm:$0xff]  ;;  %vm2542_vm0 = vcmask 130048   ;;  %vm5645_vm15 = vcmask 7168  }
  0x68   :  { %v208_v2 = vld [vmem:[#allocation5 + $0x1e0] sm:$0xff]  ;;  %v7131_v59 = vpack.c.bf16 %v135_v54, %v135_v54 }
  0x69   :  { %v332_v3 = vld [vmem:[#allocation5 + $0x5c0] sm:$0xff]  ;;  %v5713_v4 = vcombine.high %v204_v1, %v208_v2  ;;  %v5712_v6 = vcombine.low %v204_v1, %v208_v2 }
  0x6a   :  { %v336_v5 = vld [vmem:[#allocation5 + $0x5e0] sm:$0xff]  ;;  %2578 = vmatprep.mubr.bf16.mxu0 %v7131_v59 }
  0x6b   :  { %v196_v7 = vld [vmem:[#allocation5 + $0x180] sm:$0xff]  ;;  %v5841_v9 = vcombine.high %v332_v3, %v336_v5  ;;  %v5840_v10 = vcombine.low %v332_v3, %v336_v5  ;;  %2546 = vmatprep.subr.bf16.mxu0 %v5713_v4 }
  0x6c   :  { %v200_v8 = vld [vmem:[#allocation5 + $0x1a0] sm:$0xff]  ;;  %2547 = vmatpush1.bf16.msra.mxu0 %v5712_v6 }
  0x6d   :  { %v5705_v11 = vcombine.high %v196_v7, %v200_v8  ;;  %v324_v12 = vld [vmem:[#allocation5 + $0x580] sm:$0xff]  ;;  %2587 = vmatprep.subr.bf16.mxu1 %v5841_v9  ;;  %v5704_v19 = vcombine.low %v196_v7, %v200_v8 }
  0x6e   :  { %v328_v13 = vld [vmem:[#allocation5 + $0x5a0] sm:$0xff]  ;;  %2588 = vmatpush1.bf16.msra.mxu1 %v5840_v10 }
  0x6f   :  { %v188_v14 = vld [vmem:[#allocation5 + $0x140] sm:$0xff]  ;;  %v5833_v15 = vcombine.high %v324_v12, %v328_v13  ;;  %2548 = vmatprep.subr.bf16.mxu0 %v5705_v11  ;;  %v5832_v20 = vcombine.low %v324_v12, %v328_v13 }
  0x70   :  { %v192_v16 = vld [vmem:[#allocation5 + $0x160] sm:$0xff]  ;;  %2549 = vmatpush1.bf16.msra.mxu0 %v5704_v19 }
  0x71   :  { %v316_v17 = vld [vmem:[#allocation5 + $0x540] sm:$0xff]  ;;  %v5697_v21 = vcombine.high %v188_v14, %v192_v16  ;;  %2589 = vmatprep.subr.bf16.mxu1 %v5833_v15  ;;  %v5696_v27 = vcombine.low %v188_v14, %v192_v16 }
  0x72   :  { %v320_v18 = vld [vmem:[#allocation5 + $0x560] sm:$0xff]  ;;  %2590 = vmatpush1.bf16.msra.mxu1 %v5832_v20 }
  0x73   :  { %v5825_v22 = vcombine.high %v316_v17, %v320_v18  ;;  %v180_v23 = vld [vmem:[#allocation5 + $0x100] sm:$0xff]  ;;  %2550 = vmatprep.subr.bf16.mxu0 %v5697_v21  ;;  %v5824_v28 = vcombine.low %v316_v17, %v320_v18 }
  0x74   :  { %v184_v24 = vld [vmem:[#allocation5 + $0x120] sm:$0xff]  ;;  %2551 = vmatpush1.bf16.msra.mxu0 %v5696_v27 }
  0x75   :  { %v308_v25 = vld [vmem:[#allocation5 + $0x500] sm:$0xff]  ;;  %v5689_v29 = vcombine.high %v180_v23, %v184_v24  ;;  %2591 = vmatprep.subr.bf16.mxu1 %v5825_v22  ;;  %v5688_v35 = vcombine.low %v180_v23, %v184_v24 }
  0x76   :  { %v312_v26 = vld [vmem:[#allocation5 + $0x520] sm:$0xff]  ;;  %2592 = vmatpush1.bf16.msra.mxu1 %v5824_v28 }
  0x77   :  { %v5817_v30 = vcombine.high %v308_v25, %v312_v26  ;;  %v172_v31 = vld [vmem:[#allocation5 + $0xc0] sm:$0xff]  ;;  %2552 = vmatprep.subr.bf16.mxu0 %v5689_v29  ;;  %v5816_v36 = vcombine.low %v308_v25, %v312_v26 }
  0x78   :  { %v176_v32 = vld [vmem:[#allocation5 + $0xe0] sm:$0xff]  ;;  %2553 = vmatpush1.bf16.msra.mxu0 %v5688_v35 }
  0x79   :  { %v300_v33 = vld [vmem:[#allocation5 + $0x4c0] sm:$0xff]  ;;  %v5681_v37 = vcombine.high %v172_v31, %v176_v32  ;;  %2593 = vmatprep.subr.bf16.mxu1 %v5817_v30  ;;  %v5680_v43 = vcombine.low %v172_v31, %v176_v32 }
  0x7a   :  { %v304_v34 = vld [vmem:[#allocation5 + $0x4e0] sm:$0xff]  ;;  %2594 = vmatpush1.bf16.msra.mxu1 %v5816_v36 }
  0x7b   :  { %v5809_v38 = vcombine.high %v300_v33, %v304_v34  ;;  %v164_v39 = vld [vmem:[#allocation5 + $0x80] sm:$0xff]  ;;  %2554 = vmatprep.subr.bf16.mxu0 %v5681_v37  ;;  %v5808_v44 = vcombine.low %v300_v33, %v304_v34 }
  0x7c   :  { %v168_v40 = vld [vmem:[#allocation5 + $0xa0] sm:$0xff]  ;;  %2555 = vmatpush1.bf16.msra.mxu0 %v5680_v43 }
  0x7d   :  { %v292_v41 = vld [vmem:[#allocation5 + $0x480] sm:$0xff]  ;;  %v5673_v45 = vcombine.high %v164_v39, %v168_v40  ;;  %2595 = vmatprep.subr.bf16.mxu1 %v5809_v38  ;;  %v5672_v51 = vcombine.low %v164_v39, %v168_v40 }
  0x7e   :  { %v296_v42 = vld [vmem:[#allocation5 + $0x4a0] sm:$0xff]  ;;  %2596 = vmatpush1.bf16.msra.mxu1 %v5808_v44 }
  0x7f   :  { %v5801_v46 = vcombine.high %v292_v41, %v296_v42  ;;  %v156_v47 = vld [vmem:[#allocation5 + $0x40] sm:$0xff]  ;;  %2556 = vmatprep.subr.bf16.mxu0 %v5673_v45  ;;  %v5800_v52 = vcombine.low %v292_v41, %v296_v42 }
  0x80   :  { %v160_v48 = vld [vmem:[#allocation5 + $0x60] sm:$0xff]  ;;  %2557 = vmatpush1.bf16.msra.mxu0 %v5672_v51 }
  0x81   :  { %v284_v49 = vld [vmem:[#allocation5 + $0x440] sm:$0xff]  ;;  %v5665_v53 = vcombine.high %v156_v47, %v160_v48  ;;  %2597 = vmatprep.subr.bf16.mxu1 %v5801_v46  ;;  %v5664_v63 = vcombine.low %v156_v47, %v160_v48 }
  0x82   :  { %v288_v50 = vld [vmem:[#allocation5 + $0x460] sm:$0xff]  ;;  %2598 = vmatpush1.bf16.msra.mxu1 %v5800_v52 }
  0x83   :  { %v137_v55 = vld [vmem:[#allocation3 + $0x18] sm:$0xff]  ;;  %v5793_v56 = vcombine.high %v284_v49, %v288_v50  ;;  %2558 = vmatprep.subr.bf16.mxu0 %v5665_v53  ;;  %v5792_v0 = vcombine.low %v284_v49, %v288_v50 }
  0x84   :  { %v148_v57 = vld [vmem:[#allocation5] sm:$0xff]  ;;  %v7133_v60 = vpack.c.bf16 %v137_v55, %v137_v55  ;;  %2559 = vmatpush1.bf16.msra.mxu0 %v5664_v63 }
  0x85   :  { %v152_v58 = vld [vmem:[#allocation5 + $0x20] sm:$0xff]  ;;  %2599 = vmatprep.subr.bf16.mxu1 %v5793_v56 }
  0x86   :  { %v276_v61 = vld [vmem:[#allocation5 + $0x400] sm:$0xff]  ;;  %v5657_v1 = vcombine.high %v148_v57, %v152_v58  ;;  %2619 = vmatprep.mubr.bf16.mxu1 %v7133_v60  ;;  %v5656_v7 = vcombine.low %v148_v57, %v152_v58  ;;  %2600 = vmatpush1.bf16.msra.mxu1 %v5792_v0 }
  0x87   :  { %v280_v62 = vld [vmem:[#allocation5 + $0x420] sm:$0xff] }
  0x88   :  { %v5785_v2 = vcombine.high %v276_v61, %v280_v62  ;;  %v268_v3 = vld [vmem:[#allocation5 + $0x3c0] sm:$0xff]  ;;  %2560 = vmatprep.subr.bf16.mxu0 %v5657_v1  ;;  %v5784_v8 = vcombine.low %v276_v61, %v280_v62 }
  0x89   :  { %v272_v4 = vld [vmem:[#allocation5 + $0x3e0] sm:$0xff]  ;;  %2561 = vmatpush1.bf16.msra.mxu0 %v5656_v7 }
  0x8a   :  { %v396_v5 = vld [vmem:[#allocation5 + $0x7c0] sm:$0xff]  ;;  %v5777_v9 = vcombine.high %v268_v3, %v272_v4  ;;  %2601 = vmatprep.subr.bf16.mxu1 %v5785_v2  ;;  %v5776_v15 = vcombine.low %v268_v3, %v272_v4 }
  0x8b   :  { %v400_v6 = vld [vmem:[#allocation5 + $0x7e0] sm:$0xff]  ;;  %2602 = vmatpush1.bf16.msra.mxu1 %v5784_v8 }
  0x8c   :  { %v5905_v10 = vcombine.high %v396_v5, %v400_v6  ;;  %v260_v11 = vld [vmem:[#allocation5 + $0x380] sm:$0xff]  ;;  %2562 = vmatprep.subr.bf16.mxu0 %v5777_v9  ;;  %v5904_v16 = vcombine.low %v396_v5, %v400_v6 }
  0x8d   :  { %v264_v12 = vld [vmem:[#allocation5 + $0x3a0] sm:$0xff]  ;;  %2563 = vmatpush2.bf16.msra.mxu0 %v5776_v15 }
  0x8e   :  { %v388_v13 = vld [vmem:[#allocation5 + $0x780] sm:$0xff]  ;;  %v5769_v17 = vcombine.high %v260_v11, %v264_v12  ;;  %2603 = vmatprep.subr.bf16.mxu1 %v5905_v10  ;;  %v5768_v23 = vcombine.low %v260_v11, %v264_v12  ;;  %v134_v10 = vld [vmem:[#allocation3] sm:$0xff]  ;;  %v136_v12 = vld [vmem:[#allocation3 + $0x10] sm:$0xff] }
  0x8f   :  { %v392_v14 = vld [vmem:[#allocation5 + $0x7a0] sm:$0xff]  ;;  %2604 = vmatpush2.bf16.msra.mxu1 %v5904_v16 }
  0x90   :  { %v5897_v18 = vcombine.high %v388_v13, %v392_v14  ;;  %v252_v19 = vld [vmem:[#allocation5 + $0x340] sm:$0xff]  ;;  %2564 = vmatprep.subr.bf16.mxu0 %v5769_v17  ;;  %v5896_v24 = vcombine.low %v388_v13, %v392_v14  ;;  %v7137_v17 = vpack.c.bf16 %v134_v10, %v134_v10 }
  0x91   :  { %v256_v20 = vld [vmem:[#allocation5 + $0x360] sm:$0xff]  ;;  %2565 = vmatpush2.bf16.msra.mxu0 %v5768_v23 }
  0x92   :  { %v380_v21 = vld [vmem:[#allocation5 + $0x740] sm:$0xff]  ;;  %v5761_v25 = vcombine.high %v252_v19, %v256_v20  ;;  %2605 = vmatprep.subr.bf16.mxu1 %v5897_v18  ;;  %v5760_v31 = vcombine.low %v252_v19, %v256_v20  ;;  %v205_v18 = vld [vmem:[#allocation5 + $0x1c8] sm:$0xff]  ;;  %v7139_v20 = vpack.c.bf16 %v136_v12, %v136_v12 }
  0x93   :  { %v384_v22 = vld [vmem:[#allocation5 + $0x760] sm:$0xff]  ;;  %2606 = vmatpush2.bf16.msra.mxu1 %v5896_v24  ;;  %v209_v19 = vld [vmem:[#allocation5 + $0x1e8] sm:$0xff] }
  0x94   :  { %v5889_v26 = vcombine.high %v380_v21, %v384_v22  ;;  %v244_v27 = vld [vmem:[#allocation5 + $0x300] sm:$0xff]  ;;  %2566 = vmatprep.subr.bf16.mxu0 %v5761_v25  ;;  %v5888_v32 = vcombine.low %v380_v21, %v384_v22  ;;  %v139_v22 = vld [vmem:[#allocation3 + $0x28] sm:$0xff]  ;;  %v161_v12 = vld [vmem:[#allocation5 + $0x68] sm:$0xff] }
  0x95   :  { %v248_v28 = vld [vmem:[#allocation5 + $0x320] sm:$0xff]  ;;  %2567 = vmatpush2.bf16.msra.mxu0 %v5760_v31 }
  0x96   :  { %v372_v29 = vld [vmem:[#allocation5 + $0x700] sm:$0xff]  ;;  %v5753_v33 = vcombine.high %v244_v27, %v248_v28  ;;  %2607 = vmatprep.subr.bf16.mxu1 %v5889_v26  ;;  %v5752_v39 = vcombine.low %v244_v27, %v248_v28  ;;  %v5715_v26 = vcombine.high %v205_v18, %v209_v19  ;;  %v140_v28 = vld [vmem:[#allocation3 + $0x30] sm:$0xff] }
  0x97   :  { %v376_v30 = vld [vmem:[#allocation5 + $0x720] sm:$0xff]  ;;  %2608 = vmatpush2.bf16.msra.mxu1 %v5888_v32  ;;  %v197_v32 = vld [vmem:[#allocation5 + $0x188] sm:$0xff] }
  0x98   :  { %v5881_v34 = vcombine.high %v372_v29, %v376_v30  ;;  %v236_v35 = vld [vmem:[#allocation5 + $0x2c0] sm:$0xff]  ;;  %2568 = vmatprep.subr.bf16.mxu0 %v5753_v33  ;;  %v5880_v40 = vcombine.low %v372_v29, %v376_v30  ;;  %v7142_v29 = vpack.c.bf16 %v139_v22, %v139_v22  ;;  %v201_v33 = vld [vmem:[#allocation5 + $0x1a8] sm:$0xff] }
  0x99   :  { %v240_v36 = vld [vmem:[#allocation5 + $0x2e0] sm:$0xff]  ;;  %2569 = vmatpush2.bf16.msra.mxu0 %v5752_v39  ;;  %v5714_v39 = vcombine.low %v205_v18, %v209_v19  ;;  %v153_v22 = vld [vmem:[#allocation5 + $0x28] sm:$0xff] }
  0x9a   :  { %v364_v37 = vld [vmem:[#allocation5 + $0x6c0] sm:$0xff]  ;;  %v5745_v41 = vcombine.high %v236_v35, %v240_v36  ;;  %2609 = vmatprep.subr.bf16.mxu1 %v5881_v34  ;;  %v5744_v47 = vcombine.low %v236_v35, %v240_v36  ;;  %v7053_v35 = vmov 0  }
  0x9b   :  { %v368_v38 = vld [vmem:[#allocation5 + $0x6e0] sm:$0xff]  ;;  %2610 = vmatpush2.bf16.msra.mxu1 %v5880_v40 }
  0x9c   :  { %v5873_v42 = vcombine.high %v364_v37, %v368_v38  ;;  %v228_v43 = vld [vmem:[#allocation5 + $0x280] sm:$0xff]  ;;  %2570 = vmatprep.subr.bf16.mxu0 %v5745_v41  ;;  %v5872_v48 = vcombine.low %v364_v37, %v368_v38  ;;  %v7147_v38 = vpack.c.bf16 %v140_v28, %v140_v28  ;;  %v189_v41 = vld [vmem:[#allocation5 + $0x148] sm:$0xff] }
  0x9d   :  { %v232_v44 = vld [vmem:[#allocation5 + $0x2a0] sm:$0xff]  ;;  %2571 = vmatpush2.bf16.msra.mxu0 %v5744_v47  ;;  %v5706_v47 = vcombine.low %v197_v32, %v201_v33 }
  0x9e   :  { %v356_v45 = vld [vmem:[#allocation5 + $0x680] sm:$0xff]  ;;  %v5737_v49 = vcombine.high %v228_v43, %v232_v44  ;;  %2611 = vmatprep.subr.bf16.mxu1 %v5873_v42  ;;  %v5736_v55 = vcombine.low %v228_v43, %v232_v44  ;;  %v193_v42 = vld [vmem:[#allocation5 + $0x168] sm:$0xff]  ;;  %v5707_v44 = vcombine.high %v197_v32, %v201_v33 }
  0x9f   :  { %v360_v46 = vld [vmem:[#allocation5 + $0x6a0] sm:$0xff]  ;;  %2612 = vmatpush2.bf16.msra.mxu1 %v5872_v48 }
  0xa0   :  { %v5865_v50 = vcombine.high %v356_v45, %v360_v46  ;;  %v220_v51 = vld [vmem:[#allocation5 + $0x240] sm:$0xff]  ;;  %2572 = vmatprep.subr.bf16.mxu0 %v5737_v49  ;;  %v5864_v56 = vcombine.low %v356_v45, %v360_v46  ;;  %v181_v49 = vld [vmem:[#allocation5 + $0x108] sm:$0xff] }
  0xa1   :  { %v224_v52 = vld [vmem:[#allocation5 + $0x260] sm:$0xff]  ;;  %2573 = vmatpush2.bf16.msra.mxu0 %v5736_v55  ;;  %v5698_v55 = vcombine.low %v189_v41, %v193_v42 }
  0xa2   :  { %v348_v53 = vld [vmem:[#allocation5 + $0x640] sm:$0xff]  ;;  %v5729_v57 = vcombine.high %v220_v51, %v224_v52  ;;  %2613 = vmatprep.subr.bf16.mxu1 %v5865_v50  ;;  %v5728_v1 = vcombine.low %v220_v51, %v224_v52  ;;  %v185_v50 = vld [vmem:[#allocation5 + $0x128] sm:$0xff]  ;;  %v5699_v52 = vcombine.high %v189_v41, %v193_v42 }
  0xa3   :  { %v352_v54 = vld [vmem:[#allocation5 + $0x660] sm:$0xff]  ;;  %2614 = vmatpush2.bf16.msra.mxu1 %v5864_v56  ;;  %v265_v41 = vld [vmem:[#allocation5 + $0x3a8] sm:$0xff] }
  0xa4   :  { %v5857_v58 = vcombine.high %v348_v53, %v352_v54  ;;  %v212_v61 = vld [vmem:[#allocation5 + $0x200] sm:$0xff]  ;;  %2574 = vmatprep.subr.bf16.mxu0 %v5729_v57  ;;  %v5856_v2 = vcombine.low %v348_v53, %v352_v54  ;;  %v173_v57 = vld [vmem:[#allocation5 + $0xc8] sm:$0xff] }
  0xa5   :  { %v216_v62 = vld [vmem:[#allocation5 + $0x220] sm:$0xff]  ;;  %2575 = vmatpush2.bf16.msra.mxu0 %v5728_v1  ;;  %v5690_v1 = vcombine.low %v181_v49, %v185_v50 }
  0xa6   :  { %v340_v63 = vld [vmem:[#allocation5 + $0x600] sm:$0xff]  ;;  %v5721_v3 = vcombine.high %v212_v61, %v216_v62  ;;  %2615 = vmatprep.subr.bf16.mxu1 %v5857_v58  ;;  %v5720_v9 = vcombine.low %v212_v61, %v216_v62  ;;  %v177_v58 = vld [vmem:[#allocation5 + $0xe8] sm:$0xff]  ;;  %v5691_v62 = vcombine.high %v181_v49, %v185_v50 }
  0xa7   :  { %v344_v0 = vld [vmem:[#allocation5 + $0x620] sm:$0xff]  ;;  %2616 = vmatpush2.bf16.msra.mxu1 %v5856_v2  ;;  %v257_v49 = vld [vmem:[#allocation5 + $0x368] sm:$0xff] }
  0xa8   :  { %v5849_v4 = vcombine.high %v340_v63, %v344_v0  ;;  %v460_v5 = vld [vmem:[#allocation5 + $0x9c0] sm:$0xff]  ;;  %2576 = vmatprep.subr.bf16.mxu0 %v5721_v3  ;;  %v5848_v11 = vcombine.low %v340_v63, %v344_v0  ;;  %v165_v3 = vld [vmem:[#allocation5 + $0x88] sm:$0xff] }
  0xa9   :  { %v464_v6 = vld [vmem:[#allocation5 + $0x9e0] sm:$0xff]  ;;  %2577 = vmatpush2.bf16.msra.mxu0 %v5720_v9  ;;  %v5682_v9 = vcombine.low %v173_v57, %v177_v58 }
  0xaa   :  { %v532_v7 = vld [vmem:[#allocation5 + $0xc00] sm:$0xff]  ;;  %v5969_v13 = vcombine.high %v460_v5, %v464_v6  ;;  %2617 = vmatprep.subr.bf16.mxu1 %v5849_v4  ;;  %v5968_v21 = vcombine.low %v460_v5, %v464_v6  ;;  %v169_v4 = vld [vmem:[#allocation5 + $0xa8] sm:$0xff]  ;;  %v5683_v6 = vcombine.high %v173_v57, %v177_v58 }
  0xab   :  { %v536_v8 = vld [vmem:[#allocation5 + $0xc20] sm:$0xff]  ;;  %2618 = vmatpush2.bf16.msra.mxu1 %v5848_v11  ;;  %v157_v11 = vld [vmem:[#allocation5 + $0x48] sm:$0xff]  ;;  %v5674_v18 = vcombine.low %v165_v3, %v169_v4 }
  0xac   :  { %v6041_v14 = vcombine.high %v532_v7, %v536_v8  ;;  %v452_v15 = vld [vmem:[#allocation5 + $0x980] sm:$0xff]  ;;  %2628 = vmatprep.subr.bf16.mxu0 %v5969_v13  ;;  %v6040_v23 = vcombine.low %v532_v7, %v536_v8  ;;  %2579 = vmatmul.mubr.bf16.vlgmr.msra.gmra.mxu0 %v7137_v17  ;;  %v249_v57 = vld [vmem:[#allocation5 + $0x328] sm:$0xff] }
  0xad   :  { %v456_v16 = vld [vmem:[#allocation5 + $0x9a0] sm:$0xff]  ;;  %2629 = vmatpush1.bf16.msra.mxu0 %v5968_v21  ;;  %2660 = vmatprep.mubr.bf16.mxu0 %v7142_v29  ;;  %v149_v21 = vld [vmem:[#allocation5 + $0x8] sm:$0xff] }
  0xae   :  { %v5961_v24 = vcombine.high %v452_v15, %v456_v16  ;;  %v444_v25 = vld [vmem:[#allocation5 + $0x940] sm:$0xff]  ;;  %2683 = vmatprep.subr.bf16.mxu1 %v6041_v14  ;;  %2620 = vmatmul.mubr.bf16.vlgmr.msra.gmra.mxu1 %v7139_v20  ;;  %v5960_v30 = vcombine.low %v452_v15, %v456_v16  ;;  %v5675_v14 = vcombine.high %v165_v3, %v169_v4  ;;  %v241_v3 = vld [vmem:[#allocation5 + $0x2e8] sm:$0xff] }
  0xaf   :  { %v448_v27 = vld [vmem:[#allocation5 + $0x960] sm:$0xff]  ;;  %2684 = vmatpush1.bf16.msra.mxu1 %v6040_v23  ;;  %2701 = vmatprep.mubr.bf16.mxu1 %v7053_v35  ;;  %v5659_v33 = vcombine.high %v149_v21, %v153_v22 }
  0xb0   :  { %2630 = vmatprep.subr.bf16.mxu0 %v5961_v24  ;;  %v5953_v31 = vcombine.high %v444_v25, %v448_v27  ;;  %v436_v34 = vld [vmem:[#allocation5 + $0x900] sm:$0xff]  ;;  %2710 = vmatprep.subr.bf16.mxu1 %v5715_v26  ;;  %v5952_v37 = vcombine.low %v444_v25, %v448_v27  ;;  %v5667_v24 = vcombine.high %v157_v11, %v161_v12 }
  0xb1   :  { %v440_v36 = vld [vmem:[#allocation5 + $0x920] sm:$0xff]  ;;  %2631 = vmatpush1.bf16.msra.mxu0 %v5960_v30  ;;  %v5666_v27 = vcombine.low %v157_v11, %v161_v12  ;;  %v269_v30 = vld [vmem:[#allocation5 + $0x3c8] sm:$0xff] }
  0xb2   :  { %2632 = vmatprep.subr.bf16.mxu0 %v5953_v31  ;;  %v5945_v40 = vcombine.high %v436_v34, %v440_v36  ;;  %v428_v43 = vld [vmem:[#allocation5 + $0x8c0] sm:$0xff]  ;;  %v5944_v46 = vcombine.low %v436_v34, %v440_v36  ;;  %v273_v31 = vld [vmem:[#allocation5 + $0x3e8] sm:$0xff] }
  0xb3   :  { %v432_v45 = vld [vmem:[#allocation5 + $0x8e0] sm:$0xff]  ;;  %v233_v11 = vld [vmem:[#allocation5 + $0x2a8] sm:$0xff] }
  0xb4   :  { %v5937_v48 = vcombine.high %v428_v43, %v432_v45  ;;  %v420_v51 = vld [vmem:[#allocation5 + $0x880] sm:$0xff]  ;;  %v5936_v54 = vcombine.low %v428_v43, %v432_v45  ;;  %v5779_v43 = vcombine.high %v269_v30, %v273_v31 }
  0xb5   :  { %2633 = vmatpush1.bf16.msra.mxu0 %v5952_v37  ;;  %v424_v53 = vld [vmem:[#allocation5 + $0x8a0] sm:$0xff]  ;;  %v5658_v37 = vcombine.low %v149_v21, %v153_v22  ;;  %v225_v21 = vld [vmem:[#allocation5 + $0x268] sm:$0xff] }
  0xb6   :  { %6048 = vmatmul.mubr.msk.bf16.vlgmr.msra.gmra.mxu1 %vm2542_vm0, %v7147_v38  ;;  %2634 = vmatprep.subr.bf16.mxu0 %v5945_v40  ;;  %v5929_v56 = vcombine.high %v420_v51, %v424_v53  ;;  %v412_v61 = vld [vmem:[#allocation5 + $0x840] sm:$0xff]  ;;  %v5928_v0 = vcombine.low %v420_v51, %v424_v53  ;;  %v261_v40 = vld [vmem:[#allocation5 + $0x388] sm:$0xff] }
  0xb7   :  { %2711 = vmatpush1.bf16.msra.mxu1 %v5714_v39  ;;  %2742 = vmatprep.mubr.bf16.mxu1 %v7131_v59  ;;  %v416_v63 = vld [vmem:[#allocation5 + $0x860] sm:$0xff]  ;;  %v5771_v51 = vcombine.high %v261_v40, %v265_v41  ;;  %v333_v22 = vld [vmem:[#allocation5 + $0x5c8] sm:$0xff] }
  0xb8   :  { %2712 = vmatprep.subr.bf16.mxu1 %v5707_v44  ;;  %v5921_v2 = vcombine.high %v412_v61, %v416_v63  ;;  %v404_v5 = vld [vmem:[#allocation5 + $0x800] sm:$0xff]  ;;  %v5920_v8 = vcombine.low %v412_v61, %v416_v63 }
  0xb9   :  { %2635 = vmatpush1.bf16.msra.mxu0 %v5944_v46  ;;  %v408_v7 = vld [vmem:[#allocation5 + $0x820] sm:$0xff]  ;;  %v5778_v46 = vcombine.low %v269_v30, %v273_v31  ;;  %v213_v30 = vld [vmem:[#allocation5 + $0x208] sm:$0xff] }
  0xba   :  { %2636 = vmatprep.subr.bf16.mxu0 %v5937_v48  ;;  %v5913_v10 = vcombine.high %v404_v5, %v408_v7  ;;  %v524_v13 = vld [vmem:[#allocation5 + $0xbc0] sm:$0xff]  ;;  %v5912_v16 = vcombine.low %v404_v5, %v408_v7  ;;  %v253_v48 = vld [vmem:[#allocation5 + $0x348] sm:$0xff] }
  0xbb   :  { %2713 = vmatpush1.bf16.msra.mxu1 %v5706_v47  ;;  %v528_v15 = vld [vmem:[#allocation5 + $0xbe0] sm:$0xff]  ;;  %v5763_v61 = vcombine.high %v253_v48, %v257_v49  ;;  %v217_v31 = vld [vmem:[#allocation5 + $0x228] sm:$0xff] }
  0xbc   :  { %2714 = vmatprep.subr.bf16.mxu1 %v5699_v52  ;;  %v6033_v19 = vcombine.high %v524_v13, %v528_v15  ;;  %v516_v23 = vld [vmem:[#allocation5 + $0xb80] sm:$0xff]  ;;  %v6032_v26 = vcombine.low %v524_v13, %v528_v15 }
  0xbd   :  { %2637 = vmatpush1.bf16.msra.mxu0 %v5936_v54  ;;  %v520_v25 = vld [vmem:[#allocation5 + $0xba0] sm:$0xff]  ;;  %v5770_v54 = vcombine.low %v261_v40, %v265_v41  ;;  %v461_v41 = vld [vmem:[#allocation5 + $0x9c8] sm:$0xff] }
  0xbe   :  { %2638 = vmatprep.subr.bf16.mxu0 %v5929_v56  ;;  %v6025_v28 = vcombine.high %v516_v23, %v520_v25  ;;  %v508_v32 = vld [vmem:[#allocation5 + $0xb40] sm:$0xff]  ;;  %v6024_v36 = vcombine.low %v516_v23, %v520_v25  ;;  %v245_v56 = vld [vmem:[#allocation5 + $0x308] sm:$0xff] }
  0xbf   :  { %2715 = vmatpush1.bf16.msra.mxu1 %v5698_v55  ;;  %v512_v34 = vld [vmem:[#allocation5 + $0xb60] sm:$0xff]  ;;  %v5755_v5 = vcombine.high %v245_v56, %v249_v57  ;;  %v337_v25 = vld [vmem:[#allocation5 + $0x5e8] sm:$0xff] }
  0xc0   :  { %2716 = vmatprep.subr.bf16.mxu1 %v5691_v62  ;;  %v6017_v39 = vcombine.high %v508_v32, %v512_v34  ;;  %v500_v42 = vld [vmem:[#allocation5 + $0xb00] sm:$0xff]  ;;  %v6016_v45 = vcombine.low %v508_v32, %v512_v34  ;;  %v325_v32 = vld [vmem:[#allocation5 + $0x588] sm:$0xff] }
  0xc1   :  { %2639 = vmatpush1.bf16.msra.mxu0 %v5928_v0  ;;  %v504_v44 = vld [vmem:[#allocation5 + $0xb20] sm:$0xff]  ;;  %v5762_v0 = vcombine.low %v253_v48, %v257_v49  ;;  %v329_v34 = vld [vmem:[#allocation5 + $0x5a8] sm:$0xff] }
  0xc2   :  { %2640 = vmatprep.subr.bf16.mxu0 %v5921_v2  ;;  %v6009_v47 = vcombine.high %v500_v42, %v504_v44  ;;  %v492_v50 = vld [vmem:[#allocation5 + $0xac0] sm:$0xff]  ;;  %v6008_v53 = vcombine.low %v500_v42, %v504_v44  ;;  %v237_v2 = vld [vmem:[#allocation5 + $0x2c8] sm:$0xff]  ;;  %v5835_v40 = vcombine.high %v325_v32, %v329_v34 }
  0xc3   :  { %2717 = vmatpush1.bf16.msra.mxu1 %v5690_v1  ;;  %v496_v52 = vld [vmem:[#allocation5 + $0xae0] sm:$0xff]  ;;  %v5747_v13 = vcombine.high %v237_v2, %v241_v3  ;;  %v465_v42 = vld [vmem:[#allocation5 + $0x9e8] sm:$0xff] }
  0xc4   :  { %2718 = vmatprep.subr.bf16.mxu1 %v5683_v6  ;;  %v6001_v55 = vcombine.high %v492_v50, %v496_v52  ;;  %v484_v58 = vld [vmem:[#allocation5 + $0xa80] sm:$0xff]  ;;  %v6000_v63 = vcombine.low %v492_v50, %v496_v52  ;;  %v317_v44 = vld [vmem:[#allocation5 + $0x548] sm:$0xff]  ;;  %v5971_v52 = vcombine.high %v461_v41, %v465_v42 }
  0xc5   :  { %2641 = vmatpush1.bf16.msra.mxu0 %v5920_v8  ;;  %v488_v62 = vld [vmem:[#allocation5 + $0xaa0] sm:$0xff]  ;;  %v5754_v8 = vcombine.low %v245_v56, %v249_v57  ;;  %v453_v49 = vld [vmem:[#allocation5 + $0x988] sm:$0xff] }
  0xc6   :  { %2642 = vmatprep.subr.bf16.mxu0 %v5913_v10  ;;  %v5993_v1 = vcombine.high %v484_v58, %v488_v62  ;;  %v476_v4 = vld [vmem:[#allocation5 + $0xa40] sm:$0xff]  ;;  %v5992_v7 = vcombine.low %v484_v58, %v488_v62  ;;  %v229_v10 = vld [vmem:[#allocation5 + $0x288] sm:$0xff] }
  0xc7   :  { %2719 = vmatpush1.bf16.msra.mxu1 %v5682_v9  ;;  %v480_v6 = vld [vmem:[#allocation5 + $0xa60] sm:$0xff]  ;;  %v5739_v23 = vcombine.high %v229_v10, %v233_v11  ;;  %v457_v50 = vld [vmem:[#allocation5 + $0x9a8] sm:$0xff] }
  0xc8   :  { %2720 = vmatprep.subr.bf16.mxu1 %v5675_v14  ;;  %v5985_v9 = vcombine.high %v476_v4, %v480_v6  ;;  %v468_v12 = vld [vmem:[#allocation5 + $0xa00] sm:$0xff]  ;;  %v5984_v15 = vcombine.low %v476_v4, %v480_v6  ;;  %v445_v57 = vld [vmem:[#allocation5 + $0x948] sm:$0xff] }
  0xc9   :  { %2643 = vmatpush1.bf16.msra.mxu0 %v5912_v16  ;;  %v472_v14 = vld [vmem:[#allocation5 + $0xa20] sm:$0xff]  ;;  %v5746_v16 = vcombine.low %v237_v2, %v241_v3  ;;  %v449_v58 = vld [vmem:[#allocation5 + $0x968] sm:$0xff] }
  0xca   :  { %2644 = vmatprep.subr.bf16.mxu0 %v6033_v19  ;;  %v221_v19 = vld [vmem:[#allocation5 + $0x248] sm:$0xff] }
  0xcb   :  { %2721 = vmatpush1.bf16.msra.mxu1 %v5674_v18  ;;  %v5977_v18 = vcombine.high %v468_v12, %v472_v14  ;;  %v305_v62 = vld [vmem:[#allocation5 + $0x4e8] sm:$0xff] }
  0xcc   :  { %2722 = vmatprep.subr.bf16.mxu1 %v5667_v24  ;;  %v138_v24 = vld [vmem:[#allocation3 + $0x20] sm:$0xff] }
  0xcd   :  { %2645 = vmatpush2.bf16.msra.mxu0 %v6032_v26  ;;  %v5976_v26 = vcombine.low %v468_v12, %v472_v14  ;;  %v437_v3 = vld [vmem:[#allocation5 + $0x908] sm:$0xff] }
  0xce   :  { %2646 = vmatprep.subr.bf16.mxu0 %v6025_v28  ;;  %v5843_v28 = vcombine.high %v333_v22, %v337_v25  ;;  %v441_v4 = vld [vmem:[#allocation5 + $0x928] sm:$0xff] }
  0xcf   :  { %2723 = vmatpush1.bf16.msra.mxu1 %v5666_v27  ;;  %v5738_v27 = vcombine.low %v229_v10, %v233_v11  ;;  %v297_v6 = vld [vmem:[#allocation5 + $0x4a8] sm:$0xff] }
  0xd0   :  { %2724 = vmatprep.subr.bf16.mxu1 %v5659_v33  ;;  %v5731_v33 = vcombine.high %v221_v19, %v225_v21  ;;  %v429_v11 = vld [vmem:[#allocation5 + $0x8c8] sm:$0xff] }
  0xd1   :  { %2647 = vmatpush2.bf16.msra.mxu0 %v6024_v36  ;;  %v7152_v36 = vpack.c.bf16 %v138_v24, %v138_v24  ;;  %v433_v12 = vld [vmem:[#allocation5 + $0x8e8] sm:$0xff] }
  0xd2   :  { %2648 = vmatprep.subr.bf16.mxu0 %v6017_v39  ;;  %v5730_v39 = vcombine.low %v221_v19, %v225_v21  ;;  %v289_v14 = vld [vmem:[#allocation5 + $0x468] sm:$0xff] }
  0xd3   :  { %2725 = vmatpush1.bf16.msra.mxu1 %v5658_v37  ;;  %v5842_v37 = vcombine.low %v333_v22, %v337_v25  ;;  %v421_v21 = vld [vmem:[#allocation5 + $0x888] sm:$0xff] }
  0xd4   :  { %2726 = vmatprep.subr.bf16.mxu1 %v5779_v43  ;;  %v5723_v43 = vcombine.high %v213_v30, %v217_v31  ;;  %v425_v22 = vld [vmem:[#allocation5 + $0x8a8] sm:$0xff] }
  0xd5   :  { %2649 = vmatpush2.bf16.msra.mxu0 %v6016_v45  ;;  %v321_v45 = vld [vmem:[#allocation5 + $0x568] sm:$0xff] }
  0xd6   :  { %2650 = vmatprep.subr.bf16.mxu0 %v6009_v47  ;;  %v5722_v47 = vcombine.low %v213_v30, %v217_v31  ;;  %v5827_v48 = vcombine.high %v317_v44, %v321_v45  ;;  %v277_v24 = vld [vmem:[#allocation5 + $0x408] sm:$0xff] }
  0xd7   :  { %2727 = vmatpush2.bf16.msra.mxu1 %v5778_v46  ;;  %v5834_v46 = vcombine.low %v325_v32, %v329_v34  ;;  %v281_v25 = vld [vmem:[#allocation5 + $0x428] sm:$0xff]  ;;  %v5931_v32 = vcombine.high %v421_v21, %v425_v22 }
  0xd8   :  { %2728 = vmatprep.subr.bf16.mxu1 %v5771_v51  ;;  %v309_v51 = vld [vmem:[#allocation5 + $0x508] sm:$0xff] }
  0xd9   :  { %2651 = vmatpush2.bf16.msra.mxu0 %v6008_v53  ;;  %v313_v53 = vld [vmem:[#allocation5 + $0x528] sm:$0xff] }
  0xda   :  { %2652 = vmatprep.subr.bf16.mxu0 %v6001_v55  ;;  %v5970_v55 = vcombine.low %v461_v41, %v465_v42  ;;  %v5819_v56 = vcombine.high %v309_v51, %v313_v53  ;;  %v413_v30 = vld [vmem:[#allocation5 + $0x848] sm:$0xff] }
  0xdb   :  { %2729 = vmatpush2.bf16.msra.mxu1 %v5770_v54  ;;  %v5826_v54 = vcombine.low %v317_v44, %v321_v45  ;;  %v417_v31 = vld [vmem:[#allocation5 + $0x868] sm:$0xff] }
  0xdc   :  { %2730 = vmatprep.subr.bf16.mxu1 %v5763_v61  ;;  %v301_v61 = vld [vmem:[#allocation5 + $0x4c8] sm:$0xff] }
  0xdd   :  { %2653 = vmatpush2.bf16.msra.mxu0 %v6000_v63  ;;  %v5963_v63 = vcombine.high %v453_v49, %v457_v50  ;;  %v5811_v2 = vcombine.high %v301_v61, %v305_v62  ;;  %v401_v34 = vld [vmem:[#allocation5 + $0x7e8] sm:$0xff] }
  0xde   :  { %2654 = vmatprep.subr.bf16.mxu0 %v5993_v1  ;;  %v5962_v1 = vcombine.low %v453_v49, %v457_v50  ;;  %v405_v41 = vld [vmem:[#allocation5 + $0x808] sm:$0xff] }
  0xdf   :  { %2731 = vmatpush2.bf16.msra.mxu1 %v5762_v0  ;;  %v5818_v0 = vcombine.low %v309_v51, %v313_v53  ;;  %v409_v42 = vld [vmem:[#allocation5 + $0x828] sm:$0xff] }
  0xe0   :  { %2732 = vmatprep.subr.bf16.mxu1 %v5755_v5  ;;  %v293_v5 = vld [vmem:[#allocation5 + $0x488] sm:$0xff]  ;;  %v5915_v51 = vcombine.high %v405_v41, %v409_v42 }
  0xe1   :  { %2655 = vmatpush2.bf16.msra.mxu0 %v5992_v7  ;;  %v5955_v7 = vcombine.high %v445_v57, %v449_v58  ;;  %v5803_v10 = vcombine.high %v293_v5, %v297_v6  ;;  %v389_v44 = vld [vmem:[#allocation5 + $0x788] sm:$0xff] }
  0xe2   :  { %2656 = vmatprep.subr.bf16.mxu0 %v5985_v9  ;;  %v5954_v9 = vcombine.low %v445_v57, %v449_v58  ;;  %v393_v45 = vld [vmem:[#allocation5 + $0x7a8] sm:$0xff] }
  0xe3   :  { %2733 = vmatpush2.bf16.msra.mxu1 %v5754_v8  ;;  %v5810_v8 = vcombine.low %v301_v61, %v305_v62  ;;  %v525_v49 = vld [vmem:[#allocation5 + $0xbc8] sm:$0xff] }
  0xe4   :  { %2734 = vmatprep.subr.bf16.mxu1 %v5747_v13  ;;  %v285_v13 = vld [vmem:[#allocation5 + $0x448] sm:$0xff] }
  0xe5   :  { %2657 = vmatpush2.bf16.msra.mxu0 %v5984_v15  ;;  %v5947_v15 = vcombine.high %v437_v3, %v441_v4  ;;  %v5795_v19 = vcombine.high %v285_v13, %v289_v14  ;;  %v529_v50 = vld [vmem:[#allocation5 + $0xbe8] sm:$0xff] }
  0xe6   :  { %2658 = vmatprep.subr.bf16.mxu0 %v5977_v18  ;;  %v5946_v18 = vcombine.low %v437_v3, %v441_v4  ;;  %v385_v53 = vld [vmem:[#allocation5 + $0x768] sm:$0xff]  ;;  %v6035_v61 = vcombine.high %v525_v49, %v529_v50 }
  0xe7   :  { %2735 = vmatpush2.bf16.msra.mxu1 %v5746_v16  ;;  %v5802_v16 = vcombine.low %v293_v5, %v297_v6  ;;  %v517_v57 = vld [vmem:[#allocation5 + $0xb88] sm:$0xff] }
  0xe8   :  { %2736 = vmatprep.subr.bf16.mxu1 %v5739_v23  ;;  %v5939_v23 = vcombine.high %v429_v11, %v433_v12  ;;  %v521_v58 = vld [vmem:[#allocation5 + $0xba8] sm:$0xff] }
  0xe9   :  { %2659 = vmatpush2.bf16.msra.mxu0 %v5976_v26  ;;  %v5794_v26 = vcombine.low %v285_v13, %v289_v14  ;;  %v373_v62 = vld [vmem:[#allocation5 + $0x708] sm:$0xff]  ;;  %v6027_v5 = vcombine.high %v517_v57, %v521_v58 }
  0xea   :  { %2751 = vmatprep.subr.bf16.mxu0 %v5843_v28  ;;  %v5787_v28 = vcombine.high %v277_v24, %v281_v25  ;;  %v509_v3 = vld [vmem:[#allocation5 + $0xb48] sm:$0xff] }
  0xeb   :  { %2737 = vmatpush2.bf16.msra.mxu1 %v5738_v27  ;;  %v5938_v27 = vcombine.low %v429_v11, %v433_v12  ;;  %v513_v4 = vld [vmem:[#allocation5 + $0xb68] sm:$0xff] }
  0xec   :  { %2738 = vmatprep.subr.bf16.mxu1 %v5731_v33  ;;  %2661 = vmatmul.mubr.bf16.vlgmr.msra.gmra.mxu0 %v7152_v36  ;;  %v397_v33 = vld [vmem:[#allocation5 + $0x7c8] sm:$0xff]  ;;  %v6019_v13 = vcombine.high %v509_v3, %v513_v4 }
  0xed   :  { %2752 = vmatpush1.bf16.msra.mxu0 %v5842_v37  ;;  %2783 = vmatprep.mubr.bf16.mxu0 %v7133_v60  ;;  %v5786_v37 = vcombine.low %v277_v24, %v281_v25  ;;  %v365_v6 = vld [vmem:[#allocation5 + $0x6c8] sm:$0xff] }
  0xee   :  { %2753 = vmatprep.subr.bf16.mxu0 %v5835_v40  ;;  %v5907_v40 = vcombine.high %v397_v33, %v401_v34  ;;  %v501_v11 = vld [vmem:[#allocation5 + $0xb08] sm:$0xff] }
  0xef   :  { %2739 = vmatpush2.bf16.msra.mxu1 %v5730_v39  ;;  %v5930_v39 = vcombine.low %v421_v21, %v425_v22  ;;  %v505_v12 = vld [vmem:[#allocation5 + $0xb28] sm:$0xff] }
  0xf0   :  { %2740 = vmatprep.subr.bf16.mxu1 %v5723_v43  ;;  %v5923_v43 = vcombine.high %v413_v30, %v417_v31  ;;  %v357_v14 = vld [vmem:[#allocation5 + $0x688] sm:$0xff] }
  0xf1   :  { %2754 = vmatpush1.bf16.msra.mxu0 %v5834_v46  ;;  %v5906_v46 = vcombine.low %v397_v33, %v401_v34  ;;  %v493_v21 = vld [vmem:[#allocation5 + $0xac8] sm:$0xff] }
  0xf2   :  { %2755 = vmatprep.subr.bf16.mxu0 %v5827_v48  ;;  %v5899_v48 = vcombine.high %v389_v44, %v393_v45  ;;  %v497_v22 = vld [vmem:[#allocation5 + $0xae8] sm:$0xff] }
  0xf3   :  { %2741 = vmatpush2.bf16.msra.mxu1 %v5722_v47  ;;  %v5922_v47 = vcombine.low %v413_v30, %v417_v31  ;;  %v349_v24 = vld [vmem:[#allocation5 + $0x648] sm:$0xff] }
  0xf4   :  { %2792 = vmatprep.subr.bf16.mxu1 %v5971_v52  ;;  %v381_v52 = vld [vmem:[#allocation5 + $0x748] sm:$0xff] }
  0xf5   :  { %2756 = vmatpush1.bf16.msra.mxu0 %v5826_v54  ;;  %v5898_v54 = vcombine.low %v389_v44, %v393_v45  ;;  %v353_v25 = vld [vmem:[#allocation5 + $0x668] sm:$0xff] }
  0xf6   :  { %2743 = vmatmul.mubr.bf16.vlgmr.msra.gmra.mxu1 %v7137_v17  ;;  %2757 = vmatprep.subr.bf16.mxu0 %v5819_v56  ;;  %v5891_v56 = vcombine.high %v381_v52, %v385_v53  ;;  %v485_v30 = vld [vmem:[#allocation5 + $0xa88] sm:$0xff] }
  0xf7   :  { %2793 = vmatpush1.bf16.msra.mxu1 %v5970_v55  ;;  %2824 = vmatprep.mubr.bf16.mxu1 %v7142_v29  ;;  %v5914_v55 = vcombine.low %v405_v41, %v409_v42  ;;  %v489_v31 = vld [vmem:[#allocation5 + $0xaa8] sm:$0xff] }
  0xf8   :  { %2794 = vmatprep.subr.bf16.mxu1 %v5963_v63  ;;  %v377_v63 = vld [vmem:[#allocation5 + $0x728] sm:$0xff] }
  0xf9   :  { %2758 = vmatpush1.bf16.msra.mxu0 %v5818_v0  ;;  %v5890_v0 = vcombine.low %v381_v52, %v385_v53  ;;  %v341_v33 = vld [vmem:[#allocation5 + $0x608] sm:$0xff]  ;;  %v206_v52 = vld [vmem:[#allocation5 + $0x1d0] sm:$0xff] }
  0xfa   :  { %2759 = vmatprep.subr.bf16.mxu0 %v5811_v2  ;;  %v5883_v2 = vcombine.high %v373_v62, %v377_v63  ;;  %v345_v34 = vld [vmem:[#allocation5 + $0x628] sm:$0xff]  ;;  %v210_v53 = vld [vmem:[#allocation5 + $0x1f0] sm:$0xff] }
  0xfb   :  { %2795 = vmatpush1.bf16.msra.mxu1 %v5962_v1  ;;  %v6034_v1 = vcombine.low %v525_v49, %v529_v50  ;;  %v477_v41 = vld [vmem:[#allocation5 + $0xa48] sm:$0xff] }
  0xfc   :  { %2796 = vmatprep.subr.bf16.mxu1 %v5955_v7  ;;  %v369_v7 = vld [vmem:[#allocation5 + $0x6e8] sm:$0xff] }
  0xfd   :  { %2760 = vmatpush1.bf16.msra.mxu0 %v5810_v8  ;;  %v5882_v8 = vcombine.low %v373_v62, %v377_v63  ;;  %v481_v42 = vld [vmem:[#allocation5 + $0xa68] sm:$0xff]  ;;  %v198_v63 = vld [vmem:[#allocation5 + $0x190] sm:$0xff] }
  0xfe   :  { %2761 = vmatprep.subr.bf16.mxu0 %v5803_v10  ;;  %v5875_v10 = vcombine.high %v365_v6, %v369_v7  ;;  %v533_v44 = vld [vmem:[#allocation5 + $0xc08] sm:$0xff] }
  0xff   :  { %2797 = vmatpush1.bf16.msra.mxu1 %v5954_v9  ;;  %v6026_v9 = vcombine.low %v517_v57, %v521_v58  ;;  %v537_v45 = vld [vmem:[#allocation5 + $0xc28] sm:$0xff]  ;;  %v334_v58 = vld [vmem:[#allocation5 + $0x5d0] sm:$0xff] }
 0x100   :  { %2798 = vmatprep.subr.bf16.mxu1 %v5947_v15  ;;  %v361_v15 = vld [vmem:[#allocation5 + $0x6a8] sm:$0xff] }
 0x101   :  { %2762 = vmatpush1.bf16.msra.mxu0 %v5802_v16  ;;  %v5874_v16 = vcombine.low %v365_v6, %v369_v7  ;;  %v469_v49 = vld [vmem:[#allocation5 + $0xa08] sm:$0xff]  ;;  %v190_v7 = vld [vmem:[#allocation5 + $0x150] sm:$0xff] }
 0x102   :  { %2763 = vmatprep.subr.bf16.mxu0 %v5795_v19  ;;  %v5867_v19 = vcombine.high %v357_v14, %v361_v15  ;;  %v473_v50 = vld [vmem:[#allocation5 + $0xa28] sm:$0xff] }
 0x103   :  { %2799 = vmatpush1.bf16.msra.mxu1 %v5946_v18  ;;  %v6018_v18 = vcombine.low %v509_v3, %v513_v4  ;;  %v5979_v57 = vcombine.high %v469_v49, %v473_v50  ;;  %v5978_v62 = vcombine.low %v469_v49, %v473_v50  ;;  %v330_v3 = vld [vmem:[#allocation5 + $0x5b0] sm:$0xff]  ;;  %v5716_v4 = vcombine.low %v206_v52, %v210_v53 }
 0x104   :  { %2800 = vmatprep.subr.bf16.mxu1 %v5939_v23  ;;  %v6011_v23 = vcombine.high %v501_v11, %v505_v12  ;;  %v290_v49 = vld [vmem:[#allocation5 + $0x470] sm:$0xff] }
 0x105   :  { %2764 = vmatpush1.bf16.msra.mxu0 %v5794_v26  ;;  %v5866_v26 = vcombine.low %v357_v14, %v361_v15  ;;  %v182_v15 = vld [vmem:[#allocation5 + $0x110] sm:$0xff] }
 0x106   :  { %2765 = vmatprep.subr.bf16.mxu0 %v5787_v28  ;;  %v5859_v28 = vcombine.high %v349_v24, %v353_v25 }
 0x107   :  { %2801 = vmatpush1.bf16.msra.mxu1 %v5938_v27  ;;  %v6010_v27 = vcombine.low %v501_v11, %v505_v12  ;;  %v322_v11 = vld [vmem:[#allocation5 + $0x570] sm:$0xff] }
 0x108   :  { %2802 = vmatprep.subr.bf16.mxu1 %v5931_v32  ;;  %v6003_v32 = vcombine.high %v493_v21, %v497_v22 }
 0x109   :  { %2766 = vmatpush1.bf16.msra.mxu0 %v5786_v37  ;;  %v5858_v37 = vcombine.low %v349_v24, %v353_v25  ;;  %v174_v25 = vld [vmem:[#allocation5 + $0xd0] sm:$0xff] }
 0x10a   :  { %2767 = vmatprep.subr.bf16.mxu0 %v5907_v40  ;;  %v5851_v40 = vcombine.high %v341_v33, %v345_v34 }
 0x10b   :  { %2803 = vmatpush1.bf16.msra.mxu1 %v5930_v39  ;;  %v6002_v39 = vcombine.low %v493_v21, %v497_v22  ;;  %v314_v21 = vld [vmem:[#allocation5 + $0x530] sm:$0xff] }
 0x10c   :  { %2804 = vmatprep.subr.bf16.mxu1 %v5923_v43  ;;  %v5995_v43 = vcombine.high %v485_v30, %v489_v31 }
 0x10d   :  { %2768 = vmatpush2.bf16.msra.mxu0 %v5906_v46  ;;  %v5850_v46 = vcombine.low %v341_v33, %v345_v34  ;;  %v166_v34 = vld [vmem:[#allocation5 + $0x90] sm:$0xff] }
 0x10e   :  { %2769 = vmatprep.subr.bf16.mxu0 %v5899_v48  ;;  %v6043_v48 = vcombine.high %v533_v44, %v537_v45 }
 0x10f   :  { %2805 = vmatpush1.bf16.msra.mxu1 %v5922_v47  ;;  %v5994_v47 = vcombine.low %v485_v30, %v489_v31  ;;  %v306_v30 = vld [vmem:[#allocation5 + $0x4f0] sm:$0xff] }
 0x110   :  { %2806 = vmatprep.subr.bf16.mxu1 %v5915_v51  ;;  %v5987_v51 = vcombine.high %v477_v41, %v481_v42 }
 0x111   :  { %2770 = vmatpush2.bf16.msra.mxu0 %v5898_v54  ;;  %v6042_v54 = vcombine.low %v533_v44, %v537_v45  ;;  %v158_v45 = vld [vmem:[#allocation5 + $0x50] sm:$0xff] }
 0x112   :  { %2771 = vmatprep.subr.bf16.mxu0 %v5891_v56  ;;  %v5717_v56 = vcombine.high %v206_v52, %v210_v53  ;;  %v150_v53 = vld [vmem:[#allocation5 + $0x10] sm:$0xff] }
 0x113   :  { %2807 = vmatpush1.bf16.msra.mxu1 %v5914_v55  ;;  %v5986_v55 = vcombine.low %v477_v41, %v481_v42  ;;  %v298_v41 = vld [vmem:[#allocation5 + $0x4b0] sm:$0xff] }
 0x114   :  { %2808 = vmatprep.subr.bf16.mxu1 %v6035_v61  ;;  %v338_v61 = vld [vmem:[#allocation5 + $0x5f0] sm:$0xff] }
 0x115   :  { %2772 = vmatpush2.bf16.msra.mxu0 %v5890_v0  ;;  %v202_v0 = vld [vmem:[#allocation5 + $0x1b0] sm:$0xff] }
 0x116   :  { %2773 = vmatprep.subr.bf16.mxu0 %v5883_v2  ;;  %v326_v2 = vld [vmem:[#allocation5 + $0x590] sm:$0xff]  ;;  %v5709_v6 = vcombine.high %v198_v63, %v202_v0  ;;  %v5708_v12 = vcombine.low %v198_v63, %v202_v0 }
 0x117   :  { %2809 = vmatpush2.bf16.msra.mxu1 %v6034_v1  ;;  %v5845_v1 = vcombine.high %v334_v58, %v338_v61  ;;  %v270_v0 = vld [vmem:[#allocation5 + $0x3d0] sm:$0xff] }
 0x118   :  { %2810 = vmatprep.subr.bf16.mxu1 %v6027_v5  ;;  %v5844_v5 = vcombine.low %v334_v58, %v338_v61 }
 0x119   :  { %2774 = vmatpush2.bf16.msra.mxu0 %v5882_v8  ;;  %v194_v8 = vld [vmem:[#allocation5 + $0x170] sm:$0xff] }
 0x11a   :  { %2775 = vmatprep.subr.bf16.mxu0 %v5875_v10  ;;  %v318_v10 = vld [vmem:[#allocation5 + $0x550] sm:$0xff]  ;;  %v5701_v14 = vcombine.high %v190_v7, %v194_v8  ;;  %v5700_v22 = vcombine.low %v190_v7, %v194_v8 }
 0x11b   :  { %2811 = vmatpush2.bf16.msra.mxu1 %v6026_v9  ;;  %v5837_v9 = vcombine.high %v326_v2, %v330_v3  ;;  %v262_v8 = vld [vmem:[#allocation5 + $0x390] sm:$0xff] }
 0x11c   :  { %2812 = vmatprep.subr.bf16.mxu1 %v6019_v13  ;;  %v5836_v13 = vcombine.low %v326_v2, %v330_v3  ;;  %v398_v2 = vld [vmem:[#allocation5 + $0x7d0] sm:$0xff] }
 0x11d   :  { %2776 = vmatpush2.bf16.msra.mxu0 %v5874_v16  ;;  %v186_v16 = vld [vmem:[#allocation5 + $0x130] sm:$0xff] }
 0x11e   :  { %2777 = vmatprep.subr.bf16.mxu0 %v5867_v19  ;;  %v310_v19 = vld [vmem:[#allocation5 + $0x510] sm:$0xff]  ;;  %v5693_v24 = vcombine.high %v182_v15, %v186_v16  ;;  %v5692_v31 = vcombine.low %v182_v15, %v186_v16 }
 0x11f   :  { %2813 = vmatpush2.bf16.msra.mxu1 %v6018_v18  ;;  %v5829_v18 = vcombine.high %v318_v10, %v322_v11  ;;  %v402_v3 = vld [vmem:[#allocation5 + $0x7f0] sm:$0xff] }
 0x120   :  { %2814 = vmatprep.subr.bf16.mxu1 %v6011_v23  ;;  %v5828_v23 = vcombine.low %v318_v10, %v322_v11  ;;  %v5909_v7 = vcombine.high %v398_v2, %v402_v3  ;;  %v390_v10 = vld [vmem:[#allocation5 + $0x790] sm:$0xff] }
 0x121   :  { %2778 = vmatpush2.bf16.msra.mxu0 %v5866_v26  ;;  %v178_v26 = vld [vmem:[#allocation5 + $0xf0] sm:$0xff] }
 0x122   :  { %2779 = vmatprep.subr.bf16.mxu0 %v5859_v28  ;;  %v302_v28 = vld [vmem:[#allocation5 + $0x4d0] sm:$0xff]  ;;  %v5685_v33 = vcombine.high %v174_v25, %v178_v26  ;;  %v5684_v42 = vcombine.low %v174_v25, %v178_v26 }
 0x123   :  { %2815 = vmatpush2.bf16.msra.mxu1 %v6010_v27  ;;  %v5821_v27 = vcombine.high %v310_v19, %v314_v21  ;;  %v394_v11 = vld [vmem:[#allocation5 + $0x7b0] sm:$0xff] }
 0x124   :  { %2816 = vmatprep.subr.bf16.mxu1 %v6003_v32  ;;  %v5820_v32 = vcombine.low %v310_v19, %v314_v21  ;;  %v5901_v15 = vcombine.high %v390_v10, %v394_v11  ;;  %v254_v16 = vld [vmem:[#allocation5 + $0x350] sm:$0xff] }
 0x125   :  { %2780 = vmatpush2.bf16.msra.mxu0 %v5858_v37  ;;  %v170_v37 = vld [vmem:[#allocation5 + $0xb0] sm:$0xff] }
 0x126   :  { %2781 = vmatprep.subr.bf16.mxu0 %v5851_v40  ;;  %v294_v40 = vld [vmem:[#allocation5 + $0x490] sm:$0xff]  ;;  %v5677_v44 = vcombine.high %v166_v34, %v170_v37  ;;  %v5676_v50 = vcombine.low %v166_v34, %v170_v37 }
 0x127   :  { %2817 = vmatpush2.bf16.msra.mxu1 %v6002_v39  ;;  %v5813_v39 = vcombine.high %v302_v28, %v306_v30  ;;  %v382_v19 = vld [vmem:[#allocation5 + $0x750] sm:$0xff] }
 0x128   :  { %2818 = vmatprep.subr.bf16.mxu1 %v5995_v43  ;;  %v5812_v43 = vcombine.low %v302_v28, %v306_v30  ;;  %v386_v21 = vld [vmem:[#allocation5 + $0x770] sm:$0xff] }
 0x129   :  { %2782 = vmatpush2.bf16.msra.mxu0 %v5850_v46  ;;  %v162_v46 = vld [vmem:[#allocation5 + $0x70] sm:$0xff]  ;;  %v5893_v25 = vcombine.high %v382_v19, %v386_v21 }
 0x12a   :  { %2847 = vmatprep.subr.bf16.mxu0 %v6043_v48  ;;  %v286_v48 = vld [vmem:[#allocation5 + $0x450] sm:$0xff]  ;;  %v5669_v52 = vcombine.high %v158_v45, %v162_v46  ;;  %v5668_v58 = vcombine.low %v158_v45, %v162_v46 }
 0x12b   :  { %2819 = vmatpush2.bf16.msra.mxu1 %v5994_v47  ;;  %v5805_v47 = vcombine.high %v294_v40, %v298_v41  ;;  %v5796_v61 = vcombine.low %v286_v48, %v290_v49  ;;  %v246_v26 = vld [vmem:[#allocation5 + $0x310] sm:$0xff] }
 0x12c   :  { %2820 = vmatprep.subr.bf16.mxu1 %v5987_v51  ;;  %2784 = vmatmul.mubr.bf16.vlgmr.msra.gmra.mxu0 %v7139_v20  ;;  %v5804_v51 = vcombine.low %v294_v40, %v298_v41  ;;  %v374_v28 = vld [vmem:[#allocation5 + $0x710] sm:$0xff] }
 0x12d   :  { %2848 = vmatpush1.bf16.msra.mxu0 %v6042_v54  ;;  %2865 = vmatprep.mubr.bf16.mxu0 %v7053_v35  ;;  %v154_v54 = vld [vmem:[#allocation5 + $0x30] sm:$0xff] }
 0x12e   :  { %2874 = vmatprep.subr.bf16.mxu0 %v5717_v56  ;;  %v278_v56 = vld [vmem:[#allocation5 + $0x410] sm:$0xff] }
 0x12f   :  { %2821 = vmatpush2.bf16.msra.mxu1 %v5986_v55  ;;  %v5797_v55 = vcombine.high %v286_v48, %v290_v49  ;;  %v378_v30 = vld [vmem:[#allocation5 + $0x730] sm:$0xff] }
 0x130   :  { %2822 = vmatprep.subr.bf16.mxu1 %v5979_v57  ;;  %v282_v57 = vld [vmem:[#allocation5 + $0x430] sm:$0xff]  ;;  %v5885_v34 = vcombine.high %v374_v28, %v378_v30 }
 0x131   :  { %v5789_v63 = vcombine.high %v278_v56, %v282_v57  ;;  %v238_v37 = vld [vmem:[#allocation5 + $0x2d0] sm:$0xff] }
 0x132   :  { %v366_v40 = vld [vmem:[#allocation5 + $0x6d0] sm:$0xff] }
 0x133   :  { %2823 = vmatpush2.bf16.msra.mxu1 %v5978_v62  ;;  %v5661_v62 = vcombine.high %v150_v53, %v154_v54  ;;  %v370_v41 = vld [vmem:[#allocation5 + $0x6f0] sm:$0xff] }
 0x134   :  { %2915 = vmatprep.subr.bf16.mxu1 %v5845_v1  ;;  %6049 = vmatmul.mubr.msk.bf16.vlgmr.msra.gmra.mxu0 %vm2542_vm0, %v7147_v38  ;;  %v274_v1 = vld [vmem:[#allocation5 + $0x3f0] sm:$0xff]  ;;  %v5877_v46 = vcombine.high %v366_v40, %v370_v41 }
 0x135   :  { %2875 = vmatpush1.bf16.msra.mxu0 %v5716_v4  ;;  %2906 = vmatprep.mubr.bf16.mxu0 %v7131_v59  ;;  %v5660_v4 = vcombine.low %v150_v53, %v154_v54  ;;  %v234_v48 = vld [vmem:[#allocation5 + $0x2b0] sm:$0xff]  ;;  %v5876_v53 = vcombine.low %v366_v40, %v370_v41  ;;  %v211_v40 = vld [vmem:[#allocation5 + $0x1f8] sm:$0xff] }
 0x136   :  { %2825 = vmatmul.mubr.bf16.vlgmr.msra.gmra.mxu1 %v7152_v36  ;;  %2876 = vmatprep.subr.bf16.mxu0 %v5709_v6  ;;  %v5781_v6 = vcombine.high %v270_v0, %v274_v1  ;;  %v358_v49 = vld [vmem:[#allocation5 + $0x690] sm:$0xff] }
 0x137   :  { %2916 = vmatpush1.bf16.msra.mxu1 %v5844_v5  ;;  %2947 = vmatprep.mubr.bf16.mxu1 %v7133_v60  ;;  %v5788_v5 = vcombine.low %v278_v56, %v282_v57  ;;  %v222_v56 = vld [vmem:[#allocation5 + $0x250] sm:$0xff] }
 0x138   :  { %2917 = vmatprep.subr.bf16.mxu1 %v5837_v9  ;;  %v266_v9 = vld [vmem:[#allocation5 + $0x3b0] sm:$0xff] }
 0x139   :  { %2877 = vmatpush1.bf16.msra.mxu0 %v5708_v12  ;;  %v5780_v12 = vcombine.low %v270_v0, %v274_v1  ;;  %v226_v57 = vld [vmem:[#allocation5 + $0x270] sm:$0xff] }
 0x13a   :  { %2878 = vmatprep.subr.bf16.mxu0 %v5701_v14  ;;  %v5773_v14 = vcombine.high %v262_v8, %v266_v9  ;;  %v5733_v1 = vcombine.high %v222_v56, %v226_v57 }
 0x13b   :  { %2918 = vmatpush1.bf16.msra.mxu1 %v5836_v13  ;;  %v5908_v13 = vcombine.low %v398_v2, %v402_v3  ;;  %v7170_v2 = vld [vmem:[#allocation7] sm:$0xff] }
 0x13c   :  { %2919 = vmatprep.subr.bf16.mxu1 %v5829_v18  ;;  %v258_v18 = vld [vmem:[#allocation5 + $0x370] sm:$0xff] }
 0x13d   :  { %2879 = vmatpush1.bf16.msra.mxu0 %v5700_v22  ;;  %v5772_v22 = vcombine.low %v262_v8, %v266_v9  ;;  %v346_v8 = vld [vmem:[#allocation5 + $0x630] sm:$0xff]  ;;  %v5732_v9 = vcombine.low %v222_v56, %v226_v57 }
 0x13e   :  { %2880 = vmatprep.subr.bf16.mxu0 %v5693_v24  ;;  %v5765_v24 = vcombine.high %v254_v16, %v258_v18  ;;  %v438_v56 = vld [vmem:[#allocation5 + $0x910] sm:$0xff] }
 0x13f   :  { %2920 = vmatpush1.bf16.msra.mxu1 %v5828_v23  ;;  %v5900_v23 = vcombine.low %v390_v10, %v394_v11  ;;  %v442_v57 = vld [vmem:[#allocation5 + $0x930] sm:$0xff] }
 0x140   :  { %2921 = vmatprep.subr.bf16.mxu1 %v5821_v27  ;;  %v250_v27 = vld [vmem:[#allocation5 + $0x330] sm:$0xff] }
 0x141   :  { %2881 = vmatpush1.bf16.msra.mxu0 %v5692_v31  ;;  %v5764_v31 = vcombine.low %v254_v16, %v258_v18  ;;  %v466_v16 = vld [vmem:[#allocation5 + $0x9f0] sm:$0xff] }
 0x142   :  { %2882 = vmatprep.subr.bf16.mxu0 %v5685_v33  ;;  %v5757_v33 = vcombine.high %v246_v26, %v250_v27 }
 0x143   :  { %2922 = vmatpush1.bf16.msra.mxu1 %v5820_v32  ;;  %v5892_v32 = vcombine.low %v382_v19, %v386_v21  ;;  %v534_v19 = vld [vmem:[#allocation5 + $0xc10] sm:$0xff] }
 0x144   :  { %2923 = vmatprep.subr.bf16.mxu1 %v5813_v39  ;;  %v242_v39 = vld [vmem:[#allocation5 + $0x2f0] sm:$0xff] }
 0x145   :  { %2883 = vmatpush1.bf16.msra.mxu0 %v5684_v42  ;;  %v5756_v42 = vcombine.low %v246_v26, %v250_v27  ;;  %v5749_v45 = vcombine.high %v238_v37, %v242_v39  ;;  %v538_v21 = vld [vmem:[#allocation5 + $0xc30] sm:$0xff] }
 0x146   :  { %2884 = vmatprep.subr.bf16.mxu0 %v5677_v44  ;;  %v5884_v44 = vcombine.low %v374_v28, %v378_v30 }
 0x147   :  { %2924 = vmatpush1.bf16.msra.mxu1 %v5812_v43  ;;  %v542_v43 = vlaneseq }
 0x148   :  { %2925 = vmatprep.subr.bf16.mxu1 %v5805_v47  ;;  %v230_v47 = vld [vmem:[#allocation5 + $0x290] sm:$0xff] }
 0x149   :  { %2885 = vmatpush1.bf16.msra.mxu0 %v5676_v50  ;;  %v362_v50 = vld [vmem:[#allocation5 + $0x6b0] sm:$0xff]  ;;  %v5741_v54 = vcombine.high %v230_v47, %v234_v48 }
 0x14a   :  { %2886 = vmatprep.subr.bf16.mxu0 %v5669_v52  ;;  %v7165_v52 = vshrl.u32 %v542_v43, 7  ;;  %v5868_v0 = vcombine.low %v358_v49, %v362_v50 }
 0x14b   :  { %2926 = vmatpush1.bf16.msra.mxu1 %v5804_v51  ;;  %v5748_v51 = vcombine.low %v238_v37, %v242_v39  ;;  %v207_v39 = vld [vmem:[#allocation5 + $0x1d8] sm:$0xff] }
 0x14c   :  { %2927 = vmatprep.subr.bf16.mxu1 %v5797_v55  ;;  %v5869_v55 = vcombine.high %v358_v49, %v362_v50  ;;  %v446_v49 = vld [vmem:[#allocation5 + $0x950] sm:$0xff] }
 0x14d   :  { %2887 = vmatpush1.bf16.msra.mxu0 %v5668_v58  ;;  %v350_v58 = vld [vmem:[#allocation5 + $0x650] sm:$0xff] }
 0x14e   :  { %2888 = vmatprep.subr.bf16.mxu0 %v5661_v62  ;;  %v5740_v62 = vcombine.low %v230_v47, %v234_v48  ;;  %v5719_v48 = vcombine.high %v207_v39, %v211_v40  ;;  %v450_v50 = vld [vmem:[#allocation5 + $0x970] sm:$0xff] }
 0x14f   :  { %2928 = vmatpush1.bf16.msra.mxu1 %v5796_v61  ;;  %v354_v61 = vld [vmem:[#allocation5 + $0x670] sm:$0xff] }
 0x150   :  { %2929 = vmatprep.subr.bf16.mxu1 %v5789_v63  ;;  %v7168_v63 = vsub.s32 0, %v7165_v52  ;;  %v5861_v3 = vcombine.high %v350_v58, %v354_v61  ;;  %v5860_v11 = vcombine.low %v350_v58, %v354_v61  ;;  %v199_v58 = vld [vmem:[#allocation5 + $0x198] sm:$0xff] }
 0x151   :  { %2889 = vmatpush1.bf16.msra.mxu0 %v5660_v4  ;;  %v7173_v4 = vsub.s32 1, %v7165_v52  ;;  %v203_v61 = vld [vmem:[#allocation5 + $0x1b8] sm:$0xff] }
 0x152   :  { %2890 = vmatprep.subr.bf16.mxu0 %v5781_v6  ;;  %v218_v6 = vld [vmem:[#allocation5 + $0x230] sm:$0xff]  ;;  %v545_v10 = vrot.slane %v7170_v2, %v7168_v63 }
 0x153   :  { %2930 = vmatpush1.bf16.msra.mxu1 %v5788_v5  ;;  %v214_v5 = vld [vmem:[#allocation5 + $0x210] sm:$0xff] }
 0x154   :  { %2931 = vmatprep.subr.bf16.mxu1 %v5909_v7  ;;  %v342_v7 = vld [vmem:[#allocation5 + $0x610] sm:$0xff] }
 0x155   :  { %2891 = vmatpush2.bf16.msra.mxu0 %v5780_v12  ;;  %v5725_v12 = vcombine.high %v214_v5, %v218_v6  ;;  %v5852_v26 = vcombine.low %v342_v7, %v346_v8 }
 0x156   :  { %2892 = vmatprep.subr.bf16.mxu0 %v5773_v14  ;;  %v5853_v14 = vcombine.high %v342_v7, %v346_v8  ;;  %v430_v7 = vld [vmem:[#allocation5 + $0x8d0] sm:$0xff] }
 0x157   :  { %2932 = vmatpush2.bf16.msra.mxu1 %v5908_v13  ;;  %v549_v13 = vrot.slane %v7170_v2, %v7173_v4  ;;  %v434_v8 = vld [vmem:[#allocation5 + $0x8f0] sm:$0xff] }
 0x158   :  { %2933 = vmatprep.subr.bf16.mxu1 %v5901_v15  ;;  %v462_v15 = vld [vmem:[#allocation5 + $0x9d0] sm:$0xff] }
 0x159   :  { %2893 = vmatpush2.bf16.msra.mxu0 %v5772_v22  ;;  %v5973_v27 = vcombine.high %v462_v15, %v466_v16  ;;  %v5972_v43 = vcombine.low %v462_v15, %v466_v16  ;;  %v422_v15 = vld [vmem:[#allocation5 + $0x890] sm:$0xff] }
 0x15a   :  { %2894 = vmatprep.subr.bf16.mxu0 %v5765_v24  ;;  %v5724_v24 = vcombine.low %v214_v5, %v218_v6  ;;  %v5711_v6 = vcombine.high %v199_v58, %v203_v61  ;;  %v426_v16 = vld [vmem:[#allocation5 + $0x8b0] sm:$0xff] }
 0x15b   :  { %2934 = vmatpush2.bf16.msra.mxu1 %v5900_v23 }
 0x15c   :  { %2935 = vmatprep.subr.bf16.mxu1 %v5893_v25 }
 0x15d   :  { %2895 = vmatpush2.bf16.msra.mxu0 %v5764_v31 }
 0x15e   :  { %2896 = vmatprep.subr.bf16.mxu0 %v5757_v33  ;;  %v454_v33 = vld [vmem:[#allocation5 + $0x990] sm:$0xff] }
 0x15f   :  { %2936 = vmatpush2.bf16.msra.mxu1 %v5892_v32  ;;  %v6045_v32 = vcombine.high %v534_v19, %v538_v21 }
 0x160   :  { %2937 = vmatprep.subr.bf16.mxu1 %v5885_v34  ;;  %v458_v34 = vld [vmem:[#allocation5 + $0x9b0] sm:$0xff] }
 0x161   :  { %2897 = vmatpush2.bf16.msra.mxu0 %v5756_v42 }
 0x162   :  { %2898 = vmatprep.subr.bf16.mxu0 %v5749_v45  ;;  %v6044_v45 = vcombine.low %v534_v19, %v538_v21  ;;  %v187_v19 = vld [vmem:[#allocation5 + $0x138] sm:$0xff]  ;;  %v5940_v21 = vcombine.low %v430_v7, %v434_v8 }
 0x163   :  { %2938 = vmatpush2.bf16.msra.mxu1 %v5884_v44 }
 0x164   :  { %2939 = vmatprep.subr.bf16.mxu1 %v5877_v46  ;;  %v5965_v46 = vcombine.high %v454_v33, %v458_v34 }
 0x165   :  { %2899 = vmatpush2.bf16.msra.mxu0 %v5748_v51 }
 0x166   :  { %2900 = vmatprep.subr.bf16.mxu0 %v5741_v54  ;;  %v5957_v54 = vcombine.high %v446_v49, %v450_v50 }
 0x167   :  { %2940 = vmatpush2.bf16.msra.mxu1 %v5876_v53  ;;  %v5964_v53 = vcombine.low %v454_v33, %v458_v34  ;;  %v406_v34 = vld [vmem:[#allocation5 + $0x810] sm:$0xff] }
 0x168   :  { %2941 = vmatprep.subr.bf16.mxu1 %v5869_v55 }
 0x169   :  { %2901 = vmatpush2.bf16.msra.mxu0 %v5740_v62 }
 0x16a   :  { %2902 = vmatprep.subr.bf16.mxu0 %v5733_v1  ;;  %v5718_v1 = vcombine.low %v207_v39, %v211_v40  ;;  %v167_v39 = vld [vmem:[#allocation5 + $0x98] sm:$0xff] }
 0x16b   :  { %2942 = vmatpush2.bf16.msra.mxu1 %v5868_v0  ;;  %v5956_v0 = vcombine.low %v446_v49, %v450_v50  ;;  %v171_v40 = vld [vmem:[#allocation5 + $0xb8] sm:$0xff] }
 0x16c   :  { %2943 = vmatprep.subr.bf16.mxu1 %v5861_v3  ;;  %v2580_v18 = vpop.f32.mrf.mxu0  ;;  %v5949_v3 = vcombine.high %v438_v56, %v442_v57  ;;  %v163_v49 = vld [vmem:[#allocation5 + $0x78] sm:$0xff] }
 0x16d   :  { %v2581_v22 = vadd.f32 %v2580_v18, %v545_v10  ;;  %2903 = vmatpush2.bf16.msra.mxu0 %v5732_v9  ;;  %v191_v9 = vld [vmem:[#allocation5 + $0x158] sm:$0xff] }
 0x16e   :  { %v2621_v23 = vpop.f32.mrf.mxu1  ;;  %v2582_v25 = vpop.f32.mrf.mxu0  ;;  %2904 = vmatprep.subr.bf16.mxu0 %v5725_v12  ;;  %v195_v10 = vld [vmem:[#allocation5 + $0x178] sm:$0xff]  ;;  %v5710_v12 = vcombine.low %v199_v58, %v203_v61  ;;  %v522_v58 = vld [vmem:[#allocation5 + $0xbb0] sm:$0xff] }
 0x16f   :  { %2944 = vmatpush2.bf16.msra.mxu1 %v5860_v11  ;;  %v7179_v28 = vadd.f32 %v2621_v23, %v2581_v22  ;;  %v2583_v30 = vadd.f32 %v2582_v25, %v549_v13  ;;  %v5948_v11 = vcombine.low %v438_v56, %v442_v57  ;;  %v5941_v13 = vcombine.high %v430_v7, %v434_v8  ;;  %v183_v18 = vld [vmem:[#allocation5 + $0x118] sm:$0xff]  ;;  %v414_v25 = vld [vmem:[#allocation5 + $0x850] sm:$0xff] }
 0x170   :  { %v2623_v31 = vpop.f32.mrf.mxu1  ;;  %2945 = vmatprep.subr.bf16.mxu1 %v5853_v14  ;;  %v2584_v37 = vpop.f32.mrf.mxu0  ;;  %v5703_v14 = vcombine.high %v191_v9, %v195_v10  ;;  %v5702_v22 = vcombine.low %v191_v9, %v195_v10  ;;  %v5933_v23 = vcombine.high %v422_v15, %v426_v16  ;;  %v518_v57 = vld [vmem:[#allocation5 + $0xb90] sm:$0xff]  ;;  %v151_v61 = vld [vmem:[#allocation5 + $0x18] sm:$0xff] }
 0x171   :  { %v7181_v41 = vadd.f32 %v2623_v31, %v2583_v30  ;;  %2905 = vmatpush2.bf16.msra.mxu0 %v5724_v24  ;;  %v5695_v24 = vcombine.high %v183_v18, %v187_v19  ;;  %v179_v30 = vld [vmem:[#allocation5 + $0xf8] sm:$0xff]  ;;  %v5932_v31 = vcombine.low %v422_v15, %v426_v16  ;;  %v410_v37 = vld [vmem:[#allocation5 + $0x830] sm:$0xff]  ;;  %v6028_v10 = vcombine.low %v518_v57, %v522_v58 }
 0x172   :  { %v2625_v42 = vpop.f32.mrf.mxu1  ;;  %v2585_v44 = vpop.f32.mrf.mxu0  ;;  %2956 = vmatprep.subr.bf16.mxu0 %v5973_v27  ;;  %v175_v27 = vld [vmem:[#allocation5 + $0xd8] sm:$0xff]  ;;  %v5916_v50 = vcombine.low %v406_v34, %v410_v37  ;;  %v514_v7 = vld [vmem:[#allocation5 + $0xb70] sm:$0xff] }
 0x173   :  { %2946 = vmatpush2.bf16.msra.mxu1 %v5852_v26  ;;  %v418_v26 = vld [vmem:[#allocation5 + $0x870] sm:$0xff]  ;;  %v5687_v33 = vcombine.high %v175_v27, %v179_v30  ;;  %v5917_v44 = vcombine.high %v406_v34, %v410_v37  ;;  %v271_v8 = vld [vmem:[#allocation5 + $0x3d8] sm:$0xff] }
 0x174   :  { %v2626_v47 = vpop.f32.mrf.mxu1  ;;  %3011 = vmatprep.subr.bf16.mxu1 %v6045_v32  ;;  %2907 = vmatmul.mubr.bf16.vlgmr.msra.gmra.mxu0 %v7137_v17  ;;  %v5694_v32 = vcombine.low %v183_v18, %v187_v19  ;;  %v5924_v42 = vcombine.low %v414_v25, %v418_v26  ;;  %v275_v9 = vld [vmem:[#allocation5 + $0x3f8] sm:$0xff]  ;;  %v506_v15 = vld [vmem:[#allocation5 + $0xb30] sm:$0xff] }
 0x175   :  { %2957 = vmatpush1.bf16.msra.mxu0 %v5972_v43  ;;  %2988 = vmatprep.mubr.bf16.mxu0 %v7142_v29  ;;  %v5686_v43 = vcombine.low %v175_v27, %v179_v30  ;;  %v530_v47 = vld [vmem:[#allocation5 + $0xbf0] sm:$0xff]  ;;  %v263_v16 = vld [vmem:[#allocation5 + $0x398] sm:$0xff] }
 0x176   :  { %2948 = vmatmul.mubr.bf16.vlgmr.msra.gmra.mxu1 %v7139_v20  ;;  %v7185_v51 = vpop.f32.mrf.mxu1  ;;  %2958 = vmatprep.subr.bf16.mxu0 %v5965_v46  ;;  %v526_v46 = vld [vmem:[#allocation5 + $0xbd0] sm:$0xff]  ;;  %v267_v18 = vld [vmem:[#allocation5 + $0x3b8] sm:$0xff] }
 0x177   :  { %3012 = vmatpush1.bf16.msra.mxu1 %v6044_v45  ;;  %3029 = vmatprep.mubr.bf16.mxu1 %v7053_v35  ;;  %v5679_v45 = vcombine.high %v167_v39, %v171_v40  ;;  %v259_v27 = vld [vmem:[#allocation5 + $0x378] sm:$0xff]  ;;  %v490_v34 = vld [vmem:[#allocation5 + $0xab0] sm:$0xff] }
 0x178   :  { %v7187_v55 = vpop.f32.mrf.mxu1  ;;  %3038 = vmatprep.subr.bf16.mxu1 %v5719_v48  ;;  %v159_v48 = vld [vmem:[#allocation5 + $0x58] sm:$0xff] }
 0x179   :  { %2959 = vmatpush1.bf16.msra.mxu0 %v5964_v53  ;;  %v5678_v53 = vcombine.low %v167_v39, %v171_v40  ;;  %v5671_v56 = vcombine.high %v159_v48, %v163_v49  ;;  %v247_v37 = vld [vmem:[#allocation5 + $0x318] sm:$0xff] }
 0x17a   :  { %v2707_v62 = vpop.f32.mrf.mxu1  ;;  %2960 = vmatprep.subr.bf16.mxu0 %v5957_v54  ;;  %v6037_v54 = vcombine.high %v526_v46, %v530_v47  ;;  %v251_v39 = vld [vmem:[#allocation5 + $0x338] sm:$0xff] }
 0x17b   :  { %v155_v62 = vld [vmem:[#allocation5 + $0x38] sm:$0xff] }
 0x17c   :  { %v2708_v5 = vpop.f32.mrf.mxu1 }
 0x17d   :  { %2961 = vmatpush1.bf16.msra.mxu0 %v5956_v0  ;;  %v6036_v0 = vcombine.low %v526_v46, %v530_v47  ;;  %v5663_v5 = vcombine.high %v151_v61, %v155_v62  ;;  %v482_v46 = vld [vmem:[#allocation5 + $0xa70] sm:$0xff]  ;;  %v239_v47 = vld [vmem:[#allocation5 + $0x2d8] sm:$0xff] }
 0x17e   :  { %6050 = vmatmul.mubr.msk.bf16.vlgmr.msra.gmra.mxu1 %vm2542_vm0, %v7147_v38  ;;  %2962 = vmatprep.subr.bf16.mxu0 %v5949_v3  ;;  %v6029_v3 = vcombine.high %v518_v57, %v522_v58  ;;  %v474_v57 = vld [vmem:[#allocation5 + $0xa30] sm:$0xff]  ;;  %v231_v58 = vld [vmem:[#allocation5 + $0x298] sm:$0xff] }
 0x17f   :  { %3039 = vmatpush1.bf16.msra.mxu1 %v5718_v1  ;;  %3070 = vmatprep.mubr.bf16.mxu1 %v7131_v59  ;;  %v5925_v59 = vcombine.high %v414_v25, %v418_v26  ;;  %v5670_v1 = vcombine.low %v159_v48, %v163_v49  ;;  %v498_v25 = vld [vmem:[#allocation5 + $0xaf0] sm:$0xff]  ;;  %v255_v26 = vld [vmem:[#allocation5 + $0x358] sm:$0xff] }
 0x180   :  { %3040 = vmatprep.subr.bf16.mxu1 %v5711_v6  ;;  %v510_v6 = vld [vmem:[#allocation5 + $0xb50] sm:$0xff]  ;;  %v243_v48 = vld [vmem:[#allocation5 + $0x2f8] sm:$0xff] }
 0x181   :  { %2963 = vmatpush1.bf16.msra.mxu0 %v5948_v11  ;;  %v5662_v11 = vcombine.low %v151_v61, %v155_v62  ;;  %v6020_v19 = vcombine.low %v510_v6, %v514_v7  ;;  %v235_v61 = vld [vmem:[#allocation5 + $0x2b8] sm:$0xff] }
 0x182   :  { %2964 = vmatprep.subr.bf16.mxu0 %v5941_v13  ;;  %v5783_v13 = vcombine.high %v271_v8, %v275_v9 }
 0x183   :  { %3041 = vmatpush1.bf16.msra.mxu1 %v5710_v12  ;;  %v6021_v12 = vcombine.high %v510_v6, %v514_v7  ;;  %v339_v6 = vld [vmem:[#allocation5 + $0x5f8] sm:$0xff] }
 0x184   :  { %3042 = vmatprep.subr.bf16.mxu1 %v5703_v14  ;;  %v502_v14 = vld [vmem:[#allocation5 + $0xb10] sm:$0xff] }
 0x185   :  { %2965 = vmatpush1.bf16.msra.mxu0 %v5940_v21  ;;  %v5782_v21 = vcombine.low %v271_v8, %v275_v9  ;;  %v6012_v30 = vcombine.low %v502_v14, %v506_v15  ;;  %v223_v8 = vld [vmem:[#allocation5 + $0x258] sm:$0xff] }
 0x186   :  { %2966 = vmatprep.subr.bf16.mxu0 %v5933_v23  ;;  %v5775_v23 = vcombine.high %v263_v16, %v267_v18  ;;  %v227_v9 = vld [vmem:[#allocation5 + $0x278] sm:$0xff] }
 0x187   :  { %3043 = vmatpush1.bf16.msra.mxu1 %v5702_v22  ;;  %v6013_v22 = vcombine.high %v502_v14, %v506_v15 }
 0x188   :  { %3044 = vmatprep.subr.bf16.mxu1 %v5695_v24  ;;  %v494_v24 = vld [vmem:[#allocation5 + $0xad0] sm:$0xff] }
 0x189   :  { %2967 = vmatpush1.bf16.msra.mxu0 %v5932_v31  ;;  %v5774_v31 = vcombine.low %v263_v16, %v267_v18  ;;  %v6004_v40 = vcombine.low %v494_v24, %v498_v25  ;;  %v5735_v18 = vcombine.high %v223_v8, %v227_v9 }
 0x18a   :  { %2968 = vmatprep.subr.bf16.mxu0 %v5925_v59  ;;  %v5767_v59 = vcombine.high %v255_v26, %v259_v27 }
 0x18b   :  { %3045 = vmatpush1.bf16.msra.mxu1 %v5694_v32  ;;  %v6005_v32 = vcombine.high %v494_v24, %v498_v25  ;;  %v219_v24 = vld [vmem:[#allocation5 + $0x238] sm:$0xff] }
 0x18c   :  { %3046 = vmatprep.subr.bf16.mxu1 %v5687_v33  ;;  %v486_v33 = vld [vmem:[#allocation5 + $0xa90] sm:$0xff] }
 0x18d   :  { %2969 = vmatpush1.bf16.msra.mxu0 %v5924_v42  ;;  %v5766_v42 = vcombine.low %v255_v26, %v259_v27  ;;  %v5996_v49 = vcombine.low %v486_v33, %v490_v34  ;;  %v5734_v27 = vcombine.low %v223_v8, %v227_v9 }
 0x18e   :  { %2970 = vmatprep.subr.bf16.mxu0 %v5917_v44  ;;  %v5759_v44 = vcombine.high %v247_v37, %v251_v39 }
 0x18f   :  { %3047 = vmatpush1.bf16.msra.mxu1 %v5686_v43  ;;  %v5997_v43 = vcombine.high %v486_v33, %v490_v34 }
 0x190   :  { %3048 = vmatprep.subr.bf16.mxu1 %v5679_v45  ;;  %v478_v45 = vld [vmem:[#allocation5 + $0xa50] sm:$0xff] }
 0x191   :  { %2971 = vmatpush1.bf16.msra.mxu0 %v5916_v50  ;;  %v5758_v50 = vcombine.low %v247_v37, %v251_v39  ;;  %v5988_v62 = vcombine.low %v478_v45, %v482_v46 }
 0x192   :  { %2972 = vmatprep.subr.bf16.mxu0 %v6037_v54  ;;  %v5751_v54 = vcombine.high %v239_v47, %v243_v48 }
 0x193   :  { %3049 = vmatpush1.bf16.msra.mxu1 %v5678_v53  ;;  %v5989_v53 = vcombine.high %v478_v45, %v482_v46  ;;  %v459_v45 = vld [vmem:[#allocation5 + $0x9b8] sm:$0xff] }
 0x194   :  { %3050 = vmatprep.subr.bf16.mxu1 %v5671_v56  ;;  %v470_v56 = vld [vmem:[#allocation5 + $0xa10] sm:$0xff] }
 0x195   :  { %2973 = vmatpush2.bf16.msra.mxu0 %v6036_v0  ;;  %v5750_v0 = vcombine.low %v239_v47, %v243_v48 }
 0x196   :  { %2974 = vmatprep.subr.bf16.mxu0 %v6029_v3  ;;  %v5743_v3 = vcombine.high %v231_v58, %v235_v61 }
 0x197   :  { %3051 = vmatpush1.bf16.msra.mxu1 %v5670_v1  ;;  %v5981_v1 = vcombine.high %v470_v56, %v474_v57 }
 0x198   :  { %3052 = vmatprep.subr.bf16.mxu1 %v5663_v5  ;;  %v335_v5 = vld [vmem:[#allocation5 + $0x5d8] sm:$0xff] }
 0x199   :  { %2975 = vmatpush2.bf16.msra.mxu0 %v6028_v10  ;;  %v5847_v14 = vcombine.high %v335_v5, %v339_v6  ;;  %v5846_v25 = vcombine.low %v335_v5, %v339_v6  ;;  %v439_v5 = vld [vmem:[#allocation5 + $0x918] sm:$0xff] }
 0x19a   :  { %2976 = vmatprep.subr.bf16.mxu0 %v6021_v12  ;;  %v443_v6 = vld [vmem:[#allocation5 + $0x938] sm:$0xff] }
 0x19b   :  { %3053 = vmatpush1.bf16.msra.mxu1 %v5662_v11  ;;  %v5980_v11 = vcombine.low %v470_v56, %v474_v57  ;;  %v447_v56 = vld [vmem:[#allocation5 + $0x958] sm:$0xff]  ;;  %v5951_v9 = vcombine.high %v439_v5, %v443_v6 }
 0x19c   :  { %3054 = vmatprep.subr.bf16.mxu1 %v5783_v13  ;;  %v5742_v13 = vcombine.low %v231_v58, %v235_v61  ;;  %v451_v57 = vld [vmem:[#allocation5 + $0x978] sm:$0xff] }
 0x19d   :  { %2977 = vmatpush2.bf16.msra.mxu0 %v6020_v19  ;;  %v327_v19 = vld [vmem:[#allocation5 + $0x598] sm:$0xff]  ;;  %v5958_v8 = vcombine.low %v447_v56, %v451_v57 }
 0x19e   :  { %2978 = vmatprep.subr.bf16.mxu0 %v6013_v22 }
 0x19f   :  { %3055 = vmatpush2.bf16.msra.mxu1 %v5782_v21  ;;  %v331_v21 = vld [vmem:[#allocation5 + $0x5b8] sm:$0xff] }
 0x1a0   :  { %3056 = vmatprep.subr.bf16.mxu1 %v5775_v23  ;;  %v215_v23 = vld [vmem:[#allocation5 + $0x218] sm:$0xff] }
 0x1a1   :  { %2979 = vmatpush2.bf16.msra.mxu0 %v6012_v30  ;;  %v5727_v30 = vcombine.high %v215_v23, %v219_v24  ;;  %v5726_v34 = vcombine.low %v215_v23, %v219_v24  ;;  %v427_v23 = vld [vmem:[#allocation5 + $0x8b8] sm:$0xff] }
 0x1a2   :  { %2980 = vmatprep.subr.bf16.mxu0 %v6005_v32  ;;  %v463_v32 = vld [vmem:[#allocation5 + $0x9d8] sm:$0xff] }
 0x1a3   :  { %3057 = vmatpush2.bf16.msra.mxu1 %v5774_v31  ;;  %v323_v31 = vld [vmem:[#allocation5 + $0x578] sm:$0xff] }
 0x1a4   :  { %3058 = vmatprep.subr.bf16.mxu1 %v5767_v59  ;;  %v467_v59 = vld [vmem:[#allocation5 + $0x9f8] sm:$0xff] }
 0x1a5   :  { %2981 = vmatpush2.bf16.msra.mxu0 %v6004_v40  ;;  %v5975_v40 = vcombine.high %v463_v32, %v467_v59  ;;  %v5974_v48 = vcombine.low %v463_v32, %v467_v59 }
 0x1a6   :  { %2982 = vmatprep.subr.bf16.mxu0 %v5997_v43  ;;  %v315_v43 = vld [vmem:[#allocation5 + $0x538] sm:$0xff] }
 0x1a7   :  { %3059 = vmatpush2.bf16.msra.mxu1 %v5766_v42  ;;  %v311_v42 = vld [vmem:[#allocation5 + $0x518] sm:$0xff] }
 0x1a8   :  { %3060 = vmatprep.subr.bf16.mxu1 %v5759_v44  ;;  %v455_v44 = vld [vmem:[#allocation5 + $0x998] sm:$0xff]  ;;  %v5822_v58 = vcombine.low %v311_v42, %v315_v43 }
 0x1a9   :  { %2983 = vmatpush2.bf16.msra.mxu0 %v5996_v49  ;;  %v5823_v49 = vcombine.high %v311_v42, %v315_v43  ;;  %v5966_v61 = vcombine.low %v455_v44, %v459_v45  ;;  %v407_v42 = vld [vmem:[#allocation5 + $0x818] sm:$0xff] }
 0x1aa   :  { %2984 = vmatprep.subr.bf16.mxu0 %v5989_v53  ;;  %v303_v53 = vld [vmem:[#allocation5 + $0x4d8] sm:$0xff] }
 0x1ab   :  { %3061 = vmatpush2.bf16.msra.mxu1 %v5758_v50  ;;  %v5967_v50 = vcombine.high %v455_v44, %v459_v45  ;;  %v411_v43 = vld [vmem:[#allocation5 + $0x838] sm:$0xff] }
 0x1ac   :  { %3062 = vmatprep.subr.bf16.mxu1 %v5751_v54  ;;  %v2662_v7 = vpop.f32.mrf.mxu0  ;;  %v307_v54 = vld [vmem:[#allocation5 + $0x4f8] sm:$0xff] }
 0x1ad   :  { %v2663_v10 = vadd.f32 %v2662_v7, %v7179_v28  ;;  %2985 = vmatpush2.bf16.msra.mxu0 %v5988_v62  ;;  %v5815_v62 = vcombine.high %v303_v53, %v307_v54  ;;  %v5814_v7 = vcombine.low %v303_v53, %v307_v54  ;;  %v5918_v54 = vcombine.low %v407_v42, %v411_v43 }
 0x1ae   :  { %v2664_v12 = vpop.f32.mrf.mxu0  ;;  %2986 = vmatprep.subr.bf16.mxu0 %v5981_v1  ;;  %v295_v1 = vld [vmem:[#allocation5 + $0x498] sm:$0xff] }
 0x1af   :  { %3063 = vmatpush2.bf16.msra.mxu1 %v5750_v0  ;;  %v7196_v15 = vadd.f32 %v7185_v51, %v2663_v10  ;;  %v2665_v16 = vadd.f32 %v2664_v12, %v7181_v41  ;;  %v5839_v51 = vcombine.high %v327_v19, %v331_v21  ;;  %v319_v41 = vld [vmem:[#allocation5 + $0x558] sm:$0xff]  ;;  %v5959_v0 = vcombine.high %v447_v56, %v451_v57 }
 0x1b0   :  { %3064 = vmatprep.subr.bf16.mxu1 %v5743_v3  ;;  %v2666_v22 = vpop.f32.mrf.mxu0  ;;  %v5831_v37 = vcombine.high %v319_v41, %v323_v31  ;;  %v5830_v47 = vcombine.low %v319_v41, %v323_v31  ;;  %v299_v3 = vld [vmem:[#allocation5 + $0x4b8] sm:$0xff] }
 0x1b1   :  { %v7200_v28 = vadd.f32 %v7187_v55, %v2665_v16  ;;  %2987 = vmatpush2.bf16.msra.mxu0 %v5980_v11  ;;  %v5838_v55 = vcombine.low %v327_v19, %v331_v21  ;;  %v287_v10 = vld [vmem:[#allocation5 + $0x458] sm:$0xff]  ;;  %v5950_v16 = vcombine.low %v439_v5, %v443_v6  ;;  %vm3202_vm3 = vcmp.ge.f32.partialorder %v7196_v15, 0.0 }
 0x1b2   :  { %v2667_v26 = vpop.f32.mrf.mxu0  ;;  %3079 = vmatprep.subr.bf16.mxu0 %v5847_v14  ;;  %v291_v11 = vld [vmem:[#allocation5 + $0x478] sm:$0xff]  ;;  %v5806_v14 = vcombine.low %v295_v1, %v299_v3 }
 0x1b3   :  { %3065 = vmatpush2.bf16.msra.mxu1 %v5742_v13  ;;  %v431_v12 = vld [vmem:[#allocation5 + $0x8d8] sm:$0xff]  ;;  %v5798_v24 = vcombine.low %v287_v10, %v291_v11  ;;  %vm3203_vm1 = vcmp.ge.f32.partialorder %v7200_v28, 0.0 }
 0x1b4   :  { %3066 = vmatprep.subr.bf16.mxu1 %v5735_v18  ;;  %2989 = vmatmul.mubr.bf16.vlgmr.msra.gmra.mxu0 %v7152_v36  ;;  %v435_v13 = vld [vmem:[#allocation5 + $0x8f8] sm:$0xff] }
 0x1b5   :  { %3080 = vmatpush1.bf16.msra.mxu0 %v5846_v25  ;;  %3111 = vmatprep.mubr.bf16.mxu0 %v7133_v60  ;;  %v5943_v18 = vcombine.high %v431_v12, %v435_v13  ;;  %v279_v19 = vld [vmem:[#allocation5 + $0x418] sm:$0xff]  ;;  %v5942_v25 = vcombine.low %v431_v12, %v435_v13 }
 0x1b6   :  { %v7203_v33 = vpop.f32.mrf.mxu1  ;;  %3081 = vmatprep.subr.bf16.mxu0 %v5839_v51  ;;  %v283_v21 = vld [vmem:[#allocation5 + $0x438] sm:$0xff] }
 0x1b7   :  { %3067 = vmatpush2.bf16.msra.mxu1 %v5734_v27  ;;  %v423_v22 = vld [vmem:[#allocation5 + $0x898] sm:$0xff]  ;;  %v5791_v26 = vcombine.high %v279_v19, %v283_v21  ;;  %v5790_v32 = vcombine.low %v279_v19, %v283_v21 }
 0x1b8   :  { %v7206_v39 = vpop.f32.mrf.mxu1  ;;  %3068 = vmatprep.subr.bf16.mxu1 %v5727_v30  ;;  %v5935_v27 = vcombine.high %v423_v22, %v427_v23  ;;  %v399_v51 = vld [vmem:[#allocation5 + $0x7d8] sm:$0xff]  ;;  %v5934_v59 = vcombine.low %v423_v22, %v427_v23  ;;  %v552_v23 = vsub.s32 2, %v7165_v52 }
 0x1b9   :  { %3082 = vmatpush1.bf16.msra.mxu0 %v5838_v55  ;;  %v403_v30 = vld [vmem:[#allocation5 + $0x7f8] sm:$0xff] }
 0x1ba   :  { %v2748_v46 = vpop.f32.mrf.mxu1  ;;  %3083 = vmatprep.subr.bf16.mxu0 %v5831_v37  ;;  %v415_v41 = vld [vmem:[#allocation5 + $0x858] sm:$0xff]  ;;  %v5911_v55 = vcombine.high %v399_v51, %v403_v30  ;;  %v5910_v44 = vcombine.low %v399_v51, %v403_v30 }
 0x1bb   :  { %3069 = vmatpush2.bf16.msra.mxu1 %v5726_v34  ;;  %v419_v31 = vld [vmem:[#allocation5 + $0x878] sm:$0xff] }
 0x1bc   :  { %v2749_v60 = vpop.f32.mrf.mxu1  ;;  %3120 = vmatprep.subr.bf16.mxu1 %v5975_v40  ;;  %v5927_v34 = vcombine.high %v415_v41, %v419_v31  ;;  %v391_v37 = vld [vmem:[#allocation5 + $0x798] sm:$0xff]  ;;  %v5926_v45 = vcombine.low %v415_v41, %v419_v31 }
 0x1bd   :  { %3084 = vmatpush1.bf16.msra.mxu0 %v5830_v47  ;;  %v395_v40 = vld [vmem:[#allocation5 + $0x7b8] sm:$0xff]  ;;  %v5919_v47 = vcombine.high %v407_v42, %v411_v43 }
 0x1be   :  { %3071 = vmatmul.mubr.bf16.vlgmr.msra.gmra.mxu1 %v7137_v17  ;;  %3085 = vmatprep.subr.bf16.mxu0 %v5823_v49  ;;  %v5807_v17 = vcombine.high %v295_v1, %v299_v3  ;;  %v5903_v46 = vcombine.high %v391_v37, %v395_v40  ;;  %v387_v49 = vld [vmem:[#allocation5 + $0x778] sm:$0xff]  ;;  %v5902_v53 = vcombine.low %v391_v37, %v395_v40 }
 0x1bf   :  { %3121 = vmatpush1.bf16.msra.mxu1 %v5974_v48  ;;  %3152 = vmatprep.mubr.bf16.mxu1 %v7142_v29  ;;  %v5799_v29 = vcombine.high %v287_v10, %v291_v11  ;;  %v383_v48 = vld [vmem:[#allocation5 + $0x758] sm:$0xff] }
 0x1c0   :  { %3122 = vmatprep.subr.bf16.mxu1 %v5967_v50  ;;  %v527_v60 = vld [vmem:[#allocation5 + $0xbd8] sm:$0xff]  ;;  %v5895_v56 = vcombine.high %v383_v48, %v387_v49  ;;  %v5894_v1 = vcombine.low %v383_v48, %v387_v49  ;;  %v556_v49 = vsub.s32 3, %v7165_v52 }
 0x1c1   :  { %3086 = vmatpush1.bf16.msra.mxu0 %v5822_v58  ;;  %v531_v50 = vld [vmem:[#allocation5 + $0xbf8] sm:$0xff] }
 0x1c2   :  { %3087 = vmatprep.subr.bf16.mxu0 %v5815_v62  ;;  %v6039_v57 = vcombine.high %v527_v60, %v531_v50  ;;  %v375_v58 = vld [vmem:[#allocation5 + $0x718] sm:$0xff]  ;;  %v6038_v3 = vcombine.low %v527_v60, %v531_v50 }
 0x1c3   :  { %3123 = vmatpush1.bf16.msra.mxu1 %v5966_v61  ;;  %v379_v61 = vld [vmem:[#allocation5 + $0x738] sm:$0xff] }
 0x1c4   :  { %3124 = vmatprep.subr.bf16.mxu1 %v5959_v0  ;;  %v519_v62 = vld [vmem:[#allocation5 + $0xb98] sm:$0xff]  ;;  %v5887_v5 = vcombine.high %v375_v58, %v379_v61  ;;  %v5886_v10 = vcombine.low %v375_v58, %v379_v61 }
 0x1c5   :  { %3088 = vmatpush1.bf16.msra.mxu0 %v5814_v7  ;;  %v523_v0 = vld [vmem:[#allocation5 + $0xbb8] sm:$0xff] }
 0x1c6   :  { %3089 = vmatprep.subr.bf16.mxu0 %v5807_v17  ;;  %v6031_v6 = vcombine.high %v519_v62, %v523_v0  ;;  %v367_v7 = vld [vmem:[#allocation5 + $0x6d8] sm:$0xff]  ;;  %v6030_v11 = vcombine.low %v519_v62, %v523_v0 }
 0x1c7   :  { %3125 = vmatpush1.bf16.msra.mxu1 %v5958_v8  ;;  %v371_v8 = vld [vmem:[#allocation5 + $0x6f8] sm:$0xff] }
 0x1c8   :  { %3126 = vmatprep.subr.bf16.mxu1 %v5951_v9  ;;  %v511_v17 = vld [vmem:[#allocation5 + $0xb58] sm:$0xff]  ;;  %v5879_v12 = vcombine.high %v367_v7, %v371_v8  ;;  %v5878_v19 = vcombine.low %v367_v7, %v371_v8 }
 0x1c9   :  { %3090 = vmatpush1.bf16.msra.mxu0 %v5806_v14  ;;  %v515_v9 = vld [vmem:[#allocation5 + $0xb78] sm:$0xff] }
 0x1ca   :  { %3091 = vmatprep.subr.bf16.mxu0 %v5799_v29  ;;  %v6023_v13 = vcombine.high %v511_v17, %v515_v9  ;;  %v359_v14 = vld [vmem:[#allocation5 + $0x698] sm:$0xff]  ;;  %v6022_v21 = vcombine.low %v511_v17, %v515_v9 }
 0x1cb   :  { %3127 = vmatpush1.bf16.msra.mxu1 %v5950_v16  ;;  %v363_v16 = vld [vmem:[#allocation5 + $0x6b8] sm:$0xff] }
 0x1cc   :  { %3128 = vmatprep.subr.bf16.mxu1 %v5943_v18  ;;  %v503_v29 = vld [vmem:[#allocation5 + $0xb18] sm:$0xff]  ;;  %v5871_v22 = vcombine.high %v359_v14, %v363_v16  ;;  %v5870_v30 = vcombine.low %v359_v14, %v363_v16 }
 0x1cd   :  { %3092 = vmatpush1.bf16.msra.mxu0 %v5798_v24  ;;  %v507_v18 = vld [vmem:[#allocation5 + $0xb38] sm:$0xff] }
 0x1ce   :  { %3093 = vmatprep.subr.bf16.mxu0 %v5791_v26  ;;  %v6015_v24 = vcombine.high %v503_v29, %v507_v18  ;;  %v355_v26 = vld [vmem:[#allocation5 + $0x678] sm:$0xff]  ;;  %v6014_v41 = vcombine.low %v503_v29, %v507_v18 }
 0x1cf   :  { %3129 = vmatpush1.bf16.msra.mxu1 %v5942_v25  ;;  %v351_v25 = vld [vmem:[#allocation5 + $0x658] sm:$0xff] }
 0x1d0   :  { %3130 = vmatprep.subr.bf16.mxu1 %v5935_v27  ;;  %v495_v27 = vld [vmem:[#allocation5 + $0xad8] sm:$0xff]  ;;  %v5863_v31 = vcombine.high %v351_v25, %v355_v26  ;;  %v5862_v42 = vcombine.low %v351_v25, %v355_v26 }
 0x1d1   :  { %3094 = vmatpush1.bf16.msra.mxu0 %v5790_v32  ;;  %v499_v51 = vld [vmem:[#allocation5 + $0xaf8] sm:$0xff]  ;;  %v553_v32 = vrot.slane %v7170_v2, %v552_v23 }
 0x1d2   :  { %3095 = vmatprep.subr.bf16.mxu0 %v5911_v55  ;;  %v343_v55 = vld [vmem:[#allocation5 + $0x618] sm:$0xff]  ;;  %v6006_v43 = vcombine.low %v495_v27, %v499_v51 }
 0x1d3   :  { %3131 = vmatpush1.bf16.msra.mxu1 %v5934_v59  ;;  %v6007_v59 = vcombine.high %v495_v27, %v499_v51  ;;  %v487_v37 = vld [vmem:[#allocation5 + $0xa98] sm:$0xff] }
 0x1d4   :  { %3132 = vmatprep.subr.bf16.mxu1 %v5927_v34  ;;  %v347_v34 = vld [vmem:[#allocation5 + $0x638] sm:$0xff] }
 0x1d5   :  { %3096 = vmatpush2.bf16.msra.mxu0 %v5910_v44  ;;  %v491_v40 = vld [vmem:[#allocation5 + $0xab8] sm:$0xff]  ;;  %v5855_v44 = vcombine.high %v343_v55, %v347_v34 }
 0x1d6   :  { %3097 = vmatprep.subr.bf16.mxu0 %v5903_v46  ;;  %v5999_v46 = vcombine.high %v487_v37, %v491_v40  ;;  %v539_v48 = vld [vmem:[#allocation5 + $0xc38] sm:$0xff]  ;;  %v5998_v58 = vcombine.low %v487_v37, %v491_v40 }
 0x1d7   :  { %3133 = vmatpush1.bf16.msra.mxu1 %v5926_v45  ;;  %v2745_v45 = vadd.f32 %v7203_v33, %v553_v32  ;;  %v479_v50 = vld [vmem:[#allocation5 + $0xa58] sm:$0xff]  ;;  %v557_v33 = vrot.slane %v7170_v2, %v556_v49 }
 0x1d8   :  { %3134 = vmatprep.subr.bf16.mxu1 %v5919_v47  ;;  %v535_v47 = vld [vmem:[#allocation5 + $0xc18] sm:$0xff] }
 0x1d9   :  { %3098 = vmatpush2.bf16.msra.mxu0 %v5902_v53  ;;  %v483_v53 = vld [vmem:[#allocation5 + $0xa78] sm:$0xff]  ;;  %v6047_v61 = vcombine.high %v535_v47, %v539_v48  ;;  %v2747_v9 = vadd.f32 %v7206_v39, %v557_v33 }
 0x1da   :  { %3099 = vmatprep.subr.bf16.mxu0 %v5895_v56  ;;  %v5854_v56 = vcombine.low %v343_v55, %v347_v34  ;;  %v5991_v62 = vcombine.high %v479_v50, %v483_v53  ;;  %v5990_v7 = vcombine.low %v479_v50, %v483_v53  ;;  %v6390_v8 = vld [vmem:[#allocation8 + $0xe4] ss:$16 sps:$4 sm:$0xff]   ;;  %v6391_v26 = vld [vmem:[#allocation8 + $0x2e0] ss:$16 sps:$4 sm:$0xff]  }
 0x1db   :  { %3135 = vmatpush1.bf16.msra.mxu1 %v5918_v54  ;;  %v6393_v39 = vld [vmem:[#allocation8 + $0x2e4] ss:$16 sps:$4 sm:$0xff]   ;;  %v6394_v32 = vld [vmem:[#allocation8 + $0xc0] ss:$16 sps:$4 sm:$0xff]  }
 0x1dc   :  { %3136 = vmatprep.subr.bf16.mxu1 %v6039_v57  ;;  %v6396_v51 = vld [vmem:[#allocation8 + $0xc4] ss:$16 sps:$4 sm:$0xff]   ;;  %v6418_v53 = vld [vmem:[#allocation8 + $0x40] ss:$16 sps:$4 sm:$0xff]  }
 0x1dd   :  { %3100 = vmatpush2.bf16.msra.mxu0 %v5894_v1  ;;  %v471_v1 = vld [vmem:[#allocation5 + $0xa18] sm:$0xff] }
 0x1de   :  { %3101 = vmatprep.subr.bf16.mxu0 %v5887_v5  ;;  %v6046_v5 = vcombine.low %v535_v47, %v539_v48  ;;  %v6402_v55 = vld [vmem:[#allocation8 + $0xa4] ss:$16 sps:$4 sm:$0xff]   ;;  %v6412_v47 = vld [vmem:[#allocation8 + $0x60] ss:$16 sps:$4 sm:$0xff]  }
 0x1df   :  { %3137 = vmatpush2.bf16.msra.mxu1 %v6038_v3  ;;  %v475_v3 = vld [vmem:[#allocation5 + $0xa38] sm:$0xff] }
 0x1e0   :  { %3138 = vmatprep.subr.bf16.mxu1 %v6031_v6  ;;  %v5983_v17 = vcombine.high %v471_v1, %v475_v3  ;;  %v5982_v16 = vcombine.low %v471_v1, %v475_v3  ;;  %v6405_v37 = vld [vmem:[#allocation8 + $0x2a4] ss:$16 sps:$4 sm:$0xff]   ;;  %v6415_v48 = vld [vmem:[#allocation8 + $0x260] ss:$16 sps:$4 sm:$0xff]  }
 0x1e1   :  { %3102 = vmatpush2.bf16.msra.mxu0 %v5886_v10  ;;  %v6408_v40 = vld [vmem:[#allocation8 + $0x84] ss:$16 sps:$4 sm:$0xff]   ;;  %v6433_v1 = vld [vmem:[#allocation8 + $0x200] ss:$16 sps:$4 sm:$0xff]  }
 0x1e2   :  { %3103 = vmatprep.subr.bf16.mxu0 %v5879_v12  ;;  %v6423_v50 = vld [vmem:[#allocation8 + $0x244] ss:$16 sps:$4 sm:$0xff]  }
 0x1e3   :  { %3139 = vmatpush2.bf16.msra.mxu1 %v6030_v11  ;;  %v3211_v11 = vmul.f32 0.2, %v7200_v28  ;;  %v6435_v33 = vld [vmem:[#allocation8 + $0x204] ss:$16 sps:$4 sm:$0xff]  }
 0x1e4   :  { %3140 = vmatprep.subr.bf16.mxu1 %v6023_v13  ;;  %v6438_v3 = vld [vmem:[#allocation8 + $0x1e4] ss:$16 sps:$4 sm:$0xff]  }
 0x1e5   :  { %3104 = vmatpush2.bf16.msra.mxu0 %v5878_v19 }
 0x1e6   :  { %3105 = vmatprep.subr.bf16.mxu0 %v5871_v22  ;;  %v6388_v22 = vld [vmem:[#allocation8 + $0xe0] ss:$16 sps:$4 sm:$0xff]  }
 0x1e7   :  { %3141 = vmatpush2.bf16.msra.mxu1 %v6022_v21 }
 0x1e8   :  { %3142 = vmatprep.subr.bf16.mxu1 %v6015_v24  ;;  %v3219_v24 = vsel %vm3203_vm1, %v7200_v28, %v3211_v11  ;;  %v6397_v28 = vld [vmem:[#allocation8 + $0x2c0] ss:$16 sps:$4 sm:$0xff]   ;;  %v6450_v11 = vld [vmem:[#allocation8 + $0x1a4] ss:$16 sps:$4 sm:$0xff]  }
 0x1e9   :  { %3106 = vmatpush2.bf16.msra.mxu0 %v5870_v30  ;;  %v6399_v30 = vld [vmem:[#allocation8 + $0x2c4] ss:$16 sps:$4 sm:$0xff]  }
 0x1ea   :  { %3107 = vmatprep.subr.bf16.mxu0 %v5863_v31  ;;  %v7229_v31 = vpack.c.bf16 %v3219_v24, %v3219_v24  ;;  %v6468_v24 = vld [vmem:[#allocation8 + $0x144] ss:$16 sps:$4 sm:$0xff]  }
 0x1eb   :  { %3143 = vmatpush2.bf16.msra.mxu1 %v6014_v41 }
 0x1ec   :  { %3144 = vmatprep.subr.bf16.mxu1 %v6007_v59  ;;  %v2785_v60 = vpop.f32.mrf.mxu0 }
 0x1ed   :  { %v2786_v54 = vadd.f32 %v2785_v60, %v2745_v45  ;;  %3108 = vmatpush2.bf16.msra.mxu0 %v5862_v42  ;;  %v6411_v42 = vld [vmem:[#allocation8 + $0x284] ss:$16 sps:$4 sm:$0xff]  }
 0x1ee   :  { %v2787_v57 = vpop.f32.mrf.mxu0  ;;  %3109 = vmatprep.subr.bf16.mxu0 %v5855_v44  ;;  %v6409_v44 = vld [vmem:[#allocation8 + $0x280] ss:$16 sps:$4 sm:$0xff]   ;;  %v6414_v45 = vld [vmem:[#allocation8 + $0x64] ss:$16 sps:$4 sm:$0xff]  }
 0x1ef   :  { %3145 = vmatpush2.bf16.msra.mxu1 %v6006_v43  ;;  %v2788_v12 = vadd.f32 %v2787_v57, %v2747_v9  ;;  %v6406_v43 = vld [vmem:[#allocation8 + $0x80] ss:$16 sps:$4 sm:$0xff]   ;;  %v6420_v60 = vld [vmem:[#allocation8 + $0x44] ss:$16 sps:$4 sm:$0xff]  }
 0x1f0   :  { %3146 = vmatprep.subr.bf16.mxu1 %v5999_v46  ;;  %v2789_v0 = vpop.f32.mrf.mxu0  ;;  %v6417_v46 = vld [vmem:[#allocation8 + $0x264] ss:$16 sps:$4 sm:$0xff]   ;;  %v6442_v9 = vld [vmem:[#allocation8 + $0x1c0] ss:$16 sps:$4 sm:$0xff]  }
 0x1f1   :  { %3110 = vmatpush2.bf16.msra.mxu0 %v5854_v56  ;;  %v6426_v56 = vld [vmem:[#allocation8 + $0x24] ss:$16 sps:$4 sm:$0xff]   ;;  %v6430_v0 = vld [vmem:[#allocation8] ss:$16 sps:$4 sm:$0xff]  }
 0x1f2   :  { %v2790_v6 = vpop.f32.mrf.mxu0  ;;  %3175 = vmatprep.subr.bf16.mxu0 %v6047_v61  ;;  %v6429_v57 = vld [vmem:[#allocation8 + $0x224] ss:$16 sps:$4 sm:$0xff]   ;;  %v6427_v61 = vld [vmem:[#allocation8 + $0x220] ss:$16 sps:$4 sm:$0xff]  }
 0x1f3   :  { %3147 = vmatpush2.bf16.msra.mxu1 %v5998_v58  ;;  %v6424_v58 = vld [vmem:[#allocation8 + $0x20] ss:$16 sps:$4 sm:$0xff]  }
 0x1f4   :  { %3148 = vmatprep.subr.bf16.mxu1 %v5991_v62  ;;  %3112 = vmatmul.mubr.bf16.vlgmr.msra.gmra.mxu0 %v7139_v20  ;;  %v2867_v10 = vpop.f32.mrf.mxu0  ;;  %v6432_v62 = vld [vmem:[#allocation8 + $0x4] ss:$16 sps:$4 sm:$0xff]   ;;  %v6436_v6 = vld [vmem:[#allocation8 + $0x1e0] ss:$16 sps:$4 sm:$0xff]  }
 0x1f5   :  { %3176 = vmatpush1.bf16.msra.mxu0 %v6046_v5  ;;  %3193 = vmatprep.mubr.bf16.mxu0 %v7053_v35  ;;  %v6441_v5 = vld [vmem:[#allocation8 + $0x3e4] ss:$16 sps:$4 sm:$0xff]  }
 0x1f6   :  { %v2826_v2 = vpop.f32.mrf.mxu1  ;;  %v2869_v14 = vpop.f32.mrf.mxu0  ;;  %4792 = vmatprep.subr.bf16.mxu0 %v6390_v8  ;;  %v6444_v8 = vld [vmem:[#allocation8 + $0x1c4] ss:$16 sps:$4 sm:$0xff]  }
 0x1f7   :  { %v2827_v13 = vadd.f32 %v2826_v2, %v2786_v54  ;;  %3149 = vmatpush2.bf16.msra.mxu1 %v5990_v7  ;;  %v6421_v54 = vld [vmem:[#allocation8 + $0x240] ss:$16 sps:$4 sm:$0xff]   ;;  %v6453_v2 = vld [vmem:[#allocation8 + $0x3a4] ss:$16 sps:$4 sm:$0xff]  }
 0x1f8   :  { %v2828_v29 = vpop.f32.mrf.mxu1  ;;  %3150 = vmatprep.subr.bf16.mxu1 %v5983_v17  ;;  %v2871_v19 = vpop.f32.mrf.mxu0  ;;  %v6439_v7 = vld [vmem:[#allocation8 + $0x3e0] ss:$16 sps:$4 sm:$0xff]   ;;  %v6447_v17 = vld [vmem:[#allocation8 + $0x3c4] ss:$16 sps:$4 sm:$0xff]  }
 0x1f9   :  { %v7224_v18 = vadd.f32 %v2867_v10, %v2827_v13  ;;  %v2829_v20 = vadd.f32 %v2828_v29, %v2788_v12  ;;  %v6445_v10 = vld [vmem:[#allocation8 + $0x3c0] ss:$16 sps:$4 sm:$0xff]   ;;  %v6465_v19 = vld [vmem:[#allocation8 + $0x364] ss:$16 sps:$4 sm:$0xff]  }
 0x1fa   :  { %v2830_v21 = vpop.f32.mrf.mxu1  ;;  %v2872_v25 = vpop.f32.mrf.mxu0  ;;  %v6448_v12 = vld [vmem:[#allocation8 + $0x1a0] ss:$16 sps:$4 sm:$0xff]  }
 0x1fb   :  { %v2870_v35 = vadd.f32 %v2869_v14, %v2829_v20  ;;  %3151 = vmatpush2.bf16.msra.mxu1 %v5982_v16  ;;  %v6451_v13 = vld [vmem:[#allocation8 + $0x3a0] ss:$16 sps:$4 sm:$0xff]   ;;  %v6456_v14 = vld [vmem:[#allocation8 + $0x184] ss:$16 sps:$4 sm:$0xff]   ;;  %vm3204_vm4 = vcmp.ge.f32.partialorder %v7224_v18, 0.0 }
 0x1fc   :  { %v2831_v27 = vpop.f32.mrf.mxu1  ;;  %4833 = vmatprep.subr.bf16.mxu1 %v6393_v39  ;;  %6051 = vmatmul.mubr.msk.bf16.vlgmr.msra.gmra.mxu0 %vm2542_vm0, %v7147_v38  ;;  %v6400_v38 = vld [vmem:[#allocation8 + $0xa0] ss:$16 sps:$4 sm:$0xff]   ;;  %v6459_v16 = vld [vmem:[#allocation8 + $0x384] ss:$16 sps:$4 sm:$0xff]  }
 0x1fd   :  { %vm3205_vm2 = vcmp.ge.f32.partialorder %v2870_v35, 0.0  ;;  %v3213_v41 = vmul.f32 0.2, %v2870_v35  ;;  %4793 = vmatpush1.bf16.msra.mxu0 %v6388_v22  ;;  %4824 = vmatprep.mubr.bf16.mxu0 %v7229_v31  ;;  %v6454_v29 = vld [vmem:[#allocation8 + $0x180] ss:$16 sps:$4 sm:$0xff]  }
 0x1fe   :  { %3153 = vmatmul.mubr.bf16.vlgmr.msra.gmra.mxu1 %v7152_v36  ;;  %4794 = vmatprep.subr.bf16.mxu0 %v6396_v51  ;;  %v6403_v36 = vld [vmem:[#allocation8 + $0x2a0] ss:$16 sps:$4 sm:$0xff]   ;;  %v6462_v20 = vld [vmem:[#allocation8 + $0x164] ss:$16 sps:$4 sm:$0xff]  }
 0x1ff   :  { %4834 = vmatpush1.bf16.msra.mxu1 %v6391_v26  ;;  %v3221_v59 = vsel %vm3205_vm2, %v2870_v35, %v3213_v41  ;;  %v6457_v39 = vld [vmem:[#allocation8 + $0x380] ss:$16 sps:$4 sm:$0xff]   ;;  %v6471_v35 = vld [vmem:[#allocation8 + $0x344] ss:$16 sps:$4 sm:$0xff]  }
 0x200   :  { %4835 = vmatprep.subr.bf16.mxu1 %v6399_v30  ;;  %v7233_v34 = vpack.c.bf16 %v3221_v59, %v3221_v59  ;;  %v6460_v21 = vld [vmem:[#allocation8 + $0x160] ss:$16 sps:$4 sm:$0xff]   ;;  %v6474_v27 = vld [vmem:[#allocation8 + $0x124] ss:$16 sps:$4 sm:$0xff]  }
 0x201   :  { %4795 = vmatpush1.bf16.msra.mxu0 %v6394_v32  ;;  %v6463_v22 = vld [vmem:[#allocation8 + $0x360] ss:$16 sps:$4 sm:$0xff]   ;;  %v6477_v51 = vld [vmem:[#allocation8 + $0x324] ss:$16 sps:$4 sm:$0xff]  }
 0x202   :  { %4865 = vmatprep.mubr.bf16.mxu1 %v7233_v34  ;;  %4796 = vmatprep.subr.bf16.mxu0 %v6402_v55  ;;  %v6466_v25 = vld [vmem:[#allocation8 + $0x140] ss:$16 sps:$4 sm:$0xff]   ;;  %v6480_v32 = vld [vmem:[#allocation8 + $0x104] ss:$16 sps:$4 sm:$0xff]   ;;  %v3212_v55 = vmul.f32 0.2, %v7224_v18 }
 0x203   :  { %4836 = vmatpush1.bf16.msra.mxu1 %v6397_v28  ;;  %v6469_v26 = vld [vmem:[#allocation8 + $0x340] ss:$16 sps:$4 sm:$0xff]   ;;  %v3210_v28 = vmul.f32 0.2, %v7196_v15  ;;  %v6483_v59 = vld [vmem:[#allocation8 + $0x304] ss:$16 sps:$4 sm:$0xff]  }
 0x204   :  { %4837 = vmatprep.subr.bf16.mxu1 %v6405_v37  ;;  %v6472_v30 = vld [vmem:[#allocation8 + $0x120] ss:$16 sps:$4 sm:$0xff]  }
 0x205   :  { %4797 = vmatpush1.bf16.msra.mxu0 %v6400_v38  ;;  %v6475_v41 = vld [vmem:[#allocation8 + $0x320] ss:$16 sps:$4 sm:$0xff]  }
 0x206   :  { %4798 = vmatprep.subr.bf16.mxu0 %v6408_v40 }
 0x207   :  { %4838 = vmatpush1.bf16.msra.mxu1 %v6403_v36  ;;  %v6478_v36 = vld [vmem:[#allocation8 + $0x100] ss:$16 sps:$4 sm:$0xff]  }
 0x208   :  { %4839 = vmatprep.subr.bf16.mxu1 %v6411_v42  ;;  %v6481_v42 = vld [vmem:[#allocation8 + $0x300] ss:$16 sps:$4 sm:$0xff]  }
 0x209   :  { %4799 = vmatpush1.bf16.msra.mxu0 %v6406_v43  ;;  %v6486_v43 = vld [vmem:[#allocation8 + $0x4e4] ss:$16 sps:$4 sm:$0xff]  }
 0x20a   :  { %4800 = vmatprep.subr.bf16.mxu0 %v6414_v45 }
 0x20b   :  { %4840 = vmatpush1.bf16.msra.mxu1 %v6409_v44  ;;  %v3218_v44 = vsel %vm3202_vm3, %v7196_v15, %v3210_v28  ;;  %v6586_v28 = vld [vmem:[#allocation8 + $0x7e0] ss:$16 sps:$4 sm:$0xff]  }
 0x20c   :  { %4841 = vmatprep.subr.bf16.mxu1 %v6417_v46  ;;  %v6540_v46 = vld [vmem:[#allocation8 + $0x6e4] ss:$16 sps:$4 sm:$0xff]  }
 0x20d   :  { %4801 = vmatpush1.bf16.msra.mxu0 %v6412_v47  ;;  %v3220_v47 = vsel %vm3204_vm4, %v7224_v18, %v3212_v55  ;;  %v6511_v55 = vld [vmem:[#allocation8 + $0x5c0] ss:$16 sps:$4 sm:$0xff]  }
 0x20e   :  { %4802 = vmatprep.subr.bf16.mxu0 %v6420_v60 }
 0x20f   :  { %4842 = vmatpush1.bf16.msra.mxu1 %v6415_v48 }
 0x210   :  { %4843 = vmatprep.subr.bf16.mxu1 %v6423_v50  ;;  %v6484_v50 = vld [vmem:[#allocation8 + $0x4e0] ss:$16 sps:$4 sm:$0xff]  }
 0x211   :  { %4803 = vmatpush1.bf16.msra.mxu0 %v6418_v53  ;;  %v7250_v53 = vpack.c.bf16 %v3218_v44, %v3218_v44  ;;  %v6514_v44 = vld [vmem:[#allocation8 + $0x5a0] ss:$16 sps:$4 sm:$0xff]  }
 0x212   :  { %4804 = vmatprep.subr.bf16.mxu0 %v6426_v56  ;;  %v6489_v56 = vld [vmem:[#allocation8 + $0x4c4] ss:$16 sps:$4 sm:$0xff]  }
 0x213   :  { %4844 = vmatpush1.bf16.msra.mxu1 %v6421_v54 }
 0x214   :  { %4845 = vmatprep.subr.bf16.mxu1 %v6429_v57  ;;  %v6538_v57 = vld [vmem:[#allocation8 + $0x6e0] ss:$16 sps:$4 sm:$0xff]  }
 0x215   :  { %4805 = vmatpush1.bf16.msra.mxu0 %v6424_v58  ;;  %v7252_v58 = vpack.c.bf16 %v3220_v47, %v3220_v47  ;;  %v6598_v47 = vld [vmem:[#allocation8 + $0x7a0] ss:$16 sps:$4 sm:$0xff]  }
 0x216   :  { %4806 = vmatprep.subr.bf16.mxu0 %v6432_v62  ;;  %v6487_v62 = vld [vmem:[#allocation8 + $0x4c0] ss:$16 sps:$4 sm:$0xff]  }
 0x217   :  { %4846 = vmatpush1.bf16.msra.mxu1 %v6427_v61  ;;  %v6546_v61 = vld [vmem:[#allocation8 + $0x6c4] ss:$16 sps:$4 sm:$0xff]  }
 0x218   :  { %4847 = vmatprep.subr.bf16.mxu1 %v6435_v33  ;;  %v6492_v33 = vld [vmem:[#allocation8 + $0x4a4] ss:$16 sps:$4 sm:$0xff]  }
 0x219   :  { %4807 = vmatpush1.bf16.msra.mxu0 %v6430_v0  ;;  %v6544_v0 = vld [vmem:[#allocation8 + $0x6c0] ss:$16 sps:$4 sm:$0xff]  }
 0x21a   :  { %4808 = vmatprep.subr.bf16.mxu0 %v6438_v3  ;;  %v6552_v3 = vld [vmem:[#allocation8 + $0x6a4] ss:$16 sps:$4 sm:$0xff]  }
 0x21b   :  { %4848 = vmatpush1.bf16.msra.mxu1 %v6433_v1 }
 0x21c   :  { %4849 = vmatprep.subr.bf16.mxu1 %v6441_v5 }
 0x21d   :  { %4809 = vmatpush2.bf16.msra.mxu0 %v6436_v6  ;;  %v6490_v6 = vld [vmem:[#allocation8 + $0x4a0] ss:$16 sps:$4 sm:$0xff]  }
 0x21e   :  { %4810 = vmatprep.subr.bf16.mxu0 %v6444_v8  ;;  %v6550_v8 = vld [vmem:[#allocation8 + $0x6a0] ss:$16 sps:$4 sm:$0xff]  }
 0x21f   :  { %4850 = vmatpush2.bf16.msra.mxu1 %v6439_v7  ;;  %v6495_v7 = vld [vmem:[#allocation8 + $0x484] ss:$16 sps:$4 sm:$0xff]  }
 0x220   :  { %4851 = vmatprep.subr.bf16.mxu1 %v6447_v17 }
 0x221   :  { %4811 = vmatpush2.bf16.msra.mxu0 %v6442_v9  ;;  %v6558_v9 = vld [vmem:[#allocation8 + $0x684] ss:$16 sps:$4 sm:$0xff]  }
 0x222   :  { %4812 = vmatprep.subr.bf16.mxu0 %v6450_v11  ;;  %v6498_v11 = vld [vmem:[#allocation8 + $0x464] ss:$16 sps:$4 sm:$0xff]  }
 0x223   :  { %4852 = vmatpush2.bf16.msra.mxu1 %v6445_v10  ;;  %v6493_v10 = vld [vmem:[#allocation8 + $0x480] ss:$16 sps:$4 sm:$0xff]  }
 0x224   :  { %4853 = vmatprep.subr.bf16.mxu1 %v6453_v2  ;;  %v6556_v2 = vld [vmem:[#allocation8 + $0x680] ss:$16 sps:$4 sm:$0xff]  }
 0x225   :  { %4813 = vmatpush2.bf16.msra.mxu0 %v6448_v12  ;;  %v6564_v12 = vld [vmem:[#allocation8 + $0x664] ss:$16 sps:$4 sm:$0xff]  }
 0x226   :  { %4814 = vmatprep.subr.bf16.mxu0 %v6456_v14  ;;  %v6501_v14 = vld [vmem:[#allocation8 + $0x444] ss:$16 sps:$4 sm:$0xff]  }
 0x227   :  { %4854 = vmatpush2.bf16.msra.mxu1 %v6451_v13  ;;  %v6496_v13 = vld [vmem:[#allocation8 + $0x460] ss:$16 sps:$4 sm:$0xff]  }
 0x228   :  { %4855 = vmatprep.subr.bf16.mxu1 %v6459_v16  ;;  %v6562_v16 = vld [vmem:[#allocation8 + $0x660] ss:$16 sps:$4 sm:$0xff]  }
 0x229   :  { %4815 = vmatpush2.bf16.msra.mxu0 %v6454_v29  ;;  %v6570_v29 = vld [vmem:[#allocation8 + $0x644] ss:$16 sps:$4 sm:$0xff]  }
 0x22a   :  { %4816 = vmatprep.subr.bf16.mxu0 %v6462_v20  ;;  %v6504_v20 = vld [vmem:[#allocation8 + $0x424] ss:$16 sps:$4 sm:$0xff]  }
 0x22b   :  { %4856 = vmatpush2.bf16.msra.mxu1 %v6457_v39  ;;  %v6499_v39 = vld [vmem:[#allocation8 + $0x440] ss:$16 sps:$4 sm:$0xff]  }
 0x22c   :  { %4857 = vmatprep.subr.bf16.mxu1 %v6465_v19  ;;  %v6568_v19 = vld [vmem:[#allocation8 + $0x640] ss:$16 sps:$4 sm:$0xff]  }
 0x22d   :  { %4817 = vmatpush2.bf16.msra.mxu0 %v6460_v21  ;;  %v6576_v21 = vld [vmem:[#allocation8 + $0x624] ss:$16 sps:$4 sm:$0xff]  }
 0x22e   :  { %4818 = vmatprep.subr.bf16.mxu0 %v6468_v24  ;;  %v6507_v24 = vld [vmem:[#allocation8 + $0x404] ss:$16 sps:$4 sm:$0xff]  }
 0x22f   :  { %4858 = vmatpush2.bf16.msra.mxu1 %v6463_v22  ;;  %v6502_v22 = vld [vmem:[#allocation8 + $0x420] ss:$16 sps:$4 sm:$0xff]  }
 0x230   :  { %4859 = vmatprep.subr.bf16.mxu1 %v6471_v35  ;;  %v6574_v35 = vld [vmem:[#allocation8 + $0x620] ss:$16 sps:$4 sm:$0xff]  }
 0x231   :  { %4819 = vmatpush2.bf16.msra.mxu0 %v6466_v25  ;;  %v6582_v25 = vld [vmem:[#allocation8 + $0x604] ss:$16 sps:$4 sm:$0xff]  }
 0x232   :  { %4820 = vmatprep.subr.bf16.mxu0 %v6474_v27  ;;  %v6510_v27 = vld [vmem:[#allocation8 + $0x5e4] ss:$16 sps:$4 sm:$0xff]  }
 0x233   :  { %4860 = vmatpush2.bf16.msra.mxu1 %v6469_v26  ;;  %v6505_v26 = vld [vmem:[#allocation8 + $0x400] ss:$16 sps:$4 sm:$0xff]  }
 0x234   :  { %4861 = vmatprep.subr.bf16.mxu1 %v6477_v51  ;;  %v7239_v37 = vpop.f32.mrf.mxu0  ;;  %v6580_v51 = vld [vmem:[#allocation8 + $0x600] ss:$16 sps:$4 sm:$0xff]  }
 0x235   :  { %4821 = vmatpush2.bf16.msra.mxu0 %v6472_v30  ;;  %v6588_v30 = vld [vmem:[#allocation8 + $0x7e4] ss:$16 sps:$4 sm:$0xff]  }
 0x236   :  { %v7242_v38 = vpop.f32.mrf.mxu1  ;;  %v7244_v40 = vpop.f32.mrf.mxu0  ;;  %4822 = vmatprep.subr.bf16.mxu0 %v6480_v32  ;;  %v6513_v32 = vld [vmem:[#allocation8 + $0x5c4] ss:$16 sps:$4 sm:$0xff]  }
 0x237   :  { %4862 = vmatpush2.bf16.msra.mxu1 %v6475_v41  ;;  %v6508_v41 = vld [vmem:[#allocation8 + $0x5e0] ss:$16 sps:$4 sm:$0xff]  }
 0x238   :  { %v7247_v45 = vpop.f32.mrf.mxu1  ;;  %4863 = vmatprep.subr.bf16.mxu1 %v6483_v59  ;;  %v2912_v48 = vpop.f32.mrf.mxu0  ;;  %v6594_v59 = vld [vmem:[#allocation8 + $0x7c4] ss:$16 sps:$4 sm:$0xff]  }
 0x239   :  { %4823 = vmatpush2.bf16.msra.mxu0 %v6478_v36  ;;  %v6516_v36 = vld [vmem:[#allocation8 + $0x5a4] ss:$16 sps:$4 sm:$0xff]  }
 0x23a   :  { %v2953_v60 = vpop.f32.mrf.mxu1  ;;  %v2913_v54 = vpop.f32.mrf.mxu0  ;;  %4874 = vmatprep.subr.bf16.mxu0 %v6486_v43  ;;  %v6600_v43 = vld [vmem:[#allocation8 + $0x7a4] ss:$16 sps:$4 sm:$0xff]  }
 0x23b   :  { %4864 = vmatpush2.bf16.msra.mxu1 %v6481_v42  ;;  %v6592_v42 = vld [vmem:[#allocation8 + $0x7c0] ss:$16 sps:$4 sm:$0xff]   ;;  %v6606_v48 = vld [vmem:[#allocation8 + $0x784] ss:$16 sps:$4 sm:$0xff]  }
 0x23c   :  { %v2954_v15 = vpop.f32.mrf.mxu1  ;;  %4915 = vmatprep.subr.bf16.mxu1 %v6540_v46  ;;  %4825 = vmatmul.mubr.bf16.vlgmr.msra.gmra.mxu0 %v7250_v53  ;;  %v6519_v46 = vld [vmem:[#allocation8 + $0x584] ss:$16 sps:$4 sm:$0xff]   ;;  %v6517_v60 = vld [vmem:[#allocation8 + $0x580] ss:$16 sps:$4 sm:$0xff]  }
 0x23d   :  { %4875 = vmatpush1.bf16.msra.mxu0 %v6484_v50  ;;  %v6522_v50 = vld [vmem:[#allocation8 + $0x564] ss:$16 sps:$4 sm:$0xff]   ;;  %v6604_v54 = vld [vmem:[#allocation8 + $0x780] ss:$16 sps:$4 sm:$0xff]   ;;  %v564_v15 = vsub.s32 5, %v7165_v52 }
 0x23e   :  { %4866 = vmatmul.mubr.bf16.vlgmr.msra.gmra.mxu1 %v7252_v58  ;;  %v7256_v18 = vpop.f32.mrf.mxu1  ;;  %4876 = vmatprep.subr.bf16.mxu0 %v6489_v56  ;;  %v560_v56 = vsub.s32 4, %v7165_v52 }
 0x23f   :  { %4916 = vmatpush1.bf16.msra.mxu1 %v6538_v57  ;;  %v6612_v57 = vld [vmem:[#allocation8 + $0x764] ss:$16 sps:$4 sm:$0xff]  }
 0x240   :  { %v7258_v1 = vpop.f32.mrf.mxu1  ;;  %4917 = vmatprep.subr.bf16.mxu1 %v6546_v61  ;;  %v6520_v61 = vld [vmem:[#allocation8 + $0x560] ss:$16 sps:$4 sm:$0xff]  }
 0x241   :  { %4877 = vmatpush1.bf16.msra.mxu0 %v6487_v62  ;;  %v6525_v62 = vld [vmem:[#allocation8 + $0x544] ss:$16 sps:$4 sm:$0xff]  }
 0x242   :  { %v3035_v5 = vpop.f32.mrf.mxu1  ;;  %4878 = vmatprep.subr.bf16.mxu0 %v6492_v33  ;;  %v6610_v33 = vld [vmem:[#allocation8 + $0x760] ss:$16 sps:$4 sm:$0xff]  }
 0x243   :  { %4918 = vmatpush1.bf16.msra.mxu1 %v6544_v0  ;;  %v7262_v0 = vld [vmem:[#allocation7] sm:$0xff]  ;;  %v6618_v5 = vld [vmem:[#allocation8 + $0x744] ss:$16 sps:$4 sm:$0xff]  }
 0x244   :  { %v3036_v17 = vpop.f32.mrf.mxu1  ;;  %4919 = vmatprep.subr.bf16.mxu1 %v6552_v3  ;;  %v561_v3 = vrot.slane %v7262_v0, %v560_v56  ;;  %v6565_v56 = vld [vmem:[#allocation8 + $0x28] ss:$16 sps:$4 sm:$0xff]  }
 0x245   :  { %4879 = vmatpush1.bf16.msra.mxu0 %v6490_v6  ;;  %v565_v6 = vrot.slane %v7262_v0, %v564_v15  ;;  %v6616_v17 = vld [vmem:[#allocation8 + $0x740] ss:$16 sps:$4 sm:$0xff]   ;;  %v6571_v15 = vld [vmem:[#allocation8 + $0x8] ss:$16 sps:$4 sm:$0xff]  }
 0x246   :  { %4880 = vmatprep.subr.bf16.mxu0 %v6495_v7  ;;  %v6523_v7 = vld [vmem:[#allocation8 + $0x540] ss:$16 sps:$4 sm:$0xff]  }
 0x247   :  { %4920 = vmatpush1.bf16.msra.mxu1 %v6550_v8  ;;  %v6528_v8 = vld [vmem:[#allocation8 + $0x524] ss:$16 sps:$4 sm:$0xff]  }
 0x248   :  { %4921 = vmatprep.subr.bf16.mxu1 %v6558_v9  ;;  %v2909_v9 = vadd.f32 %v7239_v37, %v561_v3  ;;  %v6529_v37 = vld [vmem:[#allocation8 + $0x500] ss:$16 sps:$4 sm:$0xff]   ;;  %v6583_v3 = vld [vmem:[#allocation8 + $0x1c8] ss:$16 sps:$4 sm:$0xff]  }
 0x249   :  { %4881 = vmatpush1.bf16.msra.mxu0 %v6493_v10  ;;  %v6624_v10 = vld [vmem:[#allocation8 + $0x724] ss:$16 sps:$4 sm:$0xff]  }
 0x24a   :  { %4882 = vmatprep.subr.bf16.mxu0 %v6498_v11  ;;  %v2911_v11 = vadd.f32 %v7244_v40, %v565_v6  ;;  %v6628_v40 = vld [vmem:[#allocation8 + $0x700] ss:$16 sps:$4 sm:$0xff]   ;;  %v6589_v6 = vld [vmem:[#allocation8 + $0x1a8] ss:$16 sps:$4 sm:$0xff]  }
 0x24b   :  { %4922 = vmatpush1.bf16.msra.mxu1 %v6556_v2  ;;  %v6526_v2 = vld [vmem:[#allocation8 + $0x520] ss:$16 sps:$4 sm:$0xff]  }
 0x24c   :  { %4923 = vmatprep.subr.bf16.mxu1 %v6564_v12  ;;  %v6531_v12 = vld [vmem:[#allocation8 + $0x504] ss:$16 sps:$4 sm:$0xff]  }
 0x24d   :  { %4883 = vmatpush1.bf16.msra.mxu0 %v6496_v13  ;;  %v6622_v13 = vld [vmem:[#allocation8 + $0x720] ss:$16 sps:$4 sm:$0xff]  }
 0x24e   :  { %4884 = vmatprep.subr.bf16.mxu0 %v6501_v14  ;;  %v2950_v14 = vadd.f32 %v7242_v38, %v2909_v9  ;;  %v6601_v9 = vld [vmem:[#allocation8 + $0x168] ss:$16 sps:$4 sm:$0xff]  }
 0x24f   :  { %4924 = vmatpush1.bf16.msra.mxu1 %v6562_v16  ;;  %v6630_v16 = vld [vmem:[#allocation8 + $0x704] ss:$16 sps:$4 sm:$0xff]  }
 0x250   :  { %4925 = vmatprep.subr.bf16.mxu1 %v6570_v29 }
 0x251   :  { %4885 = vmatpush1.bf16.msra.mxu0 %v6499_v39  ;;  %v2952_v39 = vadd.f32 %v7247_v45, %v2911_v11  ;;  %v568_v11 = vsub.s32 6, %v7165_v52 }
 0x252   :  { %4886 = vmatprep.subr.bf16.mxu0 %v6504_v20 }
 0x253   :  { %4926 = vmatpush1.bf16.msra.mxu1 %v6568_v19 }
 0x254   :  { %4927 = vmatprep.subr.bf16.mxu1 %v6576_v21  ;;  %v6534_v21 = vld [vmem:[#allocation8 + $0xec] ss:$16 sps:$4 sm:$0xff]  }
 0x255   :  { %4887 = vmatpush1.bf16.msra.mxu0 %v6502_v22 }
 0x256   :  { %4888 = vmatprep.subr.bf16.mxu0 %v6507_v24 }
 0x257   :  { %4928 = vmatpush1.bf16.msra.mxu1 %v6574_v35  ;;  %v6636_v35 = vld [vmem:[#allocation8 + $0x2ec] ss:$16 sps:$4 sm:$0xff]  }
 0x258   :  { %4929 = vmatprep.subr.bf16.mxu1 %v6582_v25 }
 0x259   :  { %4889 = vmatpush1.bf16.msra.mxu0 %v6505_v26 }
 0x25a   :  { %4890 = vmatprep.subr.bf16.mxu0 %v6510_v27 }
 0x25b   :  { %4930 = vmatpush1.bf16.msra.mxu1 %v6580_v51 }
 0x25c   :  { %4931 = vmatprep.subr.bf16.mxu1 %v6588_v30 }
 0x25d   :  { %4891 = vmatpush2.bf16.msra.mxu0 %v6508_v41 }
 0x25e   :  { %4892 = vmatprep.subr.bf16.mxu0 %v6513_v32  ;;  %v6532_v32 = vld [vmem:[#allocation8 + $0xe8] ss:$16 sps:$4 sm:$0xff]  }
 0x25f   :  { %4932 = vmatpush2.bf16.msra.mxu1 %v6586_v28 }
 0x260   :  { %4933 = vmatprep.subr.bf16.mxu1 %v6594_v59 }
 0x261   :  { %4893 = vmatpush2.bf16.msra.mxu0 %v6511_v55  ;;  %v6537_v55 = vld [vmem:[#allocation8 + $0xcc] ss:$16 sps:$4 sm:$0xff]  }
 0x262   :  { %4894 = vmatprep.subr.bf16.mxu0 %v6516_v36  ;;  %v6535_v36 = vld [vmem:[#allocation8 + $0xc8] ss:$16 sps:$4 sm:$0xff]  }
 0x263   :  { %4934 = vmatpush2.bf16.msra.mxu1 %v6592_v42 }
 0x264   :  { %4935 = vmatprep.subr.bf16.mxu1 %v6600_v43  ;;  %v6543_v43 = vld [vmem:[#allocation8 + $0xac] ss:$16 sps:$4 sm:$0xff]  }
 0x265   :  { %4895 = vmatpush2.bf16.msra.mxu0 %v6514_v44  ;;  %v6541_v44 = vld [vmem:[#allocation8 + $0xa8] ss:$16 sps:$4 sm:$0xff]  }
 0x266   :  { %4896 = vmatprep.subr.bf16.mxu0 %v6519_v46  ;;  %v6549_v46 = vld [vmem:[#allocation8 + $0x8c] ss:$16 sps:$4 sm:$0xff]  }
 0x267   :  { %4936 = vmatpush2.bf16.msra.mxu1 %v6598_v47  ;;  %v6547_v47 = vld [vmem:[#allocation8 + $0x88] ss:$16 sps:$4 sm:$0xff]  }
 0x268   :  { %4937 = vmatprep.subr.bf16.mxu1 %v6606_v48  ;;  %v6555_v48 = vld [vmem:[#allocation8 + $0x6c] ss:$16 sps:$4 sm:$0xff]  }
 0x269   :  { %4897 = vmatpush2.bf16.msra.mxu0 %v6517_v60  ;;  %v6553_v60 = vld [vmem:[#allocation8 + $0x68] ss:$16 sps:$4 sm:$0xff]  }
 0x26a   :  { %4898 = vmatprep.subr.bf16.mxu0 %v6522_v50  ;;  %v6561_v50 = vld [vmem:[#allocation8 + $0x4c] ss:$16 sps:$4 sm:$0xff]  }
 0x26b   :  { %4938 = vmatpush2.bf16.msra.mxu1 %v6604_v54  ;;  %v6559_v54 = vld [vmem:[#allocation8 + $0x48] ss:$16 sps:$4 sm:$0xff]  }
 0x26c   :  { %4939 = vmatprep.subr.bf16.mxu1 %v6612_v57  ;;  %v6573_v57 = vld [vmem:[#allocation8 + $0xc] ss:$16 sps:$4 sm:$0xff]  }
 0x26d   :  { %4899 = vmatpush2.bf16.msra.mxu0 %v6520_v61  ;;  %v6579_v61 = vld [vmem:[#allocation8 + $0x1ec] ss:$16 sps:$4 sm:$0xff]  }
 0x26e   :  { %4900 = vmatprep.subr.bf16.mxu0 %v6525_v62  ;;  %v6577_v62 = vld [vmem:[#allocation8 + $0x1e8] ss:$16 sps:$4 sm:$0xff]  }
 0x26f   :  { %4940 = vmatpush2.bf16.msra.mxu1 %v6610_v33  ;;  %v6585_v33 = vld [vmem:[#allocation8 + $0x1cc] ss:$16 sps:$4 sm:$0xff]  }
 0x270   :  { %4941 = vmatprep.subr.bf16.mxu1 %v6618_v5  ;;  %v6591_v5 = vld [vmem:[#allocation8 + $0x1ac] ss:$16 sps:$4 sm:$0xff]  }
 0x271   :  { %4901 = vmatpush2.bf16.msra.mxu0 %v6523_v7  ;;  %v6597_v7 = vld [vmem:[#allocation8 + $0x18c] ss:$16 sps:$4 sm:$0xff]  }
 0x272   :  { %4902 = vmatprep.subr.bf16.mxu0 %v6528_v8  ;;  %v6595_v8 = vld [vmem:[#allocation8 + $0x188] ss:$16 sps:$4 sm:$0xff]  }
 0x273   :  { %4942 = vmatpush2.bf16.msra.mxu1 %v6616_v17  ;;  %v6603_v17 = vld [vmem:[#allocation8 + $0x16c] ss:$16 sps:$4 sm:$0xff]  }
 0x274   :  { %4943 = vmatprep.subr.bf16.mxu1 %v6624_v10  ;;  %v2990_v29 = vpop.f32.mrf.mxu0  ;;  %v6609_v10 = vld [vmem:[#allocation8 + $0x14c] ss:$16 sps:$4 sm:$0xff]  }
 0x275   :  { %v2991_v20 = vadd.f32 %v2990_v29, %v2950_v14  ;;  %4903 = vmatpush2.bf16.msra.mxu0 %v6526_v2  ;;  %v6607_v2 = vld [vmem:[#allocation8 + $0x148] ss:$16 sps:$4 sm:$0xff]  }
 0x276   :  { %v2992_v19 = vpop.f32.mrf.mxu0  ;;  %4904 = vmatprep.subr.bf16.mxu0 %v6531_v12  ;;  %v6615_v12 = vld [vmem:[#allocation8 + $0x12c] ss:$16 sps:$4 sm:$0xff]  }
 0x277   :  { %4944 = vmatpush2.bf16.msra.mxu1 %v6622_v13  ;;  %v3032_v22 = vadd.f32 %v7256_v18, %v2991_v20  ;;  %v2993_v24 = vadd.f32 %v2992_v19, %v2952_v39  ;;  %v572_v13 = vsub.s32 7, %v7165_v52  ;;  %v6613_v39 = vld [vmem:[#allocation8 + $0x128] ss:$16 sps:$4 sm:$0xff]   ;;  %v6621_v20 = vld [vmem:[#allocation8 + $0x10c] ss:$16 sps:$4 sm:$0xff]  }
 0x278   :  { %4945 = vmatprep.subr.bf16.mxu1 %v6630_v16  ;;  %v2994_v25 = vpop.f32.mrf.mxu0  ;;  %v569_v16 = vrot.slane %v7262_v0, %v568_v11  ;;  %v6658_v11 = vld [vmem:[#allocation8 + $0x268] ss:$16 sps:$4 sm:$0xff]  }
 0x279   :  { %vm3206_vm5 = vcmp.ge.f32.partialorder %v3032_v22, 0.0  ;;  %v3214_v38 = vmul.f32 0.2, %v3032_v22  ;;  %v3034_v26 = vadd.f32 %v7258_v1, %v2993_v24  ;;  %4905 = vmatpush2.bf16.msra.mxu0 %v6529_v37  ;;  %v573_v37 = vrot.slane %v7262_v0, %v572_v13  ;;  %v6627_v24 = vld [vmem:[#allocation8 + $0x4ec] ss:$16 sps:$4 sm:$0xff]  }
 0x27a   :  { %v2995_v45 = vpop.f32.mrf.mxu0  ;;  %4956 = vmatprep.subr.bf16.mxu0 %v6534_v21  ;;  %v6633_v0 = vld [vmem:[#allocation8 + $0x4cc] ss:$16 sps:$4 sm:$0xff]   ;;  %v6667_v13 = vld [vmem:[#allocation8 + $0x408] ss:$16 sps:$4 sm:$0xff]  }
 0x27b   :  { %4946 = vmatpush2.bf16.msra.mxu1 %v6628_v40  ;;  %v3215_v27 = vmul.f32 0.2, %v3034_v26  ;;  %vm3207_vm6 = vcmp.ge.f32.partialorder %v3034_v26, 0.0  ;;  %v3222_v51 = vsel %vm3206_vm5, %v3032_v22, %v3214_v38  ;;  %v6619_v22 = vld [vmem:[#allocation8 + $0x108] ss:$16 sps:$4 sm:$0xff]  }
 0x27c   :  { %4997 = vmatprep.subr.bf16.mxu1 %v6636_v35  ;;  %v7276_v28 = vpack.c.bf16 %v3222_v51, %v3222_v51 }
 0x27d   :  { %v3223_v41 = vsel %vm3207_vm6, %v3034_v26, %v3215_v27 }
 0x27e   :  { %v7272_v30 = vpop.f32.mrf.mxu1  ;;  %v7274_v18 = vpack.c.bf16 %v3223_v41, %v3223_v41  ;;  %v6625_v41 = vld [vmem:[#allocation8 + $0x4e8] ss:$16 sps:$4 sm:$0xff]  }
 0x27f   :  { %v3073_v21 = vadd.f32 %v7272_v30, %v569_v16  ;;  %v6675_v16 = vld [vmem:[#allocation8 + $0x5ec] ss:$16 sps:$4 sm:$0xff]  }
 0x280   :  { %v7278_v59 = vpop.f32.mrf.mxu1  ;;  %4906 = vmatprep.mubr.bf16.mxu0 %v7274_v18 }
 0x281   :  { %4907 = vmatmul.mubr.bf16.vlgmr.msra.gmra.mxu0 %v7276_v28  ;;  %v3075_v35 = vadd.f32 %v7278_v59, %v573_v37  ;;  %v6681_v37 = vld [vmem:[#allocation8 + $0x5cc] ss:$16 sps:$4 sm:$0xff]  }
 0x282   :  { %v3076_v1 = vpop.f32.mrf.mxu1  ;;  %4957 = vmatpush1.bf16.msra.mxu0 %v6532_v32  ;;  %4988 = vmatprep.mubr.bf16.mxu0 %v7229_v31  ;;  %v6567_v31 = vld [vmem:[#allocation8 + $0x2c] ss:$16 sps:$4 sm:$0xff]  }
 0x283   :  { %4958 = vmatprep.subr.bf16.mxu0 %v6537_v55 }
 0x284   :  { %v3077_v42 = vpop.f32.mrf.mxu1 }
 0x286   :  { %4959 = vmatpush1.bf16.msra.mxu0 %v6535_v36 }
 0x287   :  { %4960 = vmatprep.subr.bf16.mxu0 %v6543_v43 }
 0x28a   :  { %4961 = vmatpush1.bf16.msra.mxu0 %v6541_v44  ;;  %v6631_v44 = vld [vmem:[#allocation8 + $0x4c8] ss:$16 sps:$4 sm:$0xff]  }
 0x28b   :  { %4962 = vmatprep.subr.bf16.mxu0 %v6549_v46 }
 0x28e   :  { %4963 = vmatpush1.bf16.msra.mxu0 %v6547_v47  ;;  %v6639_v47 = vld [vmem:[#allocation8 + $0x4ac] ss:$16 sps:$4 sm:$0xff]  }
 0x28f   :  { %4964 = vmatprep.subr.bf16.mxu0 %v6555_v48 }
 0x292   :  { %4965 = vmatpush1.bf16.msra.mxu0 %v6553_v60 }
 0x293   :  { %4966 = vmatprep.subr.bf16.mxu0 %v6561_v50 }
 0x296   :  { %4967 = vmatpush1.bf16.msra.mxu0 %v6559_v54  ;;  %v6637_v54 = vld [vmem:[#allocation8 + $0x4a8] ss:$16 sps:$4 sm:$0xff]  }
 0x297   :  { %4968 = vmatprep.subr.bf16.mxu0 %v6567_v31 }
 0x29a   :  { %4969 = vmatpush1.bf16.msra.mxu0 %v6565_v56 }
 0x29b   :  { %4970 = vmatprep.subr.bf16.mxu0 %v6573_v57  ;;  %v6642_v57 = vld [vmem:[#allocation8 + $0x2cc] ss:$16 sps:$4 sm:$0xff]  }
 0x29e   :  { %4971 = vmatpush1.bf16.msra.mxu0 %v6571_v15  ;;  %v6645_v15 = vld [vmem:[#allocation8 + $0x48c] ss:$16 sps:$4 sm:$0xff]  }
 0x29f   :  { %4972 = vmatprep.subr.bf16.mxu0 %v6579_v61  ;;  %v6640_v61 = vld [vmem:[#allocation8 + $0x2c8] ss:$16 sps:$4 sm:$0xff]  }
 0x2a2   :  { %4973 = vmatpush2.bf16.msra.mxu0 %v6577_v62  ;;  %v6651_v62 = vld [vmem:[#allocation8 + $0x46c] ss:$16 sps:$4 sm:$0xff]  }
 0x2a3   :  { %4974 = vmatprep.subr.bf16.mxu0 %v6585_v33  ;;  %v6648_v33 = vld [vmem:[#allocation8 + $0x2ac] ss:$16 sps:$4 sm:$0xff]  }
 0x2a6   :  { %4975 = vmatpush2.bf16.msra.mxu0 %v6583_v3  ;;  %v6649_v3 = vld [vmem:[#allocation8 + $0x468] ss:$16 sps:$4 sm:$0xff]  }
 0x2a7   :  { %4976 = vmatprep.subr.bf16.mxu0 %v6591_v5  ;;  %v6646_v5 = vld [vmem:[#allocation8 + $0x2a8] ss:$16 sps:$4 sm:$0xff]  }
 0x2aa   :  { %4977 = vmatpush2.bf16.msra.mxu0 %v6589_v6  ;;  %v6657_v6 = vld [vmem:[#allocation8 + $0x44c] ss:$16 sps:$4 sm:$0xff]  }
 0x2ab   :  { %4978 = vmatprep.subr.bf16.mxu0 %v6597_v7  ;;  %v6654_v7 = vld [vmem:[#allocation8 + $0x28c] ss:$16 sps:$4 sm:$0xff]  }
 0x2ae   :  { %4979 = vmatpush2.bf16.msra.mxu0 %v6595_v8  ;;  %v6655_v8 = vld [vmem:[#allocation8 + $0x448] ss:$16 sps:$4 sm:$0xff]  }
 0x2af   :  { %4980 = vmatprep.subr.bf16.mxu0 %v6603_v17  ;;  %v6652_v17 = vld [vmem:[#allocation8 + $0x288] ss:$16 sps:$4 sm:$0xff]  }
 0x2b2   :  { %4981 = vmatpush2.bf16.msra.mxu0 %v6601_v9  ;;  %v6663_v9 = vld [vmem:[#allocation8 + $0x42c] ss:$16 sps:$4 sm:$0xff]  }
 0x2b3   :  { %4982 = vmatprep.subr.bf16.mxu0 %v6609_v10  ;;  %v6661_v10 = vld [vmem:[#allocation8 + $0x428] ss:$16 sps:$4 sm:$0xff]  }
 0x2b4   :  { %v3113_v14 = vpop.f32.mrf.mxu0 }
 0x2b5   :  { %v3114_v25 = vadd.f32 %v3113_v14, %v3073_v21  ;;  %v6664_v14 = vld [vmem:[#allocation8 + $0x248] ss:$16 sps:$4 sm:$0xff]  }
 0x2b6   :  { %4983 = vmatpush2.bf16.msra.mxu0 %v6607_v2  ;;  %v3115_v29 = vpop.f32.mrf.mxu0  ;;  %v6669_v2 = vld [vmem:[#allocation8 + $0x40c] ss:$16 sps:$4 sm:$0xff]   ;;  %v6679_v21 = vld [vmem:[#allocation8 + $0x5c8] ss:$16 sps:$4 sm:$0xff]  }
 0x2b7   :  { %4984 = vmatprep.subr.bf16.mxu0 %v6615_v12  ;;  %v3116_v45 = vadd.f32 %v3115_v29, %v3075_v35  ;;  %v6666_v12 = vld [vmem:[#allocation8 + $0x24c] ss:$16 sps:$4 sm:$0xff]   ;;  %v6685_v35 = vld [vmem:[#allocation8 + $0x5a8] ss:$16 sps:$4 sm:$0xff]  }
 0x2b8   :  { %v3117_v19 = vpop.f32.mrf.mxu0  ;;  %v6672_v29 = vld [vmem:[#allocation8 + $0x22c] ss:$16 sps:$4 sm:$0xff]  }
 0x2b9   :  { %v6678_v19 = vld [vmem:[#allocation8 + $0x20c] ss:$16 sps:$4 sm:$0xff]  }
 0x2ba   :  { %4985 = vmatpush2.bf16.msra.mxu0 %v6613_v39  ;;  %v3118_v40 = vpop.f32.mrf.mxu0  ;;  %v6673_v39 = vld [vmem:[#allocation8 + $0x5e8] ss:$16 sps:$4 sm:$0xff]  }
 0x2bb   :  { %4986 = vmatprep.subr.bf16.mxu0 %v6621_v20  ;;  %v6670_v20 = vld [vmem:[#allocation8 + $0x228] ss:$16 sps:$4 sm:$0xff]  }
 0x2bc   :  { %v3195_v38 = vpop.f32.mrf.mxu0  ;;  %v6676_v40 = vld [vmem:[#allocation8 + $0x208] ss:$16 sps:$4 sm:$0xff]  }
 0x2be   :  { %v3154_v26 = vpop.f32.mrf.mxu1  ;;  %4987 = vmatpush2.bf16.msra.mxu0 %v6619_v22  ;;  %v3197_v51 = vpop.f32.mrf.mxu0  ;;  %v6687_v22 = vld [vmem:[#allocation8 + $0x5ac] ss:$16 sps:$4 sm:$0xff]  }
 0x2bf   :  { %v3155_v27 = vadd.f32 %v3154_v26, %v3114_v25  ;;  %5038 = vmatprep.subr.bf16.mxu0 %v6627_v24  ;;  %v6684_v24 = vld [vmem:[#allocation8 + $0x3ec] ss:$16 sps:$4 sm:$0xff]   ;;  %v6682_v25 = vld [vmem:[#allocation8 + $0x3e8] ss:$16 sps:$4 sm:$0xff]  }
 0x2c0   :  { %v3156_v32 = vpop.f32.mrf.mxu1  ;;  %v3199_v1 = vpop.f32.mrf.mxu0  ;;  %v6690_v26 = vld [vmem:[#allocation8 + $0x3cc] ss:$16 sps:$4 sm:$0xff]  }
 0x2c1   :  { %v3196_v55 = vadd.f32 %v3195_v38, %v3155_v27  ;;  %v3157_v30 = vadd.f32 %v3156_v32, %v3116_v45  ;;  %4989 = vmatmul.mubr.bf16.vlgmr.msra.gmra.mxu0 %v7250_v53  ;;  %v6634_v53 = vld [vmem:[#allocation8 + $0x2e8] ss:$16 sps:$4 sm:$0xff]   ;;  %v6693_v38 = vld [vmem:[#allocation8 + $0x58c] ss:$16 sps:$4 sm:$0xff]  }
 0x2c2   :  { %v3158_v36 = vpop.f32.mrf.mxu1  ;;  %5039 = vmatpush1.bf16.msra.mxu0 %v6625_v41  ;;  %5070 = vmatprep.mubr.bf16.mxu0 %v7274_v18  ;;  %v3200_v43 = vpop.f32.mrf.mxu0  ;;  %v6643_v18 = vld [vmem:[#allocation8 + $0x488] ss:$16 sps:$4 sm:$0xff]   ;;  %v6696_v41 = vld [vmem:[#allocation8 + $0x3ac] ss:$16 sps:$4 sm:$0xff]  }
 0x2c3   :  { %vm3208_vm7 = vcmp.ge.f32.partialorder %v3196_v55, 0.0  ;;  %v3216_v42 = vmul.f32 0.2, %v3196_v55  ;;  %v3198_v59 = vadd.f32 %v3197_v51, %v3157_v30  ;;  %5040 = vmatprep.subr.bf16.mxu0 %v6633_v0  ;;  %v6691_v45 = vld [vmem:[#allocation8 + $0x588] ss:$16 sps:$4 sm:$0xff]  }
 0x2c4   :  { %v3159_v46 = vpop.f32.mrf.mxu1  ;;  %v6688_v27 = vld [vmem:[#allocation8 + $0x3c8] ss:$16 sps:$4 sm:$0xff]   ;;  %v6699_v51 = vld [vmem:[#allocation8 + $0x56c] ss:$16 sps:$4 sm:$0xff]  }
 0x2c5   :  { %vm3209_vm8 = vcmp.ge.f32.partialorder %v3198_v59, 0.0  ;;  %v3217_v48 = vmul.f32 0.2, %v3198_v59  ;;  %v3224_v60 = vsel %vm3208_vm7, %v3196_v55, %v3216_v42  ;;  %v6697_v32 = vld [vmem:[#allocation8 + $0x568] ss:$16 sps:$4 sm:$0xff]  }
 0x2c6   :  { %5041 = vmatpush1.bf16.msra.mxu0 %v6631_v44  ;;  %v7293_v56 = vpack.c.bf16 %v3224_v60, %v3224_v60  ;;  %v6694_v0 = vld [vmem:[#allocation8 + $0x3a8] ss:$16 sps:$4 sm:$0xff]   ;;  %v6705_v55 = vld [vmem:[#allocation8 + $0x54c] ss:$16 sps:$4 sm:$0xff]   ;;  %v7298_v44 = vld [vmem:[#allocation10] sm:$0xf] }
 0x2c7   :  { %v3225_v50 = vsel %vm3209_vm8, %v3198_v59, %v3217_v48  ;;  %5042 = vmatprep.subr.bf16.mxu0 %v6639_v47  ;;  %v6702_v30 = vld [vmem:[#allocation8 + $0x38c] ss:$16 sps:$4 sm:$0xff]   ;;  %v6703_v1 = vld [vmem:[#allocation8 + $0x548] ss:$16 sps:$4 sm:$0xff]   ;;  %v3495_v60 = vrot.slane %v7298_v44, %v7168_v63 }
 0x2c8   :  { %v7291_v31 = vpack.c.bf16 %v3225_v50, %v3225_v50  ;;  %v6700_v36 = vld [vmem:[#allocation8 + $0x388] ss:$16 sps:$4 sm:$0xff]   ;;  %v6711_v42 = vld [vmem:[#allocation8 + $0x52c] ss:$16 sps:$4 sm:$0xff]  }
 0x2c9   :  { %v6708_v59 = vld [vmem:[#allocation8 + $0x36c] ss:$16 sps:$4 sm:$0xff]   ;;  %v6709_v43 = vld [vmem:[#allocation8 + $0x528] ss:$16 sps:$4 sm:$0xff]  }
 0x2ca   :  { %4947 = vmatprep.mubr.bf16.mxu1 %v7291_v31  ;;  %5043 = vmatpush1.bf16.msra.mxu0 %v6637_v54  ;;  %v6706_v46 = vld [vmem:[#allocation8 + $0x368] ss:$16 sps:$4 sm:$0xff]   ;;  %v6717_v47 = vld [vmem:[#allocation8 + $0x50c] ss:$16 sps:$4 sm:$0xff]  }
 0x2cb   :  { %4948 = vmatmul.mubr.bf16.vlgmr.msra.gmra.mxu1 %v7293_v56  ;;  %5044 = vmatprep.subr.bf16.mxu0 %v6645_v15  ;;  %v6714_v48 = vld [vmem:[#allocation8 + $0x34c] ss:$16 sps:$4 sm:$0xff]   ;;  %v6715_v50 = vld [vmem:[#allocation8 + $0x508] ss:$16 sps:$4 sm:$0xff]  }
 0x2cc   :  { %4998 = vmatpush1.bf16.msra.mxu1 %v6634_v53  ;;  %5029 = vmatprep.mubr.bf16.mxu1 %v7233_v34  ;;  %v6660_v34 = vld [vmem:[#allocation8 + $0x26c] ss:$16 sps:$4 sm:$0xff]   ;;  %v6712_v54 = vld [vmem:[#allocation8 + $0x348] ss:$16 sps:$4 sm:$0xff]   ;;  %v3499_v53 = vrot.slane %v7298_v44, %v7173_v4 }
 0x2cd   :  { %4999 = vmatprep.subr.bf16.mxu1 %v6642_v57  ;;  %v6774_v57 = vld [vmem:[#allocation11 + $0x74] ss:$8 sps:$4 sm:$0xff]  }
 0x2ce   :  { %5045 = vmatpush1.bf16.msra.mxu0 %v6643_v18  ;;  %v6720_v18 = vld [vmem:[#allocation8 + $0x32c] ss:$16 sps:$4 sm:$0xff]  }
 0x2cf   :  { %5046 = vmatprep.subr.bf16.mxu0 %v6651_v62 }
 0x2d0   :  { %5000 = vmatpush1.bf16.msra.mxu1 %v6640_v61 }
 0x2d1   :  { %5001 = vmatprep.subr.bf16.mxu1 %v6648_v33 }
 0x2d2   :  { %5047 = vmatpush1.bf16.msra.mxu0 %v6649_v3  ;;  %v6772_v3 = vld [vmem:[#allocation11 + $0x70] ss:$8 sps:$4 sm:$0xff]  }
 0x2d3   :  { %5048 = vmatprep.subr.bf16.mxu0 %v6657_v6 }
 0x2d4   :  { %5002 = vmatpush1.bf16.msra.mxu1 %v6646_v5 }
 0x2d5   :  { %5003 = vmatprep.subr.bf16.mxu1 %v6654_v7 }
 0x2d6   :  { %5049 = vmatpush1.bf16.msra.mxu0 %v6655_v8  ;;  %v6718_v8 = vld [vmem:[#allocation8 + $0x328] ss:$16 sps:$4 sm:$0xff]  }
 0x2d7   :  { %5050 = vmatprep.subr.bf16.mxu0 %v6663_v9 }
 0x2d8   :  { %5004 = vmatpush1.bf16.msra.mxu1 %v6652_v17  ;;  %v6777_v17 = vld [vmem:[#allocation11 + $0x64] ss:$8 sps:$4 sm:$0xff]  }
 0x2d9   :  { %5005 = vmatprep.subr.bf16.mxu1 %v6660_v34  ;;  %v6723_v34 = vld [vmem:[#allocation8 + $0x30c] ss:$16 sps:$4 sm:$0xff]  }
 0x2da   :  { %5051 = vmatpush1.bf16.msra.mxu0 %v6661_v10 }
 0x2db   :  { %5052 = vmatprep.subr.bf16.mxu0 %v6669_v2 }
 0x2dc   :  { %5006 = vmatpush1.bf16.msra.mxu1 %v6658_v11 }
 0x2dd   :  { %5007 = vmatprep.subr.bf16.mxu1 %v6666_v12  ;;  %v6775_v12 = vld [vmem:[#allocation11 + $0x60] ss:$8 sps:$4 sm:$0xff]  }
 0x2de   :  { %5053 = vmatpush1.bf16.msra.mxu0 %v6667_v13 }
 0x2df   :  { %5054 = vmatprep.subr.bf16.mxu0 %v6675_v16  ;;  %v6780_v16 = vld [vmem:[#allocation11 + $0x54] ss:$8 sps:$4 sm:$0xff]  }
 0x2e0   :  { %5008 = vmatpush1.bf16.msra.mxu1 %v6664_v14  ;;  %v6721_v14 = vld [vmem:[#allocation8 + $0x308] ss:$16 sps:$4 sm:$0xff]  }
 0x2e1   :  { %5009 = vmatprep.subr.bf16.mxu1 %v6672_v29  ;;  %v6726_v29 = vld [vmem:[#allocation8 + $0x6ec] ss:$16 sps:$4 sm:$0xff]  }
 0x2e2   :  { %5055 = vmatpush2.bf16.msra.mxu0 %v6673_v39  ;;  %v6778_v39 = vld [vmem:[#allocation11 + $0x50] ss:$8 sps:$4 sm:$0xff]  }
 0x2e3   :  { %5056 = vmatprep.subr.bf16.mxu0 %v6681_v37  ;;  %v6729_v37 = vld [vmem:[#allocation8 + $0x6cc] ss:$16 sps:$4 sm:$0xff]  }
 0x2e4   :  { %5010 = vmatpush1.bf16.msra.mxu1 %v6670_v20  ;;  %v6724_v20 = vld [vmem:[#allocation8 + $0x6e8] ss:$16 sps:$4 sm:$0xff]  }
 0x2e5   :  { %5011 = vmatprep.subr.bf16.mxu1 %v6678_v19  ;;  %v6783_v19 = vld [vmem:[#allocation11 + $0x44] ss:$8 sps:$4 sm:$0xff]  }
 0x2e6   :  { %5057 = vmatpush2.bf16.msra.mxu0 %v6679_v21  ;;  %v6727_v21 = vld [vmem:[#allocation8 + $0x6c8] ss:$16 sps:$4 sm:$0xff]  }
 0x2e7   :  { %5058 = vmatprep.subr.bf16.mxu0 %v6687_v22  ;;  %v6732_v22 = vld [vmem:[#allocation8 + $0x6ac] ss:$16 sps:$4 sm:$0xff]  }
 0x2e8   :  { %5012 = vmatpush1.bf16.msra.mxu1 %v6676_v40  ;;  %v6786_v40 = vld [vmem:[#allocation11 + $0x34] ss:$8 sps:$4 sm:$0xff]  }
 0x2e9   :  { %5013 = vmatprep.subr.bf16.mxu1 %v6684_v24  ;;  %v6784_v24 = vld [vmem:[#allocation11 + $0x30] ss:$8 sps:$4 sm:$0xff]  }
 0x2ea   :  { %5059 = vmatpush2.bf16.msra.mxu0 %v6685_v35  ;;  %v6730_v35 = vld [vmem:[#allocation8 + $0x6a8] ss:$16 sps:$4 sm:$0xff]  }
 0x2eb   :  { %5060 = vmatprep.subr.bf16.mxu0 %v6693_v38  ;;  %v6735_v38 = vld [vmem:[#allocation8 + $0x68c] ss:$16 sps:$4 sm:$0xff]  }
 0x2ec   :  { %5014 = vmatpush2.bf16.msra.mxu1 %v6682_v25  ;;  %v6789_v25 = vld [vmem:[#allocation11 + $0x24] ss:$8 sps:$4 sm:$0xff]  }
 0x2ed   :  { %5015 = vmatprep.subr.bf16.mxu1 %v6690_v26  ;;  %v6733_v26 = vld [vmem:[#allocation8 + $0x688] ss:$16 sps:$4 sm:$0xff]  }
 0x2ee   :  { %5061 = vmatpush2.bf16.msra.mxu0 %v6691_v45  ;;  %v6792_v45 = vld [vmem:[#allocation11 + $0x14] ss:$8 sps:$4 sm:$0xff]  }
 0x2ef   :  { %5062 = vmatprep.subr.bf16.mxu0 %v6699_v51  ;;  %v6736_v51 = vld [vmem:[#allocation8 + $0x668] ss:$16 sps:$4 sm:$0xff]  }
 0x2f0   :  { %5016 = vmatpush2.bf16.msra.mxu1 %v6688_v27  ;;  %v6790_v27 = vld [vmem:[#allocation11 + $0x10] ss:$8 sps:$4 sm:$0xff]  }
 0x2f1   :  { %5017 = vmatprep.subr.bf16.mxu1 %v6696_v41  ;;  %v6795_v41 = vld [vmem:[#allocation11 + $0x4] ss:$8 sps:$4 sm:$0xff]  }
 0x2f2   :  { %5063 = vmatpush2.bf16.msra.mxu0 %v6697_v32  ;;  %v6741_v32 = vld [vmem:[#allocation8 + $0x64c] ss:$16 sps:$4 sm:$0xff]  }
 0x2f3   :  { %5064 = vmatprep.subr.bf16.mxu0 %v6705_v55  ;;  %v6739_v55 = vld [vmem:[#allocation8 + $0x648] ss:$16 sps:$4 sm:$0xff]  }
 0x2f4   :  { %5018 = vmatpush2.bf16.msra.mxu1 %v6694_v0  ;;  %v6793_v0 = vld [vmem:[#allocation11] ss:$8 sps:$4 sm:$0xff]  }
 0x2f5   :  { %5019 = vmatprep.subr.bf16.mxu1 %v6702_v30  ;;  %v6798_v30 = vld [vmem:[#allocation11 + $0xf4] ss:$8 sps:$4 sm:$0xff]  }
 0x2f6   :  { %5065 = vmatpush2.bf16.msra.mxu0 %v6703_v1  ;;  %v6744_v1 = vld [vmem:[#allocation8 + $0x62c] ss:$16 sps:$4 sm:$0xff]  }
 0x2f7   :  { %5066 = vmatprep.subr.bf16.mxu0 %v6711_v42  ;;  %v6742_v42 = vld [vmem:[#allocation8 + $0x628] ss:$16 sps:$4 sm:$0xff]  }
 0x2f8   :  { %5020 = vmatpush2.bf16.msra.mxu1 %v6700_v36  ;;  %v6796_v36 = vld [vmem:[#allocation11 + $0xf0] ss:$8 sps:$4 sm:$0xff]  }
 0x2f9   :  { %5021 = vmatprep.subr.bf16.mxu1 %v6708_v59  ;;  %v6801_v59 = vld [vmem:[#allocation11 + $0xe4] ss:$8 sps:$4 sm:$0xff]  }
 0x2fa   :  { %5067 = vmatpush2.bf16.msra.mxu0 %v6709_v43  ;;  %v6747_v43 = vld [vmem:[#allocation8 + $0x60c] ss:$16 sps:$4 sm:$0xff]  }
 0x2fb   :  { %5068 = vmatprep.subr.bf16.mxu0 %v6717_v47  ;;  %v6745_v47 = vld [vmem:[#allocation8 + $0x608] ss:$16 sps:$4 sm:$0xff]  }
 0x2fc   :  { %5022 = vmatpush2.bf16.msra.mxu1 %v6706_v46  ;;  %v4826_v15 = vpop.f32.mrf.mxu0  ;;  %v6799_v46 = vld [vmem:[#allocation11 + $0xe0] ss:$8 sps:$4 sm:$0xff]  }
 0x2fd   :  { %5023 = vmatprep.subr.bf16.mxu1 %v6714_v48  ;;  %v4827_v61 = vadd.f32 %v4826_v15, %v3495_v60  ;;  %v6804_v48 = vld [vmem:[#allocation11 + $0xd4] ss:$8 sps:$4 sm:$0xff]   ;;  %v6750_v60 = vld [vmem:[#allocation8 + $0x7ec] ss:$16 sps:$4 sm:$0xff]  }
 0x2fe   :  { %v4867_v62 = vpop.f32.mrf.mxu1  ;;  %v4828_v33 = vpop.f32.mrf.mxu0  ;;  %5069 = vmatpush2.bf16.msra.mxu0 %v6715_v50  ;;  %v6802_v50 = vld [vmem:[#allocation11 + $0xd0] ss:$8 sps:$4 sm:$0xff]   ;;  %v6805_v15 = vld [vmem:[#allocation11 + $0xc0] ss:$8 sps:$4 sm:$0xff]  }
 0x2ff   :  { %v7304_v5 = vadd.f32 %v4867_v62, %v4827_v61  ;;  %v4829_v6 = vadd.f32 %v4828_v33, %v3499_v53  ;;  %5532 = vmatprep.subr.bf16.mxu0 %v6774_v57  ;;  %v6807_v53 = vld [vmem:[#allocation11 + $0xc4] ss:$8 sps:$4 sm:$0xff]   ;;  %v6753_v57 = vld [vmem:[#allocation8 + $0x7cc] ss:$16 sps:$4 sm:$0xff]   ;;  %v6810_v61 = vld [vmem:[#allocation11 + $0xb4] ss:$8 sps:$4 sm:$0xff]  }
 0x300   :  { %5024 = vmatpush2.bf16.msra.mxu1 %v6712_v54  ;;  %v4869_v7 = vpop.f32.mrf.mxu1  ;;  %v4830_v9 = vpop.f32.mrf.mxu0  ;;  %v6748_v54 = vld [vmem:[#allocation8 + $0x7e8] ss:$16 sps:$4 sm:$0xff]   ;;  %v6756_v62 = vld [vmem:[#allocation8 + $0x7ac] ss:$16 sps:$4 sm:$0xff]  }
 0x301   :  { %5025 = vmatprep.subr.bf16.mxu1 %v6720_v18  ;;  %v7306_v10 = vadd.f32 %v4869_v7, %v4829_v6  ;;  %5071 = vmatmul.mubr.bf16.vlgmr.msra.gmra.mxu0 %v7276_v28  ;;  %v6781_v28 = vld [vmem:[#allocation11 + $0x40] ss:$8 sps:$4 sm:$0xff]   ;;  %v6751_v18 = vld [vmem:[#allocation8 + $0x7c8] ss:$16 sps:$4 sm:$0xff]   ;;  %v6808_v33 = vld [vmem:[#allocation11 + $0xb0] ss:$8 sps:$4 sm:$0xff]  }
 0x302   :  { %v4871_v11 = vpop.f32.mrf.mxu1  ;;  %v4831_v2 = vpop.f32.mrf.mxu0  ;;  %5533 = vmatpush1.bf16.msra.mxu0 %v6772_v3  ;;  %v6754_v3 = vld [vmem:[#allocation8 + $0x7a8] ss:$16 sps:$4 sm:$0xff]   ;;  %v6759_v7 = vld [vmem:[#allocation8 + $0x78c] ss:$16 sps:$4 sm:$0xff]  }
 0x303   :  { %5534 = vmatprep.subr.bf16.mxu0 %v6777_v17  ;;  %v6813_v6 = vld [vmem:[#allocation11 + $0xa4] ss:$8 sps:$4 sm:$0xff]   ;;  %v6816_v9 = vld [vmem:[#allocation11 + $0x94] ss:$8 sps:$4 sm:$0xff]   ;;  %v6814_v11 = vld [vmem:[#allocation11 + $0x90] ss:$8 sps:$4 sm:$0xff]  }
 0x304   :  { %5026 = vmatpush2.bf16.msra.mxu1 %v6718_v8  ;;  %v4872_v13 = vpop.f32.mrf.mxu1  ;;  %v6811_v8 = vld [vmem:[#allocation11 + $0xa0] ss:$8 sps:$4 sm:$0xff]   ;;  %v6757_v17 = vld [vmem:[#allocation8 + $0x788] ss:$16 sps:$4 sm:$0xff]  }
 0x305   :  { %5027 = vmatprep.subr.bf16.mxu1 %v6723_v34  ;;  %v6762_v34 = vld [vmem:[#allocation8 + $0x76c] ss:$16 sps:$4 sm:$0xff]   ;;  %v6760_v2 = vld [vmem:[#allocation8 + $0x768] ss:$16 sps:$4 sm:$0xff]  }
 0x306   :  { %5535 = vmatpush1.bf16.msra.mxu0 %v6775_v12  ;;  %v6819_v12 = vld [vmem:[#allocation11 + $0x84] ss:$8 sps:$4 sm:$0xff]   ;;  %v6765_v13 = vld [vmem:[#allocation8 + $0x74c] ss:$16 sps:$4 sm:$0xff]  }
 0x307   :  { %5536 = vmatprep.subr.bf16.mxu0 %v6780_v16  ;;  %v6763_v16 = vld [vmem:[#allocation8 + $0x748] ss:$16 sps:$4 sm:$0xff]  }
 0x308   :  { %5028 = vmatpush2.bf16.msra.mxu1 %v6721_v14  ;;  %v6817_v14 = vld [vmem:[#allocation11 + $0x80] ss:$8 sps:$4 sm:$0xff]  }
 0x309   :  { %5079 = vmatprep.subr.bf16.mxu1 %v6726_v29  ;;  %v6768_v29 = vld [vmem:[#allocation8 + $0x72c] ss:$16 sps:$4 sm:$0xff]  }
 0x30a   :  { %5537 = vmatpush1.bf16.msra.mxu0 %v6778_v39  ;;  %v6766_v39 = vld [vmem:[#allocation8 + $0x728] ss:$16 sps:$4 sm:$0xff]  }
 0x30b   :  { %5030 = vmatmul.mubr.bf16.vlgmr.msra.gmra.mxu1 %v7252_v58  ;;  %5538 = vmatprep.subr.bf16.mxu0 %v6783_v19  ;;  %v6787_v58 = vld [vmem:[#allocation11 + $0x20] ss:$8 sps:$4 sm:$0xff]  }
 0x30c   :  { %5080 = vmatpush1.bf16.msra.mxu1 %v6724_v20  ;;  %5111 = vmatprep.mubr.bf16.mxu1 %v7291_v31  ;;  %v6738_v31 = vld [vmem:[#allocation8 + $0x66c] ss:$16 sps:$4 sm:$0xff]  }
 0x30d   :  { %5081 = vmatprep.subr.bf16.mxu1 %v6729_v37  ;;  %v6771_v20 = vld [vmem:[#allocation8 + $0x70c] ss:$16 sps:$4 sm:$0xff]  }
 0x30e   :  { %5539 = vmatpush1.bf16.msra.mxu0 %v6781_v28 }
 0x30f   :  { %5540 = vmatprep.subr.bf16.mxu0 %v6786_v40 }
 0x310   :  { %5082 = vmatpush1.bf16.msra.mxu1 %v6727_v21  ;;  %v6769_v21 = vld [vmem:[#allocation8 + $0x708] ss:$16 sps:$4 sm:$0xff]  }
 0x311   :  { %5083 = vmatprep.subr.bf16.mxu1 %v6732_v22 }
 0x312   :  { %5541 = vmatpush1.bf16.msra.mxu0 %v6784_v24 }
 0x313   :  { %5542 = vmatprep.subr.bf16.mxu0 %v6789_v25  ;;  %v6822_v25 = vld [vmem:[#allocation11 + $0x174] ss:$8 sps:$4 sm:$0xff]  }
 0x314   :  { %5084 = vmatpush1.bf16.msra.mxu1 %v6730_v35  ;;  %v6820_v35 = vld [vmem:[#allocation11 + $0x170] ss:$8 sps:$4 sm:$0xff]  }
 0x315   :  { %5085 = vmatprep.subr.bf16.mxu1 %v6735_v38  ;;  %v6825_v38 = vld [vmem:[#allocation11 + $0x164] ss:$8 sps:$4 sm:$0xff]  }
 0x316   :  { %5543 = vmatpush1.bf16.msra.mxu0 %v6787_v58  ;;  %v6823_v58 = vld [vmem:[#allocation11 + $0x160] ss:$8 sps:$4 sm:$0xff]  }
 0x317   :  { %5544 = vmatprep.subr.bf16.mxu0 %v6792_v45  ;;  %v6831_v45 = vld [vmem:[#allocation11 + $0x144] ss:$8 sps:$4 sm:$0xff]  }
 0x318   :  { %5086 = vmatpush1.bf16.msra.mxu1 %v6733_v26  ;;  %v6826_v26 = vld [vmem:[#allocation11 + $0x150] ss:$8 sps:$4 sm:$0xff]  }
 0x319   :  { %5087 = vmatprep.subr.bf16.mxu1 %v6738_v31  ;;  %v6834_v31 = vld [vmem:[#allocation11 + $0x134] ss:$8 sps:$4 sm:$0xff]  }
 0x31a   :  { %5545 = vmatpush1.bf16.msra.mxu0 %v6790_v27  ;;  %v6832_v27 = vld [vmem:[#allocation11 + $0x130] ss:$8 sps:$4 sm:$0xff]  }
 0x31b   :  { %5546 = vmatprep.subr.bf16.mxu0 %v6795_v41  ;;  %v6840_v41 = vld [vmem:[#allocation11 + $0x114] ss:$8 sps:$4 sm:$0xff]  }
 0x31c   :  { %5088 = vmatpush1.bf16.msra.mxu1 %v6736_v51  ;;  %v6835_v51 = vld [vmem:[#allocation11 + $0x120] ss:$8 sps:$4 sm:$0xff]  }
 0x31d   :  { %5089 = vmatprep.subr.bf16.mxu1 %v6741_v32  ;;  %v6838_v32 = vld [vmem:[#allocation11 + $0x110] ss:$8 sps:$4 sm:$0xff]  }
 0x31e   :  { %5547 = vmatpush1.bf16.msra.mxu0 %v6793_v0  ;;  %v6843_v0 = vld [vmem:[#allocation11 + $0x104] ss:$8 sps:$4 sm:$0xff]  }
 0x31f   :  { %5548 = vmatprep.subr.bf16.mxu0 %v6798_v30  ;;  %v6846_v30 = vld [vmem:[#allocation11 + $0x1f4] ss:$8 sps:$4 sm:$0xff]  }
 0x320   :  { %5090 = vmatpush1.bf16.msra.mxu1 %v6739_v55  ;;  %v6841_v55 = vld [vmem:[#allocation11 + $0x100] ss:$8 sps:$4 sm:$0xff]  }
 0x321   :  { %5091 = vmatprep.subr.bf16.mxu1 %v6744_v1  ;;  %v6844_v1 = vld [vmem:[#allocation11 + $0x1f0] ss:$8 sps:$4 sm:$0xff]  }
 0x322   :  { %5549 = vmatpush2.bf16.msra.mxu0 %v6796_v36  ;;  %v6849_v36 = vld [vmem:[#allocation11 + $0x1e4] ss:$8 sps:$4 sm:$0xff]  }
 0x323   :  { %5550 = vmatprep.subr.bf16.mxu0 %v6801_v59  ;;  %v6852_v59 = vld [vmem:[#allocation11 + $0x1d4] ss:$8 sps:$4 sm:$0xff]  }
 0x324   :  { %5092 = vmatpush1.bf16.msra.mxu1 %v6742_v42  ;;  %v6847_v42 = vld [vmem:[#allocation11 + $0x1e0] ss:$8 sps:$4 sm:$0xff]  }
 0x325   :  { %5093 = vmatprep.subr.bf16.mxu1 %v6747_v43  ;;  %v6850_v43 = vld [vmem:[#allocation11 + $0x1d0] ss:$8 sps:$4 sm:$0xff]  }
 0x326   :  { %5551 = vmatpush2.bf16.msra.mxu0 %v6799_v46  ;;  %v6855_v46 = vld [vmem:[#allocation11 + $0x1c4] ss:$8 sps:$4 sm:$0xff]  }
 0x327   :  { %5552 = vmatprep.subr.bf16.mxu0 %v6804_v48  ;;  %v6858_v48 = vld [vmem:[#allocation11 + $0x1b4] ss:$8 sps:$4 sm:$0xff]  }
 0x328   :  { %5094 = vmatpush1.bf16.msra.mxu1 %v6745_v47  ;;  %v6853_v47 = vld [vmem:[#allocation11 + $0x1c0] ss:$8 sps:$4 sm:$0xff]  }
 0x329   :  { %5095 = vmatprep.subr.bf16.mxu1 %v6750_v60  ;;  %v6856_v60 = vld [vmem:[#allocation11 + $0x1b0] ss:$8 sps:$4 sm:$0xff]  }
 0x32a   :  { %5553 = vmatpush2.bf16.msra.mxu0 %v6802_v50  ;;  %v6861_v50 = vld [vmem:[#allocation11 + $0x1a4] ss:$8 sps:$4 sm:$0xff]  }
 0x32b   :  { %5554 = vmatprep.subr.bf16.mxu0 %v6807_v53 }
 0x32c   :  { %5096 = vmatpush2.bf16.msra.mxu1 %v6748_v54 }
 0x32d   :  { %5097 = vmatprep.subr.bf16.mxu1 %v6753_v57  ;;  %v6859_v57 = vld [vmem:[#allocation11 + $0x1a0] ss:$8 sps:$4 sm:$0xff]  }
 0x32e   :  { %5555 = vmatpush2.bf16.msra.mxu0 %v6805_v15 }
 0x32f   :  { %5556 = vmatprep.subr.bf16.mxu0 %v6810_v61 }
 0x330   :  { %5098 = vmatpush2.bf16.msra.mxu1 %v6751_v18 }
 0x331   :  { %5099 = vmatprep.subr.bf16.mxu1 %v6756_v62 }
 0x332   :  { %5557 = vmatpush2.bf16.msra.mxu0 %v6808_v33  ;;  %v6864_v33 = vld [vmem:[#allocation11 + $0x194] ss:$8 sps:$4 sm:$0xff]  }
 0x333   :  { %5558 = vmatprep.subr.bf16.mxu0 %v6813_v6  ;;  %v6862_v6 = vld [vmem:[#allocation11 + $0x190] ss:$8 sps:$4 sm:$0xff]  }
 0x334   :  { %5100 = vmatpush2.bf16.msra.mxu1 %v6754_v3 }
 0x335   :  { %5101 = vmatprep.subr.bf16.mxu1 %v6759_v7 }
 0x336   :  { %5559 = vmatpush2.bf16.msra.mxu0 %v6811_v8 }
 0x337   :  { %5560 = vmatprep.subr.bf16.mxu0 %v6816_v9 }
 0x338   :  { %5102 = vmatpush2.bf16.msra.mxu1 %v6757_v17 }
 0x339   :  { %5103 = vmatprep.subr.bf16.mxu1 %v6762_v34  ;;  %v6867_v34 = vld [vmem:[#allocation11 + $0x184] ss:$8 sps:$4 sm:$0xff]  }
 0x33a   :  { %5561 = vmatpush2.bf16.msra.mxu0 %v6814_v11 }
 0x33b   :  { %5562 = vmatprep.subr.bf16.mxu0 %v6819_v12  ;;  %v6865_v12 = vld [vmem:[#allocation11 + $0x180] ss:$8 sps:$4 sm:$0xff]  }
 0x33c   :  { %5104 = vmatpush2.bf16.msra.mxu1 %v6760_v2 }
 0x33d   :  { %5105 = vmatprep.subr.bf16.mxu1 %v6765_v13 }
 0x33e   :  { %5563 = vmatpush2.bf16.msra.mxu0 %v6817_v14 }
 0x340   :  { %5106 = vmatpush2.bf16.msra.mxu1 %v6763_v16 }
 0x341   :  { %5107 = vmatprep.subr.bf16.mxu1 %v6768_v29  ;;  %v4908_v37 = vpop.f32.mrf.mxu0 }
 0x342   :  { %v7312_v19 = vadd.f32 %v4908_v37, %v7304_v5  ;;  %v6828_v5 = vld [vmem:[#allocation11 + $0x154] ss:$8 sps:$4 sm:$0xff]  }
 0x343   :  { %v4910_v28 = vpop.f32.mrf.mxu0 }
 0x344   :  { %5108 = vmatpush2.bf16.msra.mxu1 %v6766_v39  ;;  %v7315_v40 = vadd.f32 %v4910_v28, %v7306_v10  ;;  %v6829_v10 = vld [vmem:[#allocation11 + $0x140] ss:$8 sps:$4 sm:$0xff]  }
 0x345   :  { %5109 = vmatprep.subr.bf16.mxu1 %v6771_v20  ;;  %v4912_v22 = vpop.f32.mrf.mxu0  ;;  %v3503_v20 = vrot.slane %v7298_v44, %v552_v23 }
 0x347   :  { %v4913_v24 = vpop.f32.mrf.mxu0 }
 0x348   :  { %5110 = vmatpush2.bf16.msra.mxu1 %v6769_v21 }
 0x349   :  { %5573 = vmatprep.subr.bf16.mxu1 %v6822_v25 }
 0x34b   :  { %5112 = vmatmul.mubr.bf16.vlgmr.msra.gmra.mxu1 %v7293_v56  ;;  %v6837_v56 = vld [vmem:[#allocation11 + $0x124] ss:$8 sps:$4 sm:$0xff]  }
 0x34c   :  { %5574 = vmatpush1.bf16.msra.mxu1 %v6820_v35 }
 0x34d   :  { %5575 = vmatprep.subr.bf16.mxu1 %v6825_v38 }
 0x350   :  { %5576 = vmatpush1.bf16.msra.mxu1 %v6823_v58 }
 0x351   :  { %5577 = vmatprep.subr.bf16.mxu1 %v6828_v5 }
 0x354   :  { %5578 = vmatpush1.bf16.msra.mxu1 %v6826_v26 }
 0x355   :  { %5579 = vmatprep.subr.bf16.mxu1 %v6831_v45 }
 0x358   :  { %5580 = vmatpush1.bf16.msra.mxu1 %v6829_v10 }
 0x359   :  { %5581 = vmatprep.subr.bf16.mxu1 %v6834_v31 }
 0x35c   :  { %5582 = vmatpush1.bf16.msra.mxu1 %v6832_v27 }
 0x35d   :  { %5583 = vmatprep.subr.bf16.mxu1 %v6837_v56 }
 0x360   :  { %5584 = vmatpush1.bf16.msra.mxu1 %v6835_v51 }
 0x361   :  { %5585 = vmatprep.subr.bf16.mxu1 %v6840_v41 }
 0x364   :  { %5586 = vmatpush1.bf16.msra.mxu1 %v6838_v32 }
 0x365   :  { %5587 = vmatprep.subr.bf16.mxu1 %v6843_v0 }
 0x368   :  { %5588 = vmatpush1.bf16.msra.mxu1 %v6841_v55 }
 0x369   :  { %5589 = vmatprep.subr.bf16.mxu1 %v6846_v30 }
 0x36c   :  { %5590 = vmatpush2.bf16.msra.mxu1 %v6844_v1 }
 0x36d   :  { %5591 = vmatprep.subr.bf16.mxu1 %v6849_v36  ;;  %v5200_v36 = vld [vmem:[#allocation13] sm:$0x3] }
 0x370   :  { %5592 = vmatpush2.bf16.msra.mxu1 %v6847_v42  ;;  %v5205_v42 = vrot.slane %v5200_v36, %v7168_v63 }
 0x371   :  { %5593 = vmatprep.subr.bf16.mxu1 %v6852_v59  ;;  %v5209_v59 = vrot.slane %v5200_v36, %v7173_v4 }
 0x374   :  { %5594 = vmatpush2.bf16.msra.mxu1 %v6850_v43 }
 0x375   :  { %5595 = vmatprep.subr.bf16.mxu1 %v6855_v46 }
 0x378   :  { %5596 = vmatpush2.bf16.msra.mxu1 %v6853_v47 }
 0x379   :  { %5597 = vmatprep.subr.bf16.mxu1 %v6858_v48 }
 0x37c   :  { %5598 = vmatpush2.bf16.msra.mxu1 %v6856_v60  ;;  %v5620_v60 = vld [vmem:[#allocation14] sm:$0x3] }
 0x37d   :  { %5599 = vmatprep.subr.bf16.mxu1 %v6861_v50 }
 0x380   :  { %5600 = vmatpush2.bf16.msra.mxu1 %v6859_v57 }
 0x381   :  { %v4990_v54 = vpop.f32.mrf.mxu0  ;;  %5601 = vmatprep.subr.bf16.mxu1 %v6864_v33 }
 0x382   :  { %v4991_v21 = vadd.f32 %v4990_v54, %v3503_v20 }
 0x383   :  { %v4992_v53 = vpop.f32.mrf.mxu0 }
 0x384   :  { %5602 = vmatpush2.bf16.msra.mxu1 %v6862_v6 }
 0x385   :  { %v4994_v15 = vpop.f32.mrf.mxu0  ;;  %5603 = vmatprep.subr.bf16.mxu1 %v6867_v34 }
 0x386   :  { %v5625_v15 = vrot.slane %v5620_v60, %v7168_v63 }
 0x387   :  { %v4995_v18 = vpop.f32.mrf.mxu0 }
 0x388   :  { %5604 = vmatpush2.bf16.msra.mxu1 %v6865_v12  ;;  %v5629_v18 = vrot.slane %v5620_v60, %v7173_v4 }
 0x38b   :  { %v4949_v61 = vpop.f32.mrf.mxu1 }
 0x38c   :  { %v4950_v62 = vadd.f32 %v4949_v61, %v7312_v19  ;;  %v3507_v19 = vrot.slane %v7298_v44, %v556_v49 }
 0x38d   :  { %v4951_v3 = vpop.f32.mrf.mxu1 }
 0x38e   :  { %vm5120_vm9 = vcmp.ge.f32.partialorder %v4950_v62, 0.0  ;;  %v5124_v7 = vmul.f32 0.2, %v4950_v62  ;;  %v4952_v8 = vadd.f32 %v4951_v3, %v7315_v40  ;;  %v4993_v22 = vadd.f32 %v4992_v53, %v3507_v19 }
 0x38f   :  { %v4953_v17 = vpop.f32.mrf.mxu1 }
 0x390   :  { %vm5121_vm10 = vcmp.ge.f32.partialorder %v4952_v8, 0.0  ;;  %v5125_v9 = vmul.f32 0.2, %v4952_v8  ;;  %v5128_v11 = vsel %vm5120_vm9, %v4950_v62, %v5124_v7  ;;  %v6372_v17 = vld [vmem:[#allocation2] ss:$0 sm:$0xff] }
 0x391   :  { %v4954_v2 = vpop.f32.mrf.mxu1  ;;  %v5132_v16 = vpack.c.bf16 %v5128_v11, %v5128_v11 }
 0x392   :  { %v5129_v13 = vsel %vm5121_vm10, %v4952_v8, %v5125_v9 }
 0x393   :  { %v5133_v14 = vpack.c.bf16 %v5129_v13, %v5129_v13 }
 0x395   :  { %5564 = vmatprep.mubr.bf16.mxu0 %v5133_v14 }
 0x396   :  { %5565 = vmatmul.mubr.bf16.vlgmr.msra.gmra.mxu0 %v5132_v16 }
 0x3c1   :  { %v5072_v29 = vpop.f32.mrf.mxu0 }
 0x3c3   :  { %v5074_v39 = vpop.f32.mrf.mxu0 }
 0x3c5   :  { %v5076_v37 = vpop.f32.mrf.mxu0 }
 0x3c7   :  { %v5077_v28 = vpop.f32.mrf.mxu0 }
 0x3cb   :  { %v5031_v40 = vpop.f32.mrf.mxu1 }
 0x3cc   :  { %v5032_v24 = vadd.f32 %v5031_v40, %v4991_v21 }
 0x3cd   :  { %v5033_v35 = vpop.f32.mrf.mxu1 }
 0x3ce   :  { %v5034_v25 = vadd.f32 %v5033_v35, %v4993_v22  ;;  %v5073_v38 = vadd.f32 %v5072_v29, %v5032_v24 }
 0x3cf   :  { %v5035_v58 = vpop.f32.mrf.mxu1 }
 0x3d0   :  { %v5075_v5 = vadd.f32 %v5074_v39, %v5034_v25 }
 0x3d1   :  { %v5036_v26 = vpop.f32.mrf.mxu1 }
 0x40b   :  { %v5113_v45 = vpop.f32.mrf.mxu1 }
 0x40c   :  { %v5114_v10 = vadd.f32 %v5113_v45, %v5073_v38 }
 0x40d   :  { %v5115_v31 = vpop.f32.mrf.mxu1 }
 0x40e   :  { %vm5122_vm11 = vcmp.ge.f32.partialorder %v5114_v10, 0.0  ;;  %v5126_v23 = vmul.f32 0.2, %v5114_v10  ;;  %v5116_v27 = vadd.f32 %v5115_v31, %v5075_v5 }
 0x40f   :  { %v5117_v52 = vpop.f32.mrf.mxu1 }
 0x410   :  { %vm5123_vm12 = vcmp.ge.f32.partialorder %v5116_v27, 0.0  ;;  %v5127_v49 = vmul.f32 0.2, %v5116_v27  ;;  %v5130_v44 = vsel %vm5122_vm11, %v5114_v10, %v5126_v23 }
 0x411   :  { %v5118_v56 = vpop.f32.mrf.mxu1  ;;  %v5134_v32 = vpack.c.bf16 %v5130_v44, %v5130_v44 }
 0x412   :  { %v5131_v51 = vsel %vm5123_vm12, %v5116_v27, %v5127_v49 }
 0x413   :  { %v5135_v41 = vpack.c.bf16 %v5131_v51, %v5131_v51 }
 0x415   :  { %5605 = vmatprep.mubr.bf16.mxu1 %v5135_v41 }
 0x416   :  { %5606 = vmatmul.mubr.bf16.vlgmr.msra.gmra.mxu1 %v5134_v32 }
 0x456   :  { %v5566_v0 = vpop.f32.mrf.mxu0 }
 0x457   :  { %v5567_v43 = vadd.f32 %v5566_v0, %v5205_v42 }
 0x458   :  { %v5568_v55 = vpop.f32.mrf.mxu0 }
 0x459   :  { %v5569_v47 = vadd.f32 %v5568_v55, %v5209_v59 }
 0x45a   :  { %v5570_v30 = vpop.f32.mrf.mxu0 }
 0x45c   :  { %v5571_v1 = vpop.f32.mrf.mxu0 }
 0x4d6   :  { %v5607_v46 = vpop.f32.mrf.mxu1 }
 0x4d7   :  { %v5608_v48 = vadd.f32 %v5607_v46, %v5567_v43 }
 0x4d8   :  { %v5609_v50 = vpop.f32.mrf.mxu1 }
 0x4d9   :  { %vm5614_vm13 = vcmp.ge.f32.partialorder %v5608_v48, 0.0  ;;  %v5616_v54 = vmul.f32 0.2, %v5608_v48  ;;  %v5610_v53 = vadd.f32 %v5609_v50, %v5569_v47 }
 0x4da   :  { %v5611_v57 = vpop.f32.mrf.mxu1 }
 0x4db   :  { %vm5615_vm14 = vcmp.ge.f32.partialorder %v5610_v53, 0.0  ;;  %v5617_v61 = vmul.f32 0.2, %v5610_v53  ;;  %v5618_v62 = vsel %vm5614_vm13, %v5608_v48, %v5616_v54 }
 0x4dc   :  { %v5612_v33 = vpop.f32.mrf.mxu1  ;;  %v5632_v6 = vmul.f32 %v5625_v15, %v5618_v62 }
 0x4dd   :  { %v5619_v3 = vsel %vm5615_vm14, %v5610_v53, %v5617_v61 }
 0x4de   :  { %v5633_v7 = vmul.f32 %v5629_v18, %v5619_v3 }
 0x4e0   :  { %v5634_v8 = vadd.f32 %v5633_v7, %v5632_v6 }
 0x4e2   :  { %5635 = vadd.xlane.f32.xlu0 %v5634_v8 }
 0x56b   :  { %v5636_v9 = vpop.xlane.xlu0 %5635 }
 0x56c   :  { %v5644_v34 = vadd.f32 %v6372_v17, %v5636_v9 }
 0x56e   :  { %5646 = vst.msk [vmem:[%s7342_s9] sm:$0xff] %vm5645_vm15, %v5644_v34 }
 0x56f   :  { %5651 = vsyncpa [#allocation4], 1 }
 0x570   :  { %5652 = vsyncpa [#allocation6], 1 }
 0x571   :  { %5653 = vsyncpa [#allocation9], 1 }
 0x572   :  { %5654 = vsyncpa [#allocation12], 1 }
 0x573   :  { %5655 = vsyncpa [#allocation15], 1 }

</bundles_post_ra>
